<compile_context>
chip_gen: v6e
topology: v6e:2x2x1
jax: 0.10.0
libtpu: 0.0.40
codegen_flags: <defaults>
</compile_context>

<pallas_src>
import functools

import numpy as np
import jax
import jax.numpy as jnp
from jax import lax
from jax.experimental import pallas as pl
from jax.experimental.pallas import tpu as pltpu


# --------------------------------------------------------------------------------------
# Compile-time constant builders (numpy; baked into the program at trace time)
# --------------------------------------------------------------------------------------
def _tap_masks(h, w):
    """(h*w, 9) f32: validity of each 3x3 tap (padding=1) for every raster position (y, x)."""
    m = np.zeros((h * w, 9), np.float32)
    for y in range(h):
        for x in range(w):
            u = y * w + x
            for dy in range(3):
                for dx in range(3):
                    yy, xx = y + dy - 1, x + dx - 1
                    if 0 <= yy < h and 0 <= xx < w:
                        m[u, dy * 3 + dx] = 1.0
    return m


def _pool_select(h, w):
    """(4*P, h*w) 0/1 f32 gathering the 2x2 pool-window elements, quadrant-major (P = h/2*w/2)."""
    ho, wo = h // 2, w // 2
    p = ho * wo
    s = np.zeros((4 * p, h * w), np.float32)
    for i in range(2):
        for j in range(2):
            q = i * 2 + j
            for yo in range(ho):
                for xo in range(wo):
                    s[q * p + yo * wo + xo, (2 * yo + i) * w + (2 * xo + j)] = 1.0
    return s


def _round_up(n, m):
    return ((n + m - 1) // m) * m


# --------------------------------------------------------------------------------------
# Fused kernel: conv1 -> BN1 -> ReLU -> pool1 -> conv2 -> BN2 -> ReLU -> pool2 -> fc1 -> fc2
# --------------------------------------------------------------------------------------
def _fused_kernel(x1e_ref, w1_ref, cp1_ref, m1_ref, sel1_ref,
                  w2_ref, cp2_ref, m2_ref, sel2_ref,
                  wf1_ref, bf1_ref, wf2_ref, bf2_ref, o_ref,
                  *, B, H, W, C, hidden):
    f32 = jnp.float32
    H2, W2 = H // 2, W // 2
    H4, W4 = H // 4, W // 4
    P1, P2 = H2 * W2, H4 * W4
    R1, R2 = B * H * W, B * P1

    # ---------------- layer 1: 3x3 conv (pad=1) as 9 shifted masked MXU dots ----------------
    O1 = W + 1                      # leading zero rows in the extended input slab
    m1 = m1_ref[...]                # (R1, 9) tap-validity masks
    cp1 = cp1_ref[...]              # (3, 64): [gamma, beta, conv_bias]
    acc1 = jnp.zeros((R1, 64), f32)
    for t in range(9):
        dy, dx = t // 3, t % 3
        s = O1 + (dy - 1) * W + (dx - 1)          # constant offset per tap
        lhs = x1e_ref[pl.ds(s, R1), :]            # (R1, C)
        wt = w1_ref[pl.ds(t * C, C), :]           # (C, 64)
        acc1 = acc1 + m1[:, t:t + 1] * jnp.dot(lhs, wt, preferred_element_type=f32)
    acc1 = acc1 + cp1[2:3, :]                     # conv bias (cancels under batch-stat BN)

    # ---------------- BN1 (training-mode batch stats, eps=1e-5) + affine ----------------
    mean1 = jnp.sum(acc1, axis=0, keepdims=True) * (1.0 / R1)
    d1 = acc1 - mean1
    var1 = jnp.sum(d1 * d1, axis=0, keepdims=True) * (1.0 / R1)    # biased var (PyTorch fwd)
    z1 = d1 * (cp1[0:1, :] * lax.rsqrt(var1 + 1e-5)) + cp1[1:2, :]

    # ------- per image: 2x2 maxpool (selection matmul + 4-block max) -> ReLU -> conv2 -------
    sel1 = sel1_ref[...]            # (4*P1, H*W)
    m2 = m2_ref[...]                # (P1, 9)
    cp2 = cp2_ref[...]              # (3, 64)
    O2 = W2 + 1
    zpad2 = jnp.zeros((O2, 64), f32)
    acc2_blocks = []
    for b in range(B):
        zb = z1[b * H * W:(b + 1) * H * W, :]                       # (H*W, 64), aligned slice
        qb = jnp.dot(sel1, zb, preferred_element_type=f32)          # (4*P1, 64) quadrant-major
        mb = jnp.maximum(jnp.maximum(qb[0:P1], qb[P1:2 * P1]),
                         jnp.maximum(qb[2 * P1:3 * P1], qb[3 * P1:4 * P1]))
        y1b = jnp.maximum(mb, 0.0)                                  # ReLU once, quarter size
        y1e = jnp.concatenate([zpad2, y1b, zpad2], axis=0)          # (P1 + 2*O2, 64)
        ab = jnp.zeros((P1, 64), f32)
        for t in range(9):
            dy, dx = t // 3, t % 3
            s = O2 + (dy - 1) * W2 + (dx - 1)
            wt = w2_ref[pl.ds(t * 64, 64), :]                       # (64, 64) -> K = 9*64 total
            ab = ab + m2[:, t:t + 1] * jnp.dot(y1e[s:s + P1, :], wt,
                                               preferred_element_type=f32)
        acc2_blocks.append(ab)
    acc2 = jnp.concatenate(acc2_blocks, axis=0) + cp2[2:3, :]       # (R2, 64)

    # ---------------- BN2 ----------------
    mean2 = jnp.sum(acc2, axis=0, keepdims=True) * (1.0 / R2)
    d2 = acc2 - mean2
    var2 = jnp.sum(d2 * d2, axis=0, keepdims=True) * (1.0 / R2)
    z2 = d2 * (cp2[0:1, :] * lax.rsqrt(var2 + 1e-5)) + cp2[1:2, :]

    # ------- per image: maxpool2 -> ReLU -> fc1 -> ReLU -> fc2 -> ReLU (all VMEM-resident) -------
    sel2 = sel2_ref[...]            # (4*P2, P1)
    bf1 = bf1_ref[...]              # (1, hidden)
    wf2 = wf2_ref[...]              # (1, hidden)  (fc2 weight as a row)
    bf2 = bf2_ref[...]              # (1, 1)
    outs = []
    for b in range(B):
        zb = z2[b * P1:(b + 1) * P1, :]                             # (P1, 64)
        qb = jnp.dot(sel2, zb, preferred_element_type=f32)          # (4*P2, 64)
        mb = jnp.maximum(jnp.maximum(qb[0:P2], qb[P2:2 * P2]),
                         jnp.maximum(qb[2 * P2:3 * P2], qb[3 * P2:4 * P2]))
        y2b = jnp.maximum(mb, 0.0)                                  # (P2, 64)
        # fc1 as a sum over spatial positions of (1,64)@(64,hidden) dots on the resident output
        # (PyTorch's NCHW flatten order is folded into wf1's row order at init: rows = (p, c)).
        hb = bf1
        for p in range(P2):
            hb = hb + jnp.dot(y2b[p:p + 1, :], wf1_ref[pl.ds(p * 64, 64), :],
                              preferred_element_type=f32)
        hb = jnp.maximum(hb, 0.0)                                   # (1, hidden)
        ob = jnp.maximum(jnp.sum(hb * wf2, axis=1, keepdims=True) + bf2, 0.0)   # (1, 1)
        outs.append(ob)
    o_ref[...] = jnp.concatenate(outs, axis=0)                      # (B, 1)


# --------------------------------------------------------------------------------------
# Wrapper: one pallas_call for the whole forward
# --------------------------------------------------------------------------------------
@jax.jit
def relation_network_forward(x_nchw, params):
    B, C, H, W = x_nchw.shape
    assert C == 128, "RelationNetwork.layer1 expects 128 input channels"
    assert H % 4 == 0 and W % 4 == 0, "two 2x2 pools require H, W divisible by 4"
    H2, W2 = H // 2, W // 2
    H4, W4 = H // 4, W // 4
    P1, P2 = H2 * W2, H4 * W4
    R1, R2 = B * H * W, B * P1
    hidden = params["bf1"].shape[1]

    # Flat NHWC raster (b, y, x) with a small zero head/tail so every conv tap is a
    # constant-offset slice of one slab (this replaces the old 9x im2col inflation).
    xf = jnp.transpose(x_nchw, (0, 2, 3, 1)).astype(jnp.float32).reshape(R1, C)
    O1 = W + 1
    R1e = _round_up(R1 + 2 * O1, 8)
    x1e = jnp.pad(xf, ((O1, R1e - R1 - O1), (0, 0)))

    # Compile-time constants: tap-validity masks (padding=1 borders) and pool selection matrices.
    m1 = jnp.asarray(np.tile(_tap_masks(H, W), (B, 1)))       # (R1, 9)
    sel1 = jnp.asarray(_pool_select(H, W))                    # (4*P1, H*W), per image
    m2 = jnp.asarray(_tap_masks(H2, W2))                      # (P1, 9), per image
    sel2 = jnp.asarray(_pool_select(H2, W2))                  # (4*P2, P1), per image

    inputs = [x1e, params["w1"], params["cp1"], m1, sel1,
              params["w2"], params["cp2"], m2, sel2,
              params["wf1"], params["bf1"], params["wf2"], params["bf2"]]

    def full_spec(a):
        shp = tuple(a.shape)
        return pl.BlockSpec(shp, lambda i, _n=len(shp): (0,) * _n)

    flops = (2 * R1 * 9 * C * 64 + 2 * R2 * 9 * 64 * 64
             + 2 * B * (4 * P1) * (H * W) * 64 + 2 * B * (4 * P2) * P1 * 64
             + 2 * B * P2 * 64 * hidden + 2 * B * hidden)
    bytes_accessed = sum(int(a.size) * 4 for a in inputs) + B * 4
    cost = pl.CostEstimate(flops=int(flops), transcendentals=128,
                           bytes_accessed=int(bytes_accessed))

    kernel = functools.partial(_fused_kernel, B=B, H=H, W=W, C=C, hidden=hidden)

    return pl.pallas_call(
        kernel,
        out_shape=jax.ShapeDtypeStruct((B, 1), jnp.float32),
        grid=(1,),
        in_specs=[full_spec(a) for a in inputs],
        out_specs=pl.BlockSpec((B, 1), lambda i: (0, 0)),
        compiler_params=pltpu.CompilerParams(
            dimension_semantics=("arbitrary",),
            vmem_limit_bytes=32 * 1024 * 1024),
        cost_estimate=cost,
    )(*inputs)


# --------------------------------------------------------------------------------------
# Deterministic parameters: "raw" (reference layout) + "packed" (kernel layout)
# --------------------------------------------------------------------------------------
def init_params(key, H, W, hidden):
    P2 = (H // 4) * (W // 4)
    input_size = 64 * P2
    ks = jax.random.split(key, 12)
    w1_hwio = jax.random.normal(ks[0], (3, 3, 128, 64), jnp.float32) * 0.05
    cb1 = 0.1 * jax.random.normal(ks[1], (64,), jnp.float32)
    g1 = 1.0 + 0.1 * jax.random.normal(ks[2], (64,), jnp.float32)
    be1 = 0.1 * jax.random.normal(ks[3], (64,), jnp.float32)
    w2_hwio = jax.random.normal(ks[4], (3, 3, 64, 64), jnp.float32) * 0.05
    cb2 = 0.1 * jax.random.normal(ks[5], (64,), jnp.float32)
    g2 = 1.0 + 0.1 * jax.random.normal(ks[6], (64,), jnp.float32)
    be2 = 0.1 * jax.random.normal(ks[7], (64,), jnp.float32)
    wt1 = jax.random.normal(ks[8], (hidden, input_size), jnp.float32) * 0.05   # torch layout
    bf1 = 0.1 * jax.random.normal(ks[9], (hidden,), jnp.float32)
    wt2 = jax.random.normal(ks[10], (1, hidden), jnp.float32) * 0.05
    bf2 = 0.25 + 0.1 * jax.random.normal(ks[11], (1,), jnp.float32)

    raw = dict(w1=w1_hwio, cb1=cb1, g1=g1, be1=be1,
               w2=w2_hwio, cb2=cb2, g2=g2, be2=be2,
               wt1=wt1, bf1=bf1, wt2=wt2, bf2=bf2)

    packed = dict(
        w1=w1_hwio.reshape(9 * 128, 64),                 # rows (dy, dx, cin)
        cp1=jnp.stack([g1, be1, cb1], axis=0),           # (3, 64): gamma, beta, conv bias
        w2=w2_hwio.reshape(9 * 64, 64),                  # K = 9*64 (no channel padding)
        cp2=jnp.stack([g2, be2, cb2], axis=0),
        # Fold PyTorch's NCHW .view() flatten order (idx = c*P2 + p) into fc1's rows, which the
        # kernel consumes in (spatial p, channel c) order -> no runtime transpose/reshape.
        wf1=wt1.reshape(hidden, 64, P2).transpose(2, 1, 0).reshape(P2 * 64, hidden),
        bf1=bf1.reshape(1, hidden),
        wf2=wt2,                                         # (1, hidden) row; fc2 = lane reduce
        bf2=bf2.reshape(1, 1),
    )
    return raw, packed


# --------------------------------------------------------------------------------------
# Pure-JAX reference (training-mode BN), for a self-check against the fused kernel
# --------------------------------------------------------------------------------------
@jax.jit
def reference_forward(x_nchw, raw):
    hp = lax.Precision.HIGHEST
    x = jnp.transpose(x_nchw, (0, 2, 3, 1)).astype(jnp.float32)

    def block(x, w_hwio, cb, g, be):
        y = lax.conv_general_dilated(
            x, w_hwio, window_strides=(1, 1), padding="SAME",
            dimension_numbers=("NHWC", "HWIO", "NHWC"), precision=hp) + cb
        mean = jnp.mean(y, axis=(0, 1, 2), keepdims=True)
        var = jnp.mean((y - mean) ** 2, axis=(0, 1, 2), keepdims=True)
        y = (y - mean) / jnp.sqrt(var + 1e-5) * g + be
        y = jnp.maximum(y, 0.0)
        b, hh, ww, c = y.shape
        return y.reshape(b, hh // 2, 2, ww // 2, 2, c).max(axis=(2, 4))

    y = block(x, raw["w1"], raw["cb1"], raw["g1"], raw["be1"])
    y = block(y, raw["w2"], raw["cb2"], raw["g2"], raw["be2"])
    feat = jnp.transpose(y, (0, 3, 1, 2)).reshape(y.shape[0], -1)     # NCHW .view() order
    h = jnp.maximum(jnp.dot(feat, raw["wt1"].T, precision=hp) + raw["bf1"], 0.0)
    return jnp.maximum(jnp.dot(h, raw["wt2"].T, precision=hp) + raw["bf2"], 0.0)


if __name__ == "__main__":
    # The module fixes 128 input channels; 8x8 spatial keeps both pools even.
    # After two conv+pool stages: 64 channels x 2 x 2 -> input_size = 256, hidden = 32.
    B, C, H, W = 2, 128, 8, 8
    hidden = 32

    key = jax.random.PRNGKey(0)
    kx, kp = jax.random.split(key)
    x = jax.random.normal(kx, (B, C, H, W), jnp.float32)     # NCHW, PyTorch convention
    raw, packed = init_params(kp, H, W, hidden)

    out = relation_network_forward(x, packed)
    out = jax.block_until_ready(out)
    assert out.shape == (B, 1), out.shape
    assert bool(jnp.all(jnp.isfinite(out))), "non-finite output"

    ref = jax.block_until_ready(reference_forward(x, raw))
    err = float(jnp.max(jnp.abs(out - ref)))
    assert err < 2e-2, f"mismatch vs pure-JAX reference (max abs err {err})"
    print("KERNEL_OK")
</pallas_src>

<mosaic_0001>
module attributes {stable_mosaic.version = 11 : i64} {
  func.func @_fused_kernel(%arg0: i32, %arg1: memref<152x128xf32, #tpu.memory_space<vmem>>, %arg2: memref<1152x64xf32, #tpu.memory_space<vmem>>, %arg3: memref<3x64xf32, #tpu.memory_space<vmem>>, %arg4: memref<128x9xf32, #tpu.memory_space<vmem>>, %arg5: memref<64x64xf32, #tpu.memory_space<vmem>>, %arg6: memref<576x64xf32, #tpu.memory_space<vmem>>, %arg7: memref<3x64xf32, #tpu.memory_space<vmem>>, %arg8: memref<16x9xf32, #tpu.memory_space<vmem>>, %arg9: memref<16x16xf32, #tpu.memory_space<vmem>>, %arg10: memref<256x32xf32, #tpu.memory_space<vmem>>, %arg11: memref<1x32xf32, #tpu.memory_space<vmem>>, %arg12: memref<1x32xf32, #tpu.memory_space<vmem>>, %arg13: memref<1x1xf32, #tpu.memory_space<vmem>>, %arg14: memref<2x1xf32, #tpu.memory_space<vmem>>) attributes {dimension_semantics = [#tpu.dimension_semantics<arbitrary>], iteration_bounds = array<i64: 1>, scalar_prefetch = 0 : i64, scratch_operands = 0 : i64, tpu.core_type = #tpu.core_type<tc>, window_params = [{pipeline_mode = #tpu.pipeline_mode<synchronous>, transform_indices = @transform_0, window_bounds = array<i64: 152, 128>}, {pipeline_mode = #tpu.pipeline_mode<synchronous>, transform_indices = @transform_1, window_bounds = array<i64: 1152, 64>}, {pipeline_mode = #tpu.pipeline_mode<synchronous>, transform_indices = @transform_2, window_bounds = array<i64: 3, 64>}, {pipeline_mode = #tpu.pipeline_mode<synchronous>, transform_indices = @transform_3, window_bounds = array<i64: 128, 9>}, {pipeline_mode = #tpu.pipeline_mode<synchronous>, transform_indices = @transform_4, window_bounds = array<i64: 64, 64>}, {pipeline_mode = #tpu.pipeline_mode<synchronous>, transform_indices = @transform_5, window_bounds = array<i64: 576, 64>}, {pipeline_mode = #tpu.pipeline_mode<synchronous>, transform_indices = @transform_6, window_bounds = array<i64: 3, 64>}, {pipeline_mode = #tpu.pipeline_mode<synchronous>, transform_indices = @transform_7, window_bounds = array<i64: 16, 9>}, {pipeline_mode = #tpu.pipeline_mode<synchronous>, transform_indices = @transform_8, window_bounds = array<i64: 16, 16>}, {pipeline_mode = #tpu.pipeline_mode<synchronous>, transform_indices = @transform_9, window_bounds = array<i64: 256, 32>}, {pipeline_mode = #tpu.pipeline_mode<synchronous>, transform_indices = @transform_10, window_bounds = array<i64: 1, 32>}, {pipeline_mode = #tpu.pipeline_mode<synchronous>, transform_indices = @transform_11, window_bounds = array<i64: 1, 32>}, {pipeline_mode = #tpu.pipeline_mode<synchronous>, transform_indices = @transform_12, window_bounds = array<i64: 1, 1>}, {pipeline_mode = #tpu.pipeline_mode<synchronous>, transform_indices = @transform_13, window_bounds = array<i64: 2, 1>}]} {
    %c0 = arith.constant 0 : index
    %c0_0 = arith.constant 0 : index
    %0 = vector.load %arg4[%c0, %c0_0] : memref<128x9xf32, #tpu.memory_space<vmem>>, vector<128x9xf32>
    %c0_1 = arith.constant 0 : index
    %c0_2 = arith.constant 0 : index
    %1 = vector.load %arg3[%c0_1, %c0_2] : memref<3x64xf32, #tpu.memory_space<vmem>>, vector<3x64xf32>
    %cst = arith.constant 0.000000e+00 : f32
    %2 = vector.broadcast %cst : f32 to vector<128x64xf32>
    %c0_3 = arith.constant 0 : index
    %c0_4 = arith.constant 0 : index
    %3 = vector.load %arg1[%c0_3, %c0_4] : memref<152x128xf32, #tpu.memory_space<vmem>>, vector<128x128xf32>
    %c0_5 = arith.constant 0 : index
    %c0_6 = arith.constant 0 : index
    %4 = vector.load %arg2[%c0_5, %c0_6] : memref<1152x64xf32, #tpu.memory_space<vmem>>, vector<128x64xf32>
    %5 = vector.extract_strided_slice %0 {offsets = [0, 0], sizes = [128, 1], strides = [1, 1]} : vector<128x9xf32> to vector<128x1xf32>
    %cst_7 = arith.constant dense<0.000000e+00> : vector<128x64xf32>
    %6 = tpu.matmul %3, %4, %cst_7 {dimension_numbers = #tpu.dot_dimension_numbers<[1], [0], [0], [1], [0, 0, 1, 1], [], []>} : vector<128x128xf32>, vector<128x64xf32>, vector<128x64xf32> -> vector<128x64xf32>
    %7 = vector.broadcast %5 : vector<128x1xf32> to vector<128x64xf32>
    %8 = arith.mulf %7, %6 : vector<128x64xf32>
    %9 = arith.addf %2, %8 : vector<128x64xf32>
    %c1 = arith.constant 1 : index
    %c0_8 = arith.constant 0 : index
    %10 = vector.load %arg1[%c1, %c0_8] : memref<152x128xf32, #tpu.memory_space<vmem>>, vector<128x128xf32>
    %c128 = arith.constant 128 : index
    %c0_9 = arith.constant 0 : index
    %11 = vector.load %arg2[%c128, %c0_9] : memref<1152x64xf32, #tpu.memory_space<vmem>>, vector<128x64xf32>
    %12 = vector.extract_strided_slice %0 {offsets = [0, 1], sizes = [128, 1], strides = [1, 1]} : vector<128x9xf32> to vector<128x1xf32>
    %cst_10 = arith.constant dense<0.000000e+00> : vector<128x64xf32>
    %13 = tpu.matmul %10, %11, %cst_10 {dimension_numbers = #tpu.dot_dimension_numbers<[1], [0], [0], [1], [0, 0, 1, 1], [], []>} : vector<128x128xf32>, vector<128x64xf32>, vector<128x64xf32> -> vector<128x64xf32>
    %14 = vector.broadcast %12 : vector<128x1xf32> to vector<128x64xf32>
    %15 = arith.mulf %14, %13 : vector<128x64xf32>
    %16 = arith.addf %9, %15 : vector<128x64xf32>
    %c2 = arith.constant 2 : index
    %c0_11 = arith.constant 0 : index
    %17 = vector.load %arg1[%c2, %c0_11] : memref<152x128xf32, #tpu.memory_space<vmem>>, vector<128x128xf32>
    %c256 = arith.constant 256 : index
    %c0_12 = arith.constant 0 : index
    %18 = vector.load %arg2[%c256, %c0_12] : memref<1152x64xf32, #tpu.memory_space<vmem>>, vector<128x64xf32>
    %19 = vector.extract_strided_slice %0 {offsets = [0, 2], sizes = [128, 1], strides = [1, 1]} : vector<128x9xf32> to vector<128x1xf32>
    %cst_13 = arith.constant dense<0.000000e+00> : vector<128x64xf32>
    %20 = tpu.matmul %17, %18, %cst_13 {dimension_numbers = #tpu.dot_dimension_numbers<[1], [0], [0], [1], [0, 0, 1, 1], [], []>} : vector<128x128xf32>, vector<128x64xf32>, vector<128x64xf32> -> vector<128x64xf32>
    %21 = vector.broadcast %19 : vector<128x1xf32> to vector<128x64xf32>
    %22 = arith.mulf %21, %20 : vector<128x64xf32>
    %23 = arith.addf %16, %22 : vector<128x64xf32>
    %c8 = arith.constant 8 : index
    %c0_14 = arith.constant 0 : index
    %24 = vector.load %arg1[%c8, %c0_14] : memref<152x128xf32, #tpu.memory_space<vmem>>, vector<128x128xf32>
    %c384 = arith.constant 384 : index
    %c0_15 = arith.constant 0 : index
    %25 = vector.load %arg2[%c384, %c0_15] : memref<1152x64xf32, #tpu.memory_space<vmem>>, vector<128x64xf32>
    %26 = vector.extract_strided_slice %0 {offsets = [0, 3], sizes = [128, 1], strides = [1, 1]} : vector<128x9xf32> to vector<128x1xf32>
    %cst_16 = arith.constant dense<0.000000e+00> : vector<128x64xf32>
    %27 = tpu.matmul %24, %25, %cst_16 {dimension_numbers = #tpu.dot_dimension_numbers<[1], [0], [0], [1], [0, 0, 1, 1], [], []>} : vector<128x128xf32>, vector<128x64xf32>, vector<128x64xf32> -> vector<128x64xf32>
    %28 = vector.broadcast %26 : vector<128x1xf32> to vector<128x64xf32>
    %29 = arith.mulf %28, %27 : vector<128x64xf32>
    %30 = arith.addf %23, %29 : vector<128x64xf32>
    %c9 = arith.constant 9 : index
    %c0_17 = arith.constant 0 : index
    %31 = vector.load %arg1[%c9, %c0_17] : memref<152x128xf32, #tpu.memory_space<vmem>>, vector<128x128xf32>
    %c512 = arith.constant 512 : index
    %c0_18 = arith.constant 0 : index
    %32 = vector.load %arg2[%c512, %c0_18] : memref<1152x64xf32, #tpu.memory_space<vmem>>, vector<128x64xf32>
    %33 = vector.extract_strided_slice %0 {offsets = [0, 4], sizes = [128, 1], strides = [1, 1]} : vector<128x9xf32> to vector<128x1xf32>
    %cst_19 = arith.constant dense<0.000000e+00> : vector<128x64xf32>
    %34 = tpu.matmul %31, %32, %cst_19 {dimension_numbers = #tpu.dot_dimension_numbers<[1], [0], [0], [1], [0, 0, 1, 1], [], []>} : vector<128x128xf32>, vector<128x64xf32>, vector<128x64xf32> -> vector<128x64xf32>
    %35 = vector.broadcast %33 : vector<128x1xf32> to vector<128x64xf32>
    %36 = arith.mulf %35, %34 : vector<128x64xf32>
    %37 = arith.addf %30, %36 : vector<128x64xf32>
    %c10 = arith.constant 10 : index
    %c0_20 = arith.constant 0 : index
    %38 = vector.load %arg1[%c10, %c0_20] : memref<152x128xf32, #tpu.memory_space<vmem>>, vector<128x128xf32>
    %c640 = arith.constant 640 : index
    %c0_21 = arith.constant 0 : index
    %39 = vector.load %arg2[%c640, %c0_21] : memref<1152x64xf32, #tpu.memory_space<vmem>>, vector<128x64xf32>
    %40 = vector.extract_strided_slice %0 {offsets = [0, 5], sizes = [128, 1], strides = [1, 1]} : vector<128x9xf32> to vector<128x1xf32>
    %cst_22 = arith.constant dense<0.000000e+00> : vector<128x64xf32>
    %41 = tpu.matmul %38, %39, %cst_22 {dimension_numbers = #tpu.dot_dimension_numbers<[1], [0], [0], [1], [0, 0, 1, 1], [], []>} : vector<128x128xf32>, vector<128x64xf32>, vector<128x64xf32> -> vector<128x64xf32>
    %42 = vector.broadcast %40 : vector<128x1xf32> to vector<128x64xf32>
    %43 = arith.mulf %42, %41 : vector<128x64xf32>
    %44 = arith.addf %37, %43 : vector<128x64xf32>
    %c16 = arith.constant 16 : index
    %c0_23 = arith.constant 0 : index
    %45 = vector.load %arg1[%c16, %c0_23] : memref<152x128xf32, #tpu.memory_space<vmem>>, vector<128x128xf32>
    %c768 = arith.constant 768 : index
    %c0_24 = arith.constant 0 : index
    %46 = vector.load %arg2[%c768, %c0_24] : memref<1152x64xf32, #tpu.memory_space<vmem>>, vector<128x64xf32>
    %47 = vector.extract_strided_slice %0 {offsets = [0, 6], sizes = [128, 1], strides = [1, 1]} : vector<128x9xf32> to vector<128x1xf32>
    %cst_25 = arith.constant dense<0.000000e+00> : vector<128x64xf32>
    %48 = tpu.matmul %45, %46, %cst_25 {dimension_numbers = #tpu.dot_dimension_numbers<[1], [0], [0], [1], [0, 0, 1, 1], [], []>} : vector<128x128xf32>, vector<128x64xf32>, vector<128x64xf32> -> vector<128x64xf32>
    %49 = vector.broadcast %47 : vector<128x1xf32> to vector<128x64xf32>
    %50 = arith.mulf %49, %48 : vector<128x64xf32>
    %51 = arith.addf %44, %50 : vector<128x64xf32>
    %c17 = arith.constant 17 : index
    %c0_26 = arith.constant 0 : index
    %52 = vector.load %arg1[%c17, %c0_26] : memref<152x128xf32, #tpu.memory_space<vmem>>, vector<128x128xf32>
    %c896 = arith.constant 896 : index
    %c0_27 = arith.constant 0 : index
    %53 = vector.load %arg2[%c896, %c0_27] : memref<1152x64xf32, #tpu.memory_space<vmem>>, vector<128x64xf32>
    %54 = vector.extract_strided_slice %0 {offsets = [0, 7], sizes = [128, 1], strides = [1, 1]} : vector<128x9xf32> to vector<128x1xf32>
    %cst_28 = arith.constant dense<0.000000e+00> : vector<128x64xf32>
    %55 = tpu.matmul %52, %53, %cst_28 {dimension_numbers = #tpu.dot_dimension_numbers<[1], [0], [0], [1], [0, 0, 1, 1], [], []>} : vector<128x128xf32>, vector<128x64xf32>, vector<128x64xf32> -> vector<128x64xf32>
    %56 = vector.broadcast %54 : vector<128x1xf32> to vector<128x64xf32>
    %57 = arith.mulf %56, %55 : vector<128x64xf32>
    %58 = arith.addf %51, %57 : vector<128x64xf32>
    %c18 = arith.constant 18 : index
    %c0_29 = arith.constant 0 : index
    %59 = vector.load %arg1[%c18, %c0_29] : memref<152x128xf32, #tpu.memory_space<vmem>>, vector<128x128xf32>
    %c1024 = arith.constant 1024 : index
    %c0_30 = arith.constant 0 : index
    %60 = vector.load %arg2[%c1024, %c0_30] : memref<1152x64xf32, #tpu.memory_space<vmem>>, vector<128x64xf32>
    %61 = vector.extract_strided_slice %0 {offsets = [0, 8], sizes = [128, 1], strides = [1, 1]} : vector<128x9xf32> to vector<128x1xf32>
    %cst_31 = arith.constant dense<0.000000e+00> : vector<128x64xf32>
    %62 = tpu.matmul %59, %60, %cst_31 {dimension_numbers = #tpu.dot_dimension_numbers<[1], [0], [0], [1], [0, 0, 1, 1], [], []>} : vector<128x128xf32>, vector<128x64xf32>, vector<128x64xf32> -> vector<128x64xf32>
    %63 = vector.broadcast %61 : vector<128x1xf32> to vector<128x64xf32>
    %64 = arith.mulf %63, %62 : vector<128x64xf32>
    %65 = arith.addf %58, %64 : vector<128x64xf32>
    %66 = vector.extract_strided_slice %1 {offsets = [2, 0], sizes = [1, 64], strides = [1, 1]} : vector<3x64xf32> to vector<1x64xf32>
    %67 = vector.broadcast %66 : vector<1x64xf32> to vector<128x64xf32>
    %68 = arith.addf %65, %67 : vector<128x64xf32>
    %cst_32 = arith.constant dense<0.000000e+00> : vector<64xf32>
    %69 = vector.multi_reduction <add>, %68, %cst_32 [0] : vector<128x64xf32> to vector<64xf32>
    %70 = vector.shape_cast %69 : vector<64xf32> to vector<1x64xf32>
    %cst_33 = arith.constant 7.812500e-03 : f32
    %71 = vector.broadcast %cst_33 : f32 to vector<1x64xf32>
    %72 = arith.mulf %70, %71 : vector<1x64xf32>
    %73 = vector.broadcast %72 : vector<1x64xf32> to vector<128x64xf32>
    %74 = arith.subf %68, %73 : vector<128x64xf32>
    %75 = arith.mulf %74, %74 : vector<128x64xf32>
    %cst_34 = arith.constant dense<0.000000e+00> : vector<64xf32>
    %76 = vector.multi_reduction <add>, %75, %cst_34 [0] : vector<128x64xf32> to vector<64xf32>
    %77 = vector.shape_cast %76 : vector<64xf32> to vector<1x64xf32>
    %cst_35 = arith.constant 7.812500e-03 : f32
    %78 = vector.broadcast %cst_35 : f32 to vector<1x64xf32>
    %79 = arith.mulf %77, %78 : vector<1x64xf32>
    %80 = vector.extract_strided_slice %1 {offsets = [0, 0], sizes = [1, 64], strides = [1, 1]} : vector<3x64xf32> to vector<1x64xf32>
    %cst_36 = arith.constant 9.99999974E-6 : f32
    %81 = vector.broadcast %cst_36 : f32 to vector<1x64xf32>
    %82 = arith.addf %79, %81 : vector<1x64xf32>
    %83 = math.rsqrt %82 : vector<1x64xf32>
    %84 = arith.mulf %80, %83 : vector<1x64xf32>
    %85 = vector.broadcast %84 : vector<1x64xf32> to vector<128x64xf32>
    %86 = arith.mulf %74, %85 : vector<128x64xf32>
    %87 = vector.extract_strided_slice %1 {offsets = [1, 0], sizes = [1, 64], strides = [1, 1]} : vector<3x64xf32> to vector<1x64xf32>
    %88 = vector.broadcast %87 : vector<1x64xf32> to vector<128x64xf32>
    %89 = arith.addf %86, %88 : vector<128x64xf32>
    %c0_37 = arith.constant 0 : index
    %c0_38 = arith.constant 0 : index
    %90 = vector.load %arg5[%c0_37, %c0_38] : memref<64x64xf32, #tpu.memory_space<vmem>>, vector<64x64xf32>
    %c0_39 = arith.constant 0 : index
    %c0_40 = arith.constant 0 : index
    %91 = vector.load %arg8[%c0_39, %c0_40] : memref<16x9xf32, #tpu.memory_space<vmem>>, vector<16x9xf32>
    %c0_41 = arith.constant 0 : index
    %c0_42 = arith.constant 0 : index
    %92 = vector.load %arg7[%c0_41, %c0_42] : memref<3x64xf32, #tpu.memory_space<vmem>>, vector<3x64xf32>
    %cst_43 = arith.constant 0.000000e+00 : f32
    %93 = vector.broadcast %cst_43 : f32 to vector<5x64xf32>
    %94 = vector.extract_strided_slice %89 {offsets = [0, 0], sizes = [64, 64], strides = [1, 1]} : vector<128x64xf32> to vector<64x64xf32>
    %cst_44 = arith.constant dense<0.000000e+00> : vector<64x64xf32>
    %95 = tpu.matmul %90, %94, %cst_44 {dimension_numbers = #tpu.dot_dimension_numbers<[1], [0], [0], [1], [0, 0, 1, 1], [], []>} : vector<64x64xf32>, vector<64x64xf32>, vector<64x64xf32> -> vector<64x64xf32>
    %96 = vector.extract_strided_slice %95 {offsets = [0, 0], sizes = [16, 64], strides = [1, 1]} : vector<64x64xf32> to vector<16x64xf32>
    %97 = vector.extract_strided_slice %95 {offsets = [16, 0], sizes = [16, 64], strides = [1, 1]} : vector<64x64xf32> to vector<16x64xf32>
    %98 = arith.maximumf %96, %97 : vector<16x64xf32>
    %99 = vector.extract_strided_slice %95 {offsets = [32, 0], sizes = [16, 64], strides = [1, 1]} : vector<64x64xf32> to vector<16x64xf32>
    %100 = vector.extract_strided_slice %95 {offsets = [48, 0], sizes = [16, 64], strides = [1, 1]} : vector<64x64xf32> to vector<16x64xf32>
    %101 = arith.maximumf %99, %100 : vector<16x64xf32>
    %102 = arith.maximumf %98, %101 : vector<16x64xf32>
    %cst_45 = arith.constant 0.000000e+00 : f32
    %103 = vector.broadcast %cst_45 : f32 to vector<16x64xf32>
    %104 = arith.maximumf %102, %103 : vector<16x64xf32>
    %105 = tpu.concatenate %93, %104, %93 in 0 : vector<5x64xf32>, vector<16x64xf32>, vector<5x64xf32> -> vector<26x64xf32>
    %cst_46 = arith.constant 0.000000e+00 : f32
    %106 = vector.broadcast %cst_46 : f32 to vector<16x64xf32>
    %c0_47 = arith.constant 0 : index
    %c0_48 = arith.constant 0 : index
    %107 = vector.load %arg6[%c0_47, %c0_48] : memref<576x64xf32, #tpu.memory_space<vmem>>, vector<64x64xf32>
    %108 = vector.extract_strided_slice %91 {offsets = [0, 0], sizes = [16, 1], strides = [1, 1]} : vector<16x9xf32> to vector<16x1xf32>
    %109 = vector.extract_strided_slice %105 {offsets = [0, 0], sizes = [16, 64], strides = [1, 1]} : vector<26x64xf32> to vector<16x64xf32>
    %cst_49 = arith.constant dense<0.000000e+00> : vector<16x64xf32>
    %110 = tpu.matmul %109, %107, %cst_49 {dimension_numbers = #tpu.dot_dimension_numbers<[1], [0], [0], [1], [0, 0, 1, 1], [], []>} : vector<16x64xf32>, vector<64x64xf32>, vector<16x64xf32> -> vector<16x64xf32>
    %111 = vector.broadcast %108 : vector<16x1xf32> to vector<16x64xf32>
    %112 = arith.mulf %111, %110 : vector<16x64xf32>
    %113 = arith.addf %106, %112 : vector<16x64xf32>
    %c64 = arith.constant 64 : index
    %c0_50 = arith.constant 0 : index
    %114 = vector.load %arg6[%c64, %c0_50] : memref<576x64xf32, #tpu.memory_space<vmem>>, vector<64x64xf32>
    %115 = vector.extract_strided_slice %91 {offsets = [0, 1], sizes = [16, 1], strides = [1, 1]} : vector<16x9xf32> to vector<16x1xf32>
    %116 = vector.extract_strided_slice %105 {offsets = [1, 0], sizes = [16, 64], strides = [1, 1]} : vector<26x64xf32> to vector<16x64xf32>
    %cst_51 = arith.constant dense<0.000000e+00> : vector<16x64xf32>
    %117 = tpu.matmul %116, %114, %cst_51 {dimension_numbers = #tpu.dot_dimension_numbers<[1], [0], [0], [1], [0, 0, 1, 1], [], []>} : vector<16x64xf32>, vector<64x64xf32>, vector<16x64xf32> -> vector<16x64xf32>
    %118 = vector.broadcast %115 : vector<16x1xf32> to vector<16x64xf32>
    %119 = arith.mulf %118, %117 : vector<16x64xf32>
    %120 = arith.addf %113, %119 : vector<16x64xf32>
    %c128_52 = arith.constant 128 : index
    %c0_53 = arith.constant 0 : index
    %121 = vector.load %arg6[%c128_52, %c0_53] : memref<576x64xf32, #tpu.memory_space<vmem>>, vector<64x64xf32>
    %122 = vector.extract_strided_slice %91 {offsets = [0, 2], sizes = [16, 1], strides = [1, 1]} : vector<16x9xf32> to vector<16x1xf32>
    %123 = vector.extract_strided_slice %105 {offsets = [2, 0], sizes = [16, 64], strides = [1, 1]} : vector<26x64xf32> to vector<16x64xf32>
    %cst_54 = arith.constant dense<0.000000e+00> : vector<16x64xf32>
    %124 = tpu.matmul %123, %121, %cst_54 {dimension_numbers = #tpu.dot_dimension_numbers<[1], [0], [0], [1], [0, 0, 1, 1], [], []>} : vector<16x64xf32>, vector<64x64xf32>, vector<16x64xf32> -> vector<16x64xf32>
    %125 = vector.broadcast %122 : vector<16x1xf32> to vector<16x64xf32>
    %126 = arith.mulf %125, %124 : vector<16x64xf32>
    %127 = arith.addf %120, %126 : vector<16x64xf32>
    %c192 = arith.constant 192 : index
    %c0_55 = arith.constant 0 : index
    %128 = vector.load %arg6[%c192, %c0_55] : memref<576x64xf32, #tpu.memory_space<vmem>>, vector<64x64xf32>
    %129 = vector.extract_strided_slice %91 {offsets = [0, 3], sizes = [16, 1], strides = [1, 1]} : vector<16x9xf32> to vector<16x1xf32>
    %130 = vector.extract_strided_slice %105 {offsets = [4, 0], sizes = [16, 64], strides = [1, 1]} : vector<26x64xf32> to vector<16x64xf32>
    %cst_56 = arith.constant dense<0.000000e+00> : vector<16x64xf32>
    %131 = tpu.matmul %130, %128, %cst_56 {dimension_numbers = #tpu.dot_dimension_numbers<[1], [0], [0], [1], [0, 0, 1, 1], [], []>} : vector<16x64xf32>, vector<64x64xf32>, vector<16x64xf32> -> vector<16x64xf32>
    %132 = vector.broadcast %129 : vector<16x1xf32> to vector<16x64xf32>
    %133 = arith.mulf %132, %131 : vector<16x64xf32>
    %134 = arith.addf %127, %133 : vector<16x64xf32>
    %c256_57 = arith.constant 256 : index
    %c0_58 = arith.constant 0 : index
    %135 = vector.load %arg6[%c256_57, %c0_58] : memref<576x64xf32, #tpu.memory_space<vmem>>, vector<64x64xf32>
    %136 = vector.extract_strided_slice %91 {offsets = [0, 4], sizes = [16, 1], strides = [1, 1]} : vector<16x9xf32> to vector<16x1xf32>
    %137 = vector.extract_strided_slice %105 {offsets = [5, 0], sizes = [16, 64], strides = [1, 1]} : vector<26x64xf32> to vector<16x64xf32>
    %cst_59 = arith.constant dense<0.000000e+00> : vector<16x64xf32>
    %138 = tpu.matmul %137, %135, %cst_59 {dimension_numbers = #tpu.dot_dimension_numbers<[1], [0], [0], [1], [0, 0, 1, 1], [], []>} : vector<16x64xf32>, vector<64x64xf32>, vector<16x64xf32> -> vector<16x64xf32>
    %139 = vector.broadcast %136 : vector<16x1xf32> to vector<16x64xf32>
    %140 = arith.mulf %139, %138 : vector<16x64xf32>
    %141 = arith.addf %134, %140 : vector<16x64xf32>
    %c320 = arith.constant 320 : index
    %c0_60 = arith.constant 0 : index
    %142 = vector.load %arg6[%c320, %c0_60] : memref<576x64xf32, #tpu.memory_space<vmem>>, vector<64x64xf32>
    %143 = vector.extract_strided_slice %91 {offsets = [0, 5], sizes = [16, 1], strides = [1, 1]} : vector<16x9xf32> to vector<16x1xf32>
    %144 = vector.extract_strided_slice %105 {offsets = [6, 0], sizes = [16, 64], strides = [1, 1]} : vector<26x64xf32> to vector<16x64xf32>
    %cst_61 = arith.constant dense<0.000000e+00> : vector<16x64xf32>
    %145 = tpu.matmul %144, %142, %cst_61 {dimension_numbers = #tpu.dot_dimension_numbers<[1], [0], [0], [1], [0, 0, 1, 1], [], []>} : vector<16x64xf32>, vector<64x64xf32>, vector<16x64xf32> -> vector<16x64xf32>
    %146 = vector.broadcast %143 : vector<16x1xf32> to vector<16x64xf32>
    %147 = arith.mulf %146, %145 : vector<16x64xf32>
    %148 = arith.addf %141, %147 : vector<16x64xf32>
    %c384_62 = arith.constant 384 : index
    %c0_63 = arith.constant 0 : index
    %149 = vector.load %arg6[%c384_62, %c0_63] : memref<576x64xf32, #tpu.memory_space<vmem>>, vector<64x64xf32>
    %150 = vector.extract_strided_slice %91 {offsets = [0, 6], sizes = [16, 1], strides = [1, 1]} : vector<16x9xf32> to vector<16x1xf32>
    %151 = vector.extract_strided_slice %105 {offsets = [8, 0], sizes = [16, 64], strides = [1, 1]} : vector<26x64xf32> to vector<16x64xf32>
    %cst_64 = arith.constant dense<0.000000e+00> : vector<16x64xf32>
    %152 = tpu.matmul %151, %149, %cst_64 {dimension_numbers = #tpu.dot_dimension_numbers<[1], [0], [0], [1], [0, 0, 1, 1], [], []>} : vector<16x64xf32>, vector<64x64xf32>, vector<16x64xf32> -> vector<16x64xf32>
    %153 = vector.broadcast %150 : vector<16x1xf32> to vector<16x64xf32>
    %154 = arith.mulf %153, %152 : vector<16x64xf32>
    %155 = arith.addf %148, %154 : vector<16x64xf32>
    %c448 = arith.constant 448 : index
    %c0_65 = arith.constant 0 : index
    %156 = vector.load %arg6[%c448, %c0_65] : memref<576x64xf32, #tpu.memory_space<vmem>>, vector<64x64xf32>
    %157 = vector.extract_strided_slice %91 {offsets = [0, 7], sizes = [16, 1], strides = [1, 1]} : vector<16x9xf32> to vector<16x1xf32>
    %158 = vector.extract_strided_slice %105 {offsets = [9, 0], sizes = [16, 64], strides = [1, 1]} : vector<26x64xf32> to vector<16x64xf32>
    %cst_66 = arith.constant dense<0.000000e+00> : vector<16x64xf32>
    %159 = tpu.matmul %158, %156, %cst_66 {dimension_numbers = #tpu.dot_dimension_numbers<[1], [0], [0], [1], [0, 0, 1, 1], [], []>} : vector<16x64xf32>, vector<64x64xf32>, vector<16x64xf32> -> vector<16x64xf32>
    %160 = vector.broadcast %157 : vector<16x1xf32> to vector<16x64xf32>
    %161 = arith.mulf %160, %159 : vector<16x64xf32>
    %162 = arith.addf %155, %161 : vector<16x64xf32>
    %c512_67 = arith.constant 512 : index
    %c0_68 = arith.constant 0 : index
    %163 = vector.load %arg6[%c512_67, %c0_68] : memref<576x64xf32, #tpu.memory_space<vmem>>, vector<64x64xf32>
    %164 = vector.extract_strided_slice %91 {offsets = [0, 8], sizes = [16, 1], strides = [1, 1]} : vector<16x9xf32> to vector<16x1xf32>
    %165 = vector.extract_strided_slice %105 {offsets = [10, 0], sizes = [16, 64], strides = [1, 1]} : vector<26x64xf32> to vector<16x64xf32>
    %cst_69 = arith.constant dense<0.000000e+00> : vector<16x64xf32>
    %166 = tpu.matmul %165, %163, %cst_69 {dimension_numbers = #tpu.dot_dimension_numbers<[1], [0], [0], [1], [0, 0, 1, 1], [], []>} : vector<16x64xf32>, vector<64x64xf32>, vector<16x64xf32> -> vector<16x64xf32>
    %167 = vector.broadcast %164 : vector<16x1xf32> to vector<16x64xf32>
    %168 = arith.mulf %167, %166 : vector<16x64xf32>
    %169 = arith.addf %162, %168 : vector<16x64xf32>
    %170 = vector.extract_strided_slice %89 {offsets = [64, 0], sizes = [64, 64], strides = [1, 1]} : vector<128x64xf32> to vector<64x64xf32>
    %cst_70 = arith.constant dense<0.000000e+00> : vector<64x64xf32>
    %171 = tpu.matmul %90, %170, %cst_70 {dimension_numbers = #tpu.dot_dimension_numbers<[1], [0], [0], [1], [0, 0, 1, 1], [], []>} : vector<64x64xf32>, vector<64x64xf32>, vector<64x64xf32> -> vector<64x64xf32>
    %172 = vector.extract_strided_slice %171 {offsets = [0, 0], sizes = [16, 64], strides = [1, 1]} : vector<64x64xf32> to vector<16x64xf32>
    %173 = vector.extract_strided_slice %171 {offsets = [16, 0], sizes = [16, 64], strides = [1, 1]} : vector<64x64xf32> to vector<16x64xf32>
    %174 = arith.maximumf %172, %173 : vector<16x64xf32>
    %175 = vector.extract_strided_slice %171 {offsets = [32, 0], sizes = [16, 64], strides = [1, 1]} : vector<64x64xf32> to vector<16x64xf32>
    %176 = vector.extract_strided_slice %171 {offsets = [48, 0], sizes = [16, 64], strides = [1, 1]} : vector<64x64xf32> to vector<16x64xf32>
    %177 = arith.maximumf %175, %176 : vector<16x64xf32>
    %178 = arith.maximumf %174, %177 : vector<16x64xf32>
    %cst_71 = arith.constant 0.000000e+00 : f32
    %179 = vector.broadcast %cst_71 : f32 to vector<16x64xf32>
    %180 = arith.maximumf %178, %179 : vector<16x64xf32>
    %181 = tpu.concatenate %93, %180, %93 in 0 : vector<5x64xf32>, vector<16x64xf32>, vector<5x64xf32> -> vector<26x64xf32>
    %cst_72 = arith.constant 0.000000e+00 : f32
    %182 = vector.broadcast %cst_72 : f32 to vector<16x64xf32>
    %c0_73 = arith.constant 0 : index
    %c0_74 = arith.constant 0 : index
    %183 = vector.load %arg6[%c0_73, %c0_74] : memref<576x64xf32, #tpu.memory_space<vmem>>, vector<64x64xf32>
    %184 = vector.extract_strided_slice %91 {offsets = [0, 0], sizes = [16, 1], strides = [1, 1]} : vector<16x9xf32> to vector<16x1xf32>
    %185 = vector.extract_strided_slice %181 {offsets = [0, 0], sizes = [16, 64], strides = [1, 1]} : vector<26x64xf32> to vector<16x64xf32>
    %cst_75 = arith.constant dense<0.000000e+00> : vector<16x64xf32>
    %186 = tpu.matmul %185, %183, %cst_75 {dimension_numbers = #tpu.dot_dimension_numbers<[1], [0], [0], [1], [0, 0, 1, 1], [], []>} : vector<16x64xf32>, vector<64x64xf32>, vector<16x64xf32> -> vector<16x64xf32>
    %187 = vector.broadcast %184 : vector<16x1xf32> to vector<16x64xf32>
    %188 = arith.mulf %187, %186 : vector<16x64xf32>
    %189 = arith.addf %182, %188 : vector<16x64xf32>
    %c64_76 = arith.constant 64 : index
    %c0_77 = arith.constant 0 : index
    %190 = vector.load %arg6[%c64_76, %c0_77] : memref<576x64xf32, #tpu.memory_space<vmem>>, vector<64x64xf32>
    %191 = vector.extract_strided_slice %91 {offsets = [0, 1], sizes = [16, 1], strides = [1, 1]} : vector<16x9xf32> to vector<16x1xf32>
    %192 = vector.extract_strided_slice %181 {offsets = [1, 0], sizes = [16, 64], strides = [1, 1]} : vector<26x64xf32> to vector<16x64xf32>
    %cst_78 = arith.constant dense<0.000000e+00> : vector<16x64xf32>
    %193 = tpu.matmul %192, %190, %cst_78 {dimension_numbers = #tpu.dot_dimension_numbers<[1], [0], [0], [1], [0, 0, 1, 1], [], []>} : vector<16x64xf32>, vector<64x64xf32>, vector<16x64xf32> -> vector<16x64xf32>
    %194 = vector.broadcast %191 : vector<16x1xf32> to vector<16x64xf32>
    %195 = arith.mulf %194, %193 : vector<16x64xf32>
    %196 = arith.addf %189, %195 : vector<16x64xf32>
    %c128_79 = arith.constant 128 : index
    %c0_80 = arith.constant 0 : index
    %197 = vector.load %arg6[%c128_79, %c0_80] : memref<576x64xf32, #tpu.memory_space<vmem>>, vector<64x64xf32>
    %198 = vector.extract_strided_slice %91 {offsets = [0, 2], sizes = [16, 1], strides = [1, 1]} : vector<16x9xf32> to vector<16x1xf32>
    %199 = vector.extract_strided_slice %181 {offsets = [2, 0], sizes = [16, 64], strides = [1, 1]} : vector<26x64xf32> to vector<16x64xf32>
    %cst_81 = arith.constant dense<0.000000e+00> : vector<16x64xf32>
    %200 = tpu.matmul %199, %197, %cst_81 {dimension_numbers = #tpu.dot_dimension_numbers<[1], [0], [0], [1], [0, 0, 1, 1], [], []>} : vector<16x64xf32>, vector<64x64xf32>, vector<16x64xf32> -> vector<16x64xf32>
    %201 = vector.broadcast %198 : vector<16x1xf32> to vector<16x64xf32>
    %202 = arith.mulf %201, %200 : vector<16x64xf32>
    %203 = arith.addf %196, %202 : vector<16x64xf32>
    %c192_82 = arith.constant 192 : index
    %c0_83 = arith.constant 0 : index
    %204 = vector.load %arg6[%c192_82, %c0_83] : memref<576x64xf32, #tpu.memory_space<vmem>>, vector<64x64xf32>
    %205 = vector.extract_strided_slice %91 {offsets = [0, 3], sizes = [16, 1], strides = [1, 1]} : vector<16x9xf32> to vector<16x1xf32>
    %206 = vector.extract_strided_slice %181 {offsets = [4, 0], sizes = [16, 64], strides = [1, 1]} : vector<26x64xf32> to vector<16x64xf32>
    %cst_84 = arith.constant dense<0.000000e+00> : vector<16x64xf32>
    %207 = tpu.matmul %206, %204, %cst_84 {dimension_numbers = #tpu.dot_dimension_numbers<[1], [0], [0], [1], [0, 0, 1, 1], [], []>} : vector<16x64xf32>, vector<64x64xf32>, vector<16x64xf32> -> vector<16x64xf32>
    %208 = vector.broadcast %205 : vector<16x1xf32> to vector<16x64xf32>
    %209 = arith.mulf %208, %207 : vector<16x64xf32>
    %210 = arith.addf %203, %209 : vector<16x64xf32>
    %c256_85 = arith.constant 256 : index
    %c0_86 = arith.constant 0 : index
    %211 = vector.load %arg6[%c256_85, %c0_86] : memref<576x64xf32, #tpu.memory_space<vmem>>, vector<64x64xf32>
    %212 = vector.extract_strided_slice %91 {offsets = [0, 4], sizes = [16, 1], strides = [1, 1]} : vector<16x9xf32> to vector<16x1xf32>
    %213 = vector.extract_strided_slice %181 {offsets = [5, 0], sizes = [16, 64], strides = [1, 1]} : vector<26x64xf32> to vector<16x64xf32>
    %cst_87 = arith.constant dense<0.000000e+00> : vector<16x64xf32>
    %214 = tpu.matmul %213, %211, %cst_87 {dimension_numbers = #tpu.dot_dimension_numbers<[1], [0], [0], [1], [0, 0, 1, 1], [], []>} : vector<16x64xf32>, vector<64x64xf32>, vector<16x64xf32> -> vector<16x64xf32>
    %215 = vector.broadcast %212 : vector<16x1xf32> to vector<16x64xf32>
    %216 = arith.mulf %215, %214 : vector<16x64xf32>
    %217 = arith.addf %210, %216 : vector<16x64xf32>
    %c320_88 = arith.constant 320 : index
    %c0_89 = arith.constant 0 : index
    %218 = vector.load %arg6[%c320_88, %c0_89] : memref<576x64xf32, #tpu.memory_space<vmem>>, vector<64x64xf32>
    %219 = vector.extract_strided_slice %91 {offsets = [0, 5], sizes = [16, 1], strides = [1, 1]} : vector<16x9xf32> to vector<16x1xf32>
    %220 = vector.extract_strided_slice %181 {offsets = [6, 0], sizes = [16, 64], strides = [1, 1]} : vector<26x64xf32> to vector<16x64xf32>
    %cst_90 = arith.constant dense<0.000000e+00> : vector<16x64xf32>
    %221 = tpu.matmul %220, %218, %cst_90 {dimension_numbers = #tpu.dot_dimension_numbers<[1], [0], [0], [1], [0, 0, 1, 1], [], []>} : vector<16x64xf32>, vector<64x64xf32>, vector<16x64xf32> -> vector<16x64xf32>
    %222 = vector.broadcast %219 : vector<16x1xf32> to vector<16x64xf32>
    %223 = arith.mulf %222, %221 : vector<16x64xf32>
    %224 = arith.addf %217, %223 : vector<16x64xf32>
    %c384_91 = arith.constant 384 : index
    %c0_92 = arith.constant 0 : index
    %225 = vector.load %arg6[%c384_91, %c0_92] : memref<576x64xf32, #tpu.memory_space<vmem>>, vector<64x64xf32>
    %226 = vector.extract_strided_slice %91 {offsets = [0, 6], sizes = [16, 1], strides = [1, 1]} : vector<16x9xf32> to vector<16x1xf32>
    %227 = vector.extract_strided_slice %181 {offsets = [8, 0], sizes = [16, 64], strides = [1, 1]} : vector<26x64xf32> to vector<16x64xf32>
    %cst_93 = arith.constant dense<0.000000e+00> : vector<16x64xf32>
    %228 = tpu.matmul %227, %225, %cst_93 {dimension_numbers = #tpu.dot_dimension_numbers<[1], [0], [0], [1], [0, 0, 1, 1], [], []>} : vector<16x64xf32>, vector<64x64xf32>, vector<16x64xf32> -> vector<16x64xf32>
    %229 = vector.broadcast %226 : vector<16x1xf32> to vector<16x64xf32>
    %230 = arith.mulf %229, %228 : vector<16x64xf32>
    %231 = arith.addf %224, %230 : vector<16x64xf32>
    %c448_94 = arith.constant 448 : index
    %c0_95 = arith.constant 0 : index
    %232 = vector.load %arg6[%c448_94, %c0_95] : memref<576x64xf32, #tpu.memory_space<vmem>>, vector<64x64xf32>
    %233 = vector.extract_strided_slice %91 {offsets = [0, 7], sizes = [16, 1], strides = [1, 1]} : vector<16x9xf32> to vector<16x1xf32>
    %234 = vector.extract_strided_slice %181 {offsets = [9, 0], sizes = [16, 64], strides = [1, 1]} : vector<26x64xf32> to vector<16x64xf32>
    %cst_96 = arith.constant dense<0.000000e+00> : vector<16x64xf32>
    %235 = tpu.matmul %234, %232, %cst_96 {dimension_numbers = #tpu.dot_dimension_numbers<[1], [0], [0], [1], [0, 0, 1, 1], [], []>} : vector<16x64xf32>, vector<64x64xf32>, vector<16x64xf32> -> vector<16x64xf32>
    %236 = vector.broadcast %233 : vector<16x1xf32> to vector<16x64xf32>
    %237 = arith.mulf %236, %235 : vector<16x64xf32>
    %238 = arith.addf %231, %237 : vector<16x64xf32>
    %c512_97 = arith.constant 512 : index
    %c0_98 = arith.constant 0 : index
    %239 = vector.load %arg6[%c512_97, %c0_98] : memref<576x64xf32, #tpu.memory_space<vmem>>, vector<64x64xf32>
    %240 = vector.extract_strided_slice %91 {offsets = [0, 8], sizes = [16, 1], strides = [1, 1]} : vector<16x9xf32> to vector<16x1xf32>
    %241 = vector.extract_strided_slice %181 {offsets = [10, 0], sizes = [16, 64], strides = [1, 1]} : vector<26x64xf32> to vector<16x64xf32>
    %cst_99 = arith.constant dense<0.000000e+00> : vector<16x64xf32>
    %242 = tpu.matmul %241, %239, %cst_99 {dimension_numbers = #tpu.dot_dimension_numbers<[1], [0], [0], [1], [0, 0, 1, 1], [], []>} : vector<16x64xf32>, vector<64x64xf32>, vector<16x64xf32> -> vector<16x64xf32>
    %243 = vector.broadcast %240 : vector<16x1xf32> to vector<16x64xf32>
    %244 = arith.mulf %243, %242 : vector<16x64xf32>
    %245 = arith.addf %238, %244 : vector<16x64xf32>
    %246 = tpu.concatenate %169, %245 in 0 : vector<16x64xf32>, vector<16x64xf32> -> vector<32x64xf32>
    %247 = vector.extract_strided_slice %92 {offsets = [2, 0], sizes = [1, 64], strides = [1, 1]} : vector<3x64xf32> to vector<1x64xf32>
    %248 = vector.broadcast %247 : vector<1x64xf32> to vector<32x64xf32>
    %249 = arith.addf %246, %248 : vector<32x64xf32>
    %cst_100 = arith.constant dense<0.000000e+00> : vector<64xf32>
    %250 = vector.multi_reduction <add>, %249, %cst_100 [0] : vector<32x64xf32> to vector<64xf32>
    %251 = vector.shape_cast %250 : vector<64xf32> to vector<1x64xf32>
    %cst_101 = arith.constant 3.125000e-02 : f32
    %252 = vector.broadcast %cst_101 : f32 to vector<1x64xf32>
    %253 = arith.mulf %251, %252 : vector<1x64xf32>
    %254 = vector.broadcast %253 : vector<1x64xf32> to vector<32x64xf32>
    %255 = arith.subf %249, %254 : vector<32x64xf32>
    %256 = arith.mulf %255, %255 : vector<32x64xf32>
    %cst_102 = arith.constant dense<0.000000e+00> : vector<64xf32>
    %257 = vector.multi_reduction <add>, %256, %cst_102 [0] : vector<32x64xf32> to vector<64xf32>
    %258 = vector.shape_cast %257 : vector<64xf32> to vector<1x64xf32>
    %cst_103 = arith.constant 3.125000e-02 : f32
    %259 = vector.broadcast %cst_103 : f32 to vector<1x64xf32>
    %260 = arith.mulf %258, %259 : vector<1x64xf32>
    %261 = vector.extract_strided_slice %92 {offsets = [0, 0], sizes = [1, 64], strides = [1, 1]} : vector<3x64xf32> to vector<1x64xf32>
    %cst_104 = arith.constant 9.99999974E-6 : f32
    %262 = vector.broadcast %cst_104 : f32 to vector<1x64xf32>
    %263 = arith.addf %260, %262 : vector<1x64xf32>
    %264 = math.rsqrt %263 : vector<1x64xf32>
    %265 = arith.mulf %261, %264 : vector<1x64xf32>
    %266 = vector.broadcast %265 : vector<1x64xf32> to vector<32x64xf32>
    %267 = arith.mulf %255, %266 : vector<32x64xf32>
    %268 = vector.extract_strided_slice %92 {offsets = [1, 0], sizes = [1, 64], strides = [1, 1]} : vector<3x64xf32> to vector<1x64xf32>
    %269 = vector.broadcast %268 : vector<1x64xf32> to vector<32x64xf32>
    %270 = arith.addf %267, %269 : vector<32x64xf32>
    %c0_105 = arith.constant 0 : index
    %c0_106 = arith.constant 0 : index
    %271 = vector.load %arg9[%c0_105, %c0_106] : memref<16x16xf32, #tpu.memory_space<vmem>>, vector<16x16xf32>
    %c0_107 = arith.constant 0 : index
    %c0_108 = arith.constant 0 : index
    %272 = vector.load %arg11[%c0_107, %c0_108] : memref<1x32xf32, #tpu.memory_space<vmem>>, vector<1x32xf32>
    %c0_109 = arith.constant 0 : index
    %c0_110 = arith.constant 0 : index
    %273 = vector.load %arg12[%c0_109, %c0_110] : memref<1x32xf32, #tpu.memory_space<vmem>>, vector<1x32xf32>
    %c0_111 = arith.constant 0 : index
    %c0_112 = arith.constant 0 : index
    %274 = vector.load %arg13[%c0_111, %c0_112] : memref<1x1xf32, #tpu.memory_space<vmem>>, vector<1x1xf32>
    %275 = vector.extract_strided_slice %270 {offsets = [0, 0], sizes = [16, 64], strides = [1, 1]} : vector<32x64xf32> to vector<16x64xf32>
    %cst_113 = arith.constant dense<0.000000e+00> : vector<16x64xf32>
    %276 = tpu.matmul %271, %275, %cst_113 {dimension_numbers = #tpu.dot_dimension_numbers<[1], [0], [0], [1], [0, 0, 1, 1], [], []>} : vector<16x16xf32>, vector<16x64xf32>, vector<16x64xf32> -> vector<16x64xf32>
    %277 = vector.extract_strided_slice %276 {offsets = [0, 0], sizes = [4, 64], strides = [1, 1]} : vector<16x64xf32> to vector<4x64xf32>
    %278 = vector.extract_strided_slice %276 {offsets = [4, 0], sizes = [4, 64], strides = [1, 1]} : vector<16x64xf32> to vector<4x64xf32>
    %279 = arith.maximumf %277, %278 : vector<4x64xf32>
    %280 = vector.extract_strided_slice %276 {offsets = [8, 0], sizes = [4, 64], strides = [1, 1]} : vector<16x64xf32> to vector<4x64xf32>
    %281 = vector.extract_strided_slice %276 {offsets = [12, 0], sizes = [4, 64], strides = [1, 1]} : vector<16x64xf32> to vector<4x64xf32>
    %282 = arith.maximumf %280, %281 : vector<4x64xf32>
    %283 = arith.maximumf %279, %282 : vector<4x64xf32>
    %cst_114 = arith.constant 0.000000e+00 : f32
    %284 = vector.broadcast %cst_114 : f32 to vector<4x64xf32>
    %285 = arith.maximumf %283, %284 : vector<4x64xf32>
    %286 = vector.extract_strided_slice %285 {offsets = [0, 0], sizes = [1, 64], strides = [1, 1]} : vector<4x64xf32> to vector<1x64xf32>
    %c0_115 = arith.constant 0 : index
    %c0_116 = arith.constant 0 : index
    %287 = vector.load %arg10[%c0_115, %c0_116] : memref<256x32xf32, #tpu.memory_space<vmem>>, vector<64x32xf32>
    %cst_117 = arith.constant dense<0.000000e+00> : vector<1x32xf32>
    %288 = tpu.matmul %286, %287, %cst_117 {dimension_numbers = #tpu.dot_dimension_numbers<[1], [0], [0], [1], [0, 0, 1, 1], [], []>} : vector<1x64xf32>, vector<64x32xf32>, vector<1x32xf32> -> vector<1x32xf32>
    %289 = arith.addf %272, %288 : vector<1x32xf32>
    %290 = vector.extract_strided_slice %285 {offsets = [1, 0], sizes = [1, 64], strides = [1, 1]} : vector<4x64xf32> to vector<1x64xf32>
    %c64_118 = arith.constant 64 : index
    %c0_119 = arith.constant 0 : index
    %291 = vector.load %arg10[%c64_118, %c0_119] : memref<256x32xf32, #tpu.memory_space<vmem>>, vector<64x32xf32>
    %cst_120 = arith.constant dense<0.000000e+00> : vector<1x32xf32>
    %292 = tpu.matmul %290, %291, %cst_120 {dimension_numbers = #tpu.dot_dimension_numbers<[1], [0], [0], [1], [0, 0, 1, 1], [], []>} : vector<1x64xf32>, vector<64x32xf32>, vector<1x32xf32> -> vector<1x32xf32>
    %293 = arith.addf %289, %292 : vector<1x32xf32>
    %294 = vector.extract_strided_slice %285 {offsets = [2, 0], sizes = [1, 64], strides = [1, 1]} : vector<4x64xf32> to vector<1x64xf32>
    %c128_121 = arith.constant 128 : index
    %c0_122 = arith.constant 0 : index
    %295 = vector.load %arg10[%c128_121, %c0_122] : memref<256x32xf32, #tpu.memory_space<vmem>>, vector<64x32xf32>
    %cst_123 = arith.constant dense<0.000000e+00> : vector<1x32xf32>
    %296 = tpu.matmul %294, %295, %cst_123 {dimension_numbers = #tpu.dot_dimension_numbers<[1], [0], [0], [1], [0, 0, 1, 1], [], []>} : vector<1x64xf32>, vector<64x32xf32>, vector<1x32xf32> -> vector<1x32xf32>
    %297 = arith.addf %293, %296 : vector<1x32xf32>
    %298 = vector.extract_strided_slice %285 {offsets = [3, 0], sizes = [1, 64], strides = [1, 1]} : vector<4x64xf32> to vector<1x64xf32>
    %c192_124 = arith.constant 192 : index
    %c0_125 = arith.constant 0 : index
    %299 = vector.load %arg10[%c192_124, %c0_125] : memref<256x32xf32, #tpu.memory_space<vmem>>, vector<64x32xf32>
    %cst_126 = arith.constant dense<0.000000e+00> : vector<1x32xf32>
    %300 = tpu.matmul %298, %299, %cst_126 {dimension_numbers = #tpu.dot_dimension_numbers<[1], [0], [0], [1], [0, 0, 1, 1], [], []>} : vector<1x64xf32>, vector<64x32xf32>, vector<1x32xf32> -> vector<1x32xf32>
    %301 = arith.addf %297, %300 : vector<1x32xf32>
    %cst_127 = arith.constant 0.000000e+00 : f32
    %302 = vector.broadcast %cst_127 : f32 to vector<1x32xf32>
    %303 = arith.maximumf %301, %302 : vector<1x32xf32>
    %304 = arith.mulf %303, %273 : vector<1x32xf32>
    %cst_128 = arith.constant dense<0.000000e+00> : vector<1xf32>
    %305 = vector.multi_reduction <add>, %304, %cst_128 [1] : vector<1x32xf32> to vector<1xf32>
    %306 = vector.shape_cast %305 : vector<1xf32> to vector<1x1xf32>
    %307 = arith.addf %306, %274 : vector<1x1xf32>
    %cst_129 = arith.constant 0.000000e+00 : f32
    %308 = vector.broadcast %cst_129 : f32 to vector<1x1xf32>
    %309 = arith.maximumf %307, %308 : vector<1x1xf32>
    %310 = vector.extract_strided_slice %270 {offsets = [16, 0], sizes = [16, 64], strides = [1, 1]} : vector<32x64xf32> to vector<16x64xf32>
    %cst_130 = arith.constant dense<0.000000e+00> : vector<16x64xf32>
    %311 = tpu.matmul %271, %310, %cst_130 {dimension_numbers = #tpu.dot_dimension_numbers<[1], [0], [0], [1], [0, 0, 1, 1], [], []>} : vector<16x16xf32>, vector<16x64xf32>, vector<16x64xf32> -> vector<16x64xf32>
    %312 = vector.extract_strided_slice %311 {offsets = [0, 0], sizes = [4, 64], strides = [1, 1]} : vector<16x64xf32> to vector<4x64xf32>
    %313 = vector.extract_strided_slice %311 {offsets = [4, 0], sizes = [4, 64], strides = [1, 1]} : vector<16x64xf32> to vector<4x64xf32>
    %314 = arith.maximumf %312, %313 : vector<4x64xf32>
    %315 = vector.extract_strided_slice %311 {offsets = [8, 0], sizes = [4, 64], strides = [1, 1]} : vector<16x64xf32> to vector<4x64xf32>
    %316 = vector.extract_strided_slice %311 {offsets = [12, 0], sizes = [4, 64], strides = [1, 1]} : vector<16x64xf32> to vector<4x64xf32>
    %317 = arith.maximumf %315, %316 : vector<4x64xf32>
    %318 = arith.maximumf %314, %317 : vector<4x64xf32>
    %cst_131 = arith.constant 0.000000e+00 : f32
    %319 = vector.broadcast %cst_131 : f32 to vector<4x64xf32>
    %320 = arith.maximumf %318, %319 : vector<4x64xf32>
    %321 = vector.extract_strided_slice %320 {offsets = [0, 0], sizes = [1, 64], strides = [1, 1]} : vector<4x64xf32> to vector<1x64xf32>
    %c0_132 = arith.constant 0 : index
    %c0_133 = arith.constant 0 : index
    %322 = vector.load %arg10[%c0_132, %c0_133] : memref<256x32xf32, #tpu.memory_space<vmem>>, vector<64x32xf32>
    %cst_134 = arith.constant dense<0.000000e+00> : vector<1x32xf32>
    %323 = tpu.matmul %321, %322, %cst_134 {dimension_numbers = #tpu.dot_dimension_numbers<[1], [0], [0], [1], [0, 0, 1, 1], [], []>} : vector<1x64xf32>, vector<64x32xf32>, vector<1x32xf32> -> vector<1x32xf32>
    %324 = arith.addf %272, %323 : vector<1x32xf32>
    %325 = vector.extract_strided_slice %320 {offsets = [1, 0], sizes = [1, 64], strides = [1, 1]} : vector<4x64xf32> to vector<1x64xf32>
    %c64_135 = arith.constant 64 : index
    %c0_136 = arith.constant 0 : index
    %326 = vector.load %arg10[%c64_135, %c0_136] : memref<256x32xf32, #tpu.memory_space<vmem>>, vector<64x32xf32>
    %cst_137 = arith.constant dense<0.000000e+00> : vector<1x32xf32>
    %327 = tpu.matmul %325, %326, %cst_137 {dimension_numbers = #tpu.dot_dimension_numbers<[1], [0], [0], [1], [0, 0, 1, 1], [], []>} : vector<1x64xf32>, vector<64x32xf32>, vector<1x32xf32> -> vector<1x32xf32>
    %328 = arith.addf %324, %327 : vector<1x32xf32>
    %329 = vector.extract_strided_slice %320 {offsets = [2, 0], sizes = [1, 64], strides = [1, 1]} : vector<4x64xf32> to vector<1x64xf32>
    %c128_138 = arith.constant 128 : index
    %c0_139 = arith.constant 0 : index
    %330 = vector.load %arg10[%c128_138, %c0_139] : memref<256x32xf32, #tpu.memory_space<vmem>>, vector<64x32xf32>
    %cst_140 = arith.constant dense<0.000000e+00> : vector<1x32xf32>
    %331 = tpu.matmul %329, %330, %cst_140 {dimension_numbers = #tpu.dot_dimension_numbers<[1], [0], [0], [1], [0, 0, 1, 1], [], []>} : vector<1x64xf32>, vector<64x32xf32>, vector<1x32xf32> -> vector<1x32xf32>
    %332 = arith.addf %328, %331 : vector<1x32xf32>
    %333 = vector.extract_strided_slice %320 {offsets = [3, 0], sizes = [1, 64], strides = [1, 1]} : vector<4x64xf32> to vector<1x64xf32>
    %c192_141 = arith.constant 192 : index
    %c0_142 = arith.constant 0 : index
    %334 = vector.load %arg10[%c192_141, %c0_142] : memref<256x32xf32, #tpu.memory_space<vmem>>, vector<64x32xf32>
    %cst_143 = arith.constant dense<0.000000e+00> : vector<1x32xf32>
    %335 = tpu.matmul %333, %334, %cst_143 {dimension_numbers = #tpu.dot_dimension_numbers<[1], [0], [0], [1], [0, 0, 1, 1], [], []>} : vector<1x64xf32>, vector<64x32xf32>, vector<1x32xf32> -> vector<1x32xf32>
    %336 = arith.addf %332, %335 : vector<1x32xf32>
    %cst_144 = arith.constant 0.000000e+00 : f32
    %337 = vector.broadcast %cst_144 : f32 to vector<1x32xf32>
    %338 = arith.maximumf %336, %337 : vector<1x32xf32>
    %339 = arith.mulf %338, %273 : vector<1x32xf32>
    %cst_145 = arith.constant dense<0.000000e+00> : vector<1xf32>
    %340 = vector.multi_reduction <add>, %339, %cst_145 [1] : vector<1x32xf32> to vector<1xf32>
    %341 = vector.shape_cast %340 : vector<1xf32> to vector<1x1xf32>
    %342 = arith.addf %341, %274 : vector<1x1xf32>
    %cst_146 = arith.constant 0.000000e+00 : f32
    %343 = vector.broadcast %cst_146 : f32 to vector<1x1xf32>
    %344 = arith.maximumf %342, %343 : vector<1x1xf32>
    %345 = tpu.concatenate %309, %344 in 0 : vector<1x1xf32>, vector<1x1xf32> -> vector<2x1xf32>
    %c0_147 = arith.constant 0 : index
    %c0_148 = arith.constant 0 : index
    %346 = vector.load %arg14[%c0_147, %c0_148] : memref<2x1xf32, #tpu.memory_space<vmem>>, vector<2x1xf32>
    tpu.vector_store %arg14[%c0_147, %c0_148], %345 {strides = array<i32>} : memref<2x1xf32, #tpu.memory_space<vmem>>, vector<2x1xf32>,
    return
  }
  func.func @transform_0(%arg0: i32) -> (i32, i32) {
    %c0_i32 = arith.constant 0 : i32
    %c0_i32_0 = arith.constant 0 : i32
    %c0_i32_1 = arith.constant 0 : i32
    return %c0_i32, %c0_i32_0 : i32, i32
  }
  func.func @transform_1(%arg0: i32) -> (i32, i32) {
    %c0_i32 = arith.constant 0 : i32
    %c0_i32_0 = arith.constant 0 : i32
    %c0_i32_1 = arith.constant 0 : i32
    return %c0_i32, %c0_i32_0 : i32, i32
  }
  func.func @transform_2(%arg0: i32) -> (i32, i32) {
    %c0_i32 = arith.constant 0 : i32
    %c0_i32_0 = arith.constant 0 : i32
    %c0_i32_1 = arith.constant 0 : i32
    return %c0_i32, %c0_i32_0 : i32, i32
  }
  func.func @transform_3(%arg0: i32) -> (i32, i32) {
    %c0_i32 = arith.constant 0 : i32
    %c0_i32_0 = arith.constant 0 : i32
    %c0_i32_1 = arith.constant 0 : i32
    return %c0_i32, %c0_i32_0 : i32, i32
  }
  func.func @transform_4(%arg0: i32) -> (i32, i32) {
    %c0_i32 = arith.constant 0 : i32
    %c0_i32_0 = arith.constant 0 : i32
    %c0_i32_1 = arith.constant 0 : i32
    return %c0_i32, %c0_i32_0 : i32, i32
  }
  func.func @transform_5(%arg0: i32) -> (i32, i32) {
    %c0_i32 = arith.constant 0 : i32
    %c0_i32_0 = arith.constant 0 : i32
    %c0_i32_1 = arith.constant 0 : i32
    return %c0_i32, %c0_i32_0 : i32, i32
  }
  func.func @transform_6(%arg0: i32) -> (i32, i32) {
    %c0_i32 = arith.constant 0 : i32
    %c0_i32_0 = arith.constant 0 : i32
    %c0_i32_1 = arith.constant 0 : i32
    return %c0_i32, %c0_i32_0 : i32, i32
  }
  func.func @transform_7(%arg0: i32) -> (i32, i32) {
    %c0_i32 = arith.constant 0 : i32
    %c0_i32_0 = arith.constant 0 : i32
    %c0_i32_1 = arith.constant 0 : i32
    return %c0_i32, %c0_i32_0 : i32, i32
  }
  func.func @transform_8(%arg0: i32) -> (i32, i32) {
    %c0_i32 = arith.constant 0 : i32
    %c0_i32_0 = arith.constant 0 : i32
    %c0_i32_1 = arith.constant 0 : i32
    return %c0_i32, %c0_i32_0 : i32, i32
  }
  func.func @transform_9(%arg0: i32) -> (i32, i32) {
    %c0_i32 = arith.constant 0 : i32
    %c0_i32_0 = arith.constant 0 : i32
    %c0_i32_1 = arith.constant 0 : i32
    return %c0_i32, %c0_i32_0 : i32, i32
  }
  func.func @transform_10(%arg0: i32) -> (i32, i32) {
    %c0_i32 = arith.constant 0 : i32
    %c0_i32_0 = arith.constant 0 : i32
    %c0_i32_1 = arith.constant 0 : i32
    return %c0_i32, %c0_i32_0 : i32, i32
  }
  func.func @transform_11(%arg0: i32) -> (i32, i32) {
    %c0_i32 = arith.constant 0 : i32
    %c0_i32_0 = arith.constant 0 : i32
    %c0_i32_1 = arith.constant 0 : i32
    return %c0_i32, %c0_i32_0 : i32, i32
  }
  func.func @transform_12(%arg0: i32) -> (i32, i32) {
    %c0_i32 = arith.constant 0 : i32
    %c0_i32_0 = arith.constant 0 : i32
    %c0_i32_1 = arith.constant 0 : i32
    return %c0_i32, %c0_i32_0 : i32, i32
  }
  func.func @transform_13(%arg0: i32) -> (i32, i32) {
    %c0_i32 = arith.constant 0 : i32
    %c0_i32_0 = arith.constant 0 : i32
    %c0_i32_1 = arith.constant 0 : i32
    return %c0_i32, %c0_i32_0 : i32, i32
  }
}

</mosaic_0001>

<bundles_post_ra>
// kernel: relation_network_forward.1
= control target key start
LH: loop header
LB: loop body
LE: loop exit
PB: predicated region body
PF: predicated region fallthrough
CT: control target
= control target key end

     0   :  { %v11036_v0 = vmov 1   ;;  %v11049_v4 = vmov 0   ;;  %v11043_v19 = vmov 2   ;;  %v11041_v36 = vmov 3   ;;  %s11022_s3 = inlined_call_operand.vmem [shape: f32[128,9], index: 3, kind: input, shape index: {}]   ;;  %s11023_s1 = inlined_call_operand.vmem [shape: f32[1152,64], index: 1, kind: input, shape index: {}]   ;;  %s11024_s0 = inlined_call_operand.vmem [shape: f32[152,128], index: 0, kind: input, shape index: {}]   ;;  %s11025_s2 = inlined_call_operand.vmem [shape: f32[3,64], index: 2, kind: input, shape index: {}]   ;;  %s11026_s4 = inlined_call_operand.vmem [shape: f32[64,64], index: 4, kind: input, shape index: {}]   ;;  %s11027_s5 = inlined_call_operand.vmem [shape: f32[576,64], index: 5, kind: input, shape index: {}]   ;;  %s11028_s7 = inlined_call_operand.vmem [shape: f32[16,9], index: 7, kind: input, shape index: {}]   ;;  %s11029_s6 = inlined_call_operand.vmem [shape: f32[3,64], index: 6, kind: input, shape index: {}]   ;;  %s11030_s8 = inlined_call_operand.vmem [shape: f32[16,16], index: 8, kind: input, shape index: {}]   ;;  %s11031_s9 = inlined_call_operand.vmem [shape: f32[256,32], index: 9, kind: input, shape index: {}]   ;;  %s11032_s12 = inlined_call_operand.<no memory space> [shape: f32[1,1], index: 12, kind: input, shape index: {}]   ;;  %s11033_s10 = inlined_call_operand.vmem [shape: f32[1,32], index: 10, kind: input, shape index: {}]   ;;  %s11034_s11 = inlined_call_operand.vmem [shape: f32[1,32], index: 11, kind: input, shape index: {}]   ;;  %s11035_s13 = inlined_call_operand.vmem [shape: f32[2,1], index: 13, kind: output, shape index: {}]  }
   0x1   :  { %7301 = vset.pattern.permute.xlu1 %v11036_v0  ;;  %v7523_v1 = vld [vmem:[%s11022_s3] sm:$0xff]  ;;  %v94_v2 = vld [vmem:[%s11023_s1 + $0x78] sm:$0xff]  ;;  %7300 = vset.pattern.permute.xlu0 %v11049_v4  ;;  %v93_v5 = vld [vmem:[%s11023_s1 + $0x70] sm:$0xff]  ;;  %vm2556_vm0 = vcmask 523264   ;;  %vm2858_vm1 = vcmask 1044480   ;;  %vm2977_vm2 = vcmask 1046528  }
   0x2   :  { %v383_v3 = vld [vmem:[%s11023_s1 + $0xf8] sm:$0xff]  ;;  %530 = vperm.xlu1 %7301, %v7523_v1   ;;  %6221 = vmatprep.subr.mxu0 %v94_v2  ;;  %v382_v6 = vld [vmem:[%s11023_s1 + $0xf0] sm:$0xff]  ;;  %v7542_v7 = vld [vmem:[%s11022_s3 + $0x8] sm:$0xff]  ;;  %vm3082_vm3 = vcmask 1045504   ;;  %vm3187_vm4 = vcmask 1043456   ;;  %vm3292_vm5 = vcmask 1042432  }
   0x3   :  { %6277 = vmatprep.subr.mxu1 %v383_v3  ;;  %6222 = vmatpush3.msra.mxu0 %v94_v2  ;;  %v92_v8 = vld [vmem:[%s11023_s1 + $0x68] sm:$0xff]  ;;  %v91_v10 = vld [vmem:[%s11023_s1 + $0x60] sm:$0xff]  ;;  %v7560_v12 = vld [vmem:[%s11022_s3 + $0x10] sm:$0xff]  ;;  %vm3397_vm6 = vcmask 1041408   ;;  %vm4750_vm7 = vcmask 130048   ;;  %vm7448_vm8 = vmmov 0  }
   0x4   :  { %6278 = vmatpush3.msra.mxu1 %v383_v3  ;;  %6223 = vmatprep.subr.mxu0 %v93_v5  ;;  %v381_v9 = vld [vmem:[%s11023_s1 + $0xe8] sm:$0xff]  ;;  %v380_v11 = vld [vmem:[%s11023_s1 + $0xe0] sm:$0xff]  ;;  %v90_v13 = vld [vmem:[%s11023_s1 + $0x58] sm:$0xff]  ;;  %vm5172_vm9 = vcmask 253952   ;;  %vm5569_vm10 = vcmask 1040384   ;;  %vm5571_vm11 = vcmask 1024  }
   0x5   :  { %6279 = vmatprep.subr.mxu1 %v382_v6  ;;  %6224 = vmatpush3.msra.mxu0 %v93_v5  ;;  %v379_v14 = vld [vmem:[%s11023_s1 + $0xd8] sm:$0xff]  ;;  %v89_v15 = vld [vmem:[%s11023_s1 + $0x50] sm:$0xff]  ;;  %v88_v17 = vld [vmem:[%s11023_s1 + $0x48] sm:$0xff] }
   0x6   :  { %6280 = vmatpush3.msra.mxu1 %v382_v6  ;;  %534 = vperm.xlu1 %7301, %v7542_v7   ;;  %v378_v16 = vld [vmem:[%s11023_s1 + $0xd0] sm:$0xff]  ;;  %v377_v18 = vld [vmem:[%s11023_s1 + $0xc8] sm:$0xff]  ;;  %v87_v20 = vld [vmem:[%s11023_s1 + $0x40] sm:$0xff] }
   0x7   :  { %6225 = vmatprep.subr.mxu0 %v92_v8  ;;  %6281 = vmatprep.subr.mxu1 %v381_v9  ;;  %v376_v21 = vld [vmem:[%s11023_s1 + $0xc0] sm:$0xff]  ;;  %v86_v22 = vld [vmem:[%s11023_s1 + $0x38] sm:$0xff]  ;;  %v85_v25 = vld [vmem:[%s11023_s1 + $0x30] sm:$0xff] }
   0x8   :  { %6226 = vmatpush3.msra.mxu0 %v92_v8  ;;  %6282 = vmatpush3.msra.mxu1 %v381_v9  ;;  %v375_v23 = vld [vmem:[%s11023_s1 + $0xb8] sm:$0xff]  ;;  %v374_v26 = vld [vmem:[%s11023_s1 + $0xb0] sm:$0xff]  ;;  %v84_v27 = vld [vmem:[%s11023_s1 + $0x28] sm:$0xff] }
   0x9   :  { %6227 = vmatprep.subr.mxu0 %v91_v10  ;;  %6283 = vmatprep.subr.mxu1 %v380_v11  ;;  %v7598_v24 = vld [vmem:[%s11022_s3 + $0x18] sm:$0xff]  ;;  %v373_v28 = vld [vmem:[%s11023_s1 + $0xa8] sm:$0xff]  ;;  %v83_v29 = vld [vmem:[%s11023_s1 + $0x20] sm:$0xff] }
   0xa   :  { %6228 = vmatpush3.msra.mxu0 %v91_v10  ;;  %6284 = vmatpush3.msra.mxu1 %v380_v11  ;;  %v372_v30 = vld [vmem:[%s11023_s1 + $0xa0] sm:$0xff]  ;;  %v82_v31 = vld [vmem:[%s11023_s1 + $0x18] sm:$0xff]  ;;  %v81_v33 = vld [vmem:[%s11023_s1 + $0x10] sm:$0xff] }
   0xb   :  { %538 = vperm.xlu1 %7301, %v7560_v12   ;;  %6229 = vmatprep.subr.mxu0 %v90_v13  ;;  %v371_v32 = vld [vmem:[%s11023_s1 + $0x98] sm:$0xff]  ;;  %v370_v34 = vld [vmem:[%s11023_s1 + $0x90] sm:$0xff]  ;;  %v80_v35 = vld [vmem:[%s11023_s1 + $0x8] sm:$0xff] }
   0xc   :  { %6285 = vmatprep.subr.mxu1 %v379_v14  ;;  %6230 = vmatpush3.msra.mxu0 %v90_v13  ;;  %v369_v37 = vld [vmem:[%s11023_s1 + $0x88] sm:$0xff]  ;;  %v79_v38 = vld [vmem:[%s11023_s1] sm:$0xff]  ;;  %v656_v44 = vld [vmem:[%s11023_s1 + $0x178] sm:$0xff] }
   0xd   :  { %6286 = vmatpush3.msra.mxu1 %v379_v14  ;;  %6231 = vmatprep.subr.mxu0 %v89_v15  ;;  %v368_v39 = vld [vmem:[%s11023_s1 + $0x80] sm:$0xff]  ;;  %v7657_v42 = vld [vmem:[%s11024_s0 + $0x8] sm:$0xff]  ;;  %v929_v45 = vld [vmem:[%s11023_s1 + $0x1f8] sm:$0xff] }
   0xe   :  { %6287 = vmatprep.subr.mxu1 %v378_v16  ;;  %6232 = vmatpush3.msra.mxu0 %v89_v15  ;;  %v63_v40 = vld [vmem:[%s11024_s0] sm:$0xff]  ;;  %v7662_v43 = vld [vmem:[%s11024_s0 + $0x9] sm:$0xff]  ;;  %v7693_v50 = vld [vmem:[%s11024_s0 + $0x11] sm:$0xff] }
   0xf   :  { %6288 = vmatpush3.msra.mxu1 %v378_v16  ;;  %7302 = vset.pattern.permute.xlu1 %v11043_v19  ;;  %v352_v41 = vld [vmem:[%s11024_s0 + $0x1] sm:$0xff]  ;;  %v655_v47 = vld [vmem:[%s11023_s1 + $0x170] sm:$0xff]  ;;  %v7698_v51 = vld [vmem:[%s11024_s0 + $0x18] sm:$0xff]  ;;  %v11037_v16 = vmov 4  }
  0x10   :  { %6233 = vmatprep.subr.mxu0 %v88_v17  ;;  %6289 = vmatprep.subr.mxu1 %v377_v18  ;;  %v7674_v46 = vld [vmem:[%s11022_s3 + $0x20] sm:$0xff]  ;;  %v928_v48 = vld [vmem:[%s11023_s1 + $0x1f0] sm:$0xff]  ;;  %v654_v53 = vld [vmem:[%s11023_s1 + $0x168] sm:$0xff] }
  0x11   :  { %807 = vperm.xlu1 %7302, %v7542_v7   ;;  %6234 = vmatpush3.msra.mxu0 %v88_v17  ;;  %v7687_v49 = vld [vmem:[%s11024_s0 + $0x10] sm:$0xff]  ;;  %v7704_v52 = vld [vmem:[%s11024_s0 + $0x19] sm:$0xff]  ;;  %v927_v54 = vld [vmem:[%s11023_s1 + $0x1e8] sm:$0xff] }
  0x12   :  { %6290 = vmatpush3.msra.mxu1 %v377_v18  ;;  %6235 = vmatprep.subr.mxu0 %v87_v20  ;;  %v653_v55 = vld [vmem:[%s11023_s1 + $0x160] sm:$0xff]  ;;  %v7736_v59 = vld [vmem:[%s11024_s0 + $0x28] sm:$0xff]  ;;  %v652_v61 = vld [vmem:[%s11023_s1 + $0x158] sm:$0xff] }
  0x13   :  { %6291 = vmatprep.subr.mxu1 %v376_v21  ;;  %6236 = vmatpush3.msra.mxu0 %v87_v20  ;;  %v926_v56 = vld [vmem:[%s11023_s1 + $0x1e0] sm:$0xff]  ;;  %v7742_v60 = vld [vmem:[%s11024_s0 + $0x29] sm:$0xff]  ;;  %v925_v62 = vld [vmem:[%s11023_s1 + $0x1d8] sm:$0xff] }
  0x14   :  { %6292 = vmatpush3.msra.mxu1 %v376_v21  ;;  %6237 = vmatprep.subr.mxu0 %v86_v22  ;;  %v7725_v57 = vld [vmem:[%s11024_s0 + $0x20] sm:$0xff]  ;;  %v651_v63 = vld [vmem:[%s11023_s1 + $0x150] sm:$0xff]  ;;  %v7775_v6 = vld [vmem:[%s11024_s0 + $0x38] sm:$0xff] }
  0x15   :  { %6293 = vmatprep.subr.mxu1 %v375_v23  ;;  %7303 = vset.pattern.permute.xlu1 %v11049_v4  ;;  %v7730_v58 = vld [vmem:[%s11024_s0 + $0x21] sm:$0xff]  ;;  %v924_v2 = vld [vmem:[%s11023_s1 + $0x1d0] sm:$0xff]  ;;  %v7780_v8 = vld [vmem:[%s11024_s0 + $0x39] sm:$0xff] }
  0x16   :  { %6238 = vmatpush3.msra.mxu0 %v86_v22  ;;  %6294 = vmatpush3.msra.mxu1 %v375_v23  ;;  %v7763_v3 = vld [vmem:[%s11024_s0 + $0x30] sm:$0xff]  ;;  %v650_v9 = vld [vmem:[%s11023_s1 + $0x148] sm:$0xff]  ;;  %v649_v11 = vld [vmem:[%s11023_s1 + $0x140] sm:$0xff] }
  0x17   :  { %257 = vperm.xlu1 %7303, %v7598_v24   ;;  %6239 = vmatprep.subr.mxu0 %v85_v25  ;;  %v7768_v5 = vld [vmem:[%s11024_s0 + $0x31] sm:$0xff]  ;;  %v923_v10 = vld [vmem:[%s11023_s1 + $0x1c8] sm:$0xff]  ;;  %v922_v13 = vld [vmem:[%s11023_s1 + $0x1c0] sm:$0xff] }
  0x18   :  { %6295 = vmatprep.subr.mxu1 %v374_v26  ;;  %6240 = vmatpush3.msra.mxu0 %v85_v25  ;;  %v7802_v14 = vld [vmem:[%s11024_s0 + $0x40] sm:$0xff]  ;;  %v7813_v17 = vld [vmem:[%s11024_s0 + $0x48] sm:$0xff]  ;;  %v648_v20 = vld [vmem:[%s11023_s1 + $0x138] sm:$0xff] }
  0x19   :  { %6296 = vmatpush3.msra.mxu1 %v374_v26  ;;  %6241 = vmatprep.subr.mxu0 %v84_v27  ;;  %v7807_v15 = vld [vmem:[%s11024_s0 + $0x41] sm:$0xff]  ;;  %v7820_v18 = vld [vmem:[%s11024_s0 + $0x49] sm:$0xff]  ;;  %v921_v21 = vld [vmem:[%s11023_s1 + $0x1b8] sm:$0xff] }
  0x1a   :  { %6297 = vmatprep.subr.mxu1 %v373_v28  ;;  %6242 = vmatpush3.msra.mxu0 %v84_v27  ;;  %v647_v22 = vld [vmem:[%s11023_s1 + $0x130] sm:$0xff]  ;;  %v7851_v27 = vld [vmem:[%s11024_s0 + $0x58] sm:$0xff] }
  0x1b   :  { %6298 = vmatpush3.msra.mxu1 %v373_v28  ;;  %7304 = vset.pattern.permute.xlu1 %v11043_v19  ;;  %v920_v23 = vld [vmem:[%s11023_s1 + $0x1b0] sm:$0xff]  ;;  %v7858_v28 = vld [vmem:[%s11024_s0 + $0x59] sm:$0xff] }
  0x1c   :  { %6243 = vmatprep.subr.mxu0 %v83_v29  ;;  %6299 = vmatprep.subr.mxu1 %v372_v30  ;;  %v7841_v25 = vld [vmem:[%s11024_s0 + $0x50] sm:$0xff] }
  0x1d   :  { %811 = vperm.xlu1 %7304, %v7560_v12   ;;  %6244 = vmatpush3.msra.mxu0 %v83_v29  ;;  %v7846_v26 = vld [vmem:[%s11024_s0 + $0x51] sm:$0xff]  ;;  %v646_v29 = vld [vmem:[%s11023_s1 + $0x128] sm:$0xff] }
  0x1e   :  { %6300 = vmatpush3.msra.mxu1 %v372_v30  ;;  %6245 = vmatprep.subr.mxu0 %v82_v31  ;;  %v919_v30 = vld [vmem:[%s11023_s1 + $0x1a8] sm:$0xff] }
  0x1f   :  { %6301 = vmatprep.subr.mxu1 %v371_v32  ;;  %6246 = vmatpush3.msra.mxu0 %v82_v31  ;;  %v7869_v31 = vld [vmem:[%s11022_s3 + $0x28] sm:$0xff] }
  0x20   :  { %6302 = vmatpush3.msra.mxu1 %v371_v32  ;;  %6247 = vmatprep.subr.mxu0 %v81_v33  ;;  %v645_v32 = vld [vmem:[%s11023_s1 + $0x120] sm:$0xff] }
  0x21   :  { %6303 = vmatprep.subr.mxu1 %v370_v34  ;;  %7305 = vset.pattern.permute.xlu1 %v11041_v36 }
  0x22   :  { %6248 = vmatpush3.msra.mxu0 %v81_v33  ;;  %6304 = vmatpush3.msra.mxu1 %v370_v34  ;;  %v918_v33 = vld [vmem:[%s11023_s1 + $0x1a0] sm:$0xff]  ;;  %v11045_v34 = vmov 6  }
  0x23   :  { %1076 = vperm.xlu1 %7305, %v7523_v1   ;;  %6249 = vmatprep.subr.mxu0 %v80_v35 }
  0x24   :  { %6305 = vmatprep.subr.mxu1 %v369_v37  ;;  %6250 = vmatpush3.msra.mxu0 %v80_v35  ;;  %v7885_v35 = vld [vmem:[%s11024_s0 + $0x60] sm:$0xff] }
  0x25   :  { %6306 = vmatpush3.msra.mxu1 %v369_v37  ;;  %6251 = vmatprep.subr.mxu0 %v79_v38  ;;  %v7890_v37 = vld [vmem:[%s11024_s0 + $0x61] sm:$0xff] }
  0x26   :  { %6307 = vmatprep.subr.mxu1 %v368_v39  ;;  %6252 = vmatpush3.msra.mxu0 %v79_v38  ;;  %v7896_v38 = vld [vmem:[%s11024_s0 + $0x68] sm:$0xff] }
  0x27   :  { %6253 = vmatprep.mubr.f32.mxu0 %v63_v40  ;;  %6308 = vmatpush3.msra.mxu1 %v368_v39  ;;  %v7901_v39 = vld [vmem:[%s11024_s0 + $0x69] sm:$0xff]  ;;  %v644_v40 = vld [vmem:[%s11023_s1 + $0x118] sm:$0xff] }
  0x28   :  { %6309 = vmatprep.mubr.f32.mxu1 %v352_v41  ;;  %7306 = vset.pattern.permute.xlu1 %v11049_v4  ;;  %v917_v41 = vld [vmem:[%s11023_s1 + $0x198] sm:$0xff] }
  0x29   :  { %6254 = vmatmul.mubr.f32.vlgmr.msra.gmra.mxu0 %v7657_v42  ;;  %6310 = vmatmul.mubr.f32.vlgmr.msra.gmra.mxu1 %v7662_v43 }
  0x2a   :  { %6333 = vmatprep.subr.mxu0 %v656_v44  ;;  %6389 = vmatprep.subr.mxu1 %v929_v45 }
  0x2b   :  { %262 = vperm.xlu1 %7306, %v7674_v46   ;;  %6334 = vmatpush3.msra.mxu0 %v656_v44  ;;  %v643_v44 = vld [vmem:[%s11023_s1 + $0x110] sm:$0xff] }
  0x2c   :  { %6390 = vmatpush3.msra.mxu1 %v929_v45  ;;  %6335 = vmatprep.subr.mxu0 %v655_v47  ;;  %v916_v45 = vld [vmem:[%s11023_s1 + $0x190] sm:$0xff] }
  0x2d   :  { %6391 = vmatprep.subr.mxu1 %v928_v48  ;;  %6256 = vmatprep.mubr.f32.mxu0 %v7687_v49 }
  0x2e   :  { %6312 = vmatprep.mubr.f32.mxu1 %v7693_v50  ;;  %6336 = vmatpush3.msra.mxu0 %v655_v47  ;;  %v7924_v47 = vld [vmem:[%s11024_s0 + $0x70] sm:$0xff] }
  0x2f   :  { %6392 = vmatpush3.msra.mxu1 %v928_v48  ;;  %6257 = vmatmul.mubr.f32.gmra.mxu0 %v7698_v51  ;;  %v7929_v48 = vld [vmem:[%s11024_s0 + $0x71] sm:$0xff] }
  0x30   :  { %6313 = vmatmul.mubr.f32.gmra.mxu1 %v7704_v52  ;;  %6337 = vmatprep.subr.mxu0 %v654_v53 }
  0x31   :  { %6393 = vmatprep.subr.mxu1 %v927_v54  ;;  %7307 = vset.pattern.permute.xlu1 %v11036_v0 }
  0x32   :  { %6338 = vmatpush3.msra.mxu0 %v654_v53  ;;  %6394 = vmatpush3.msra.mxu1 %v927_v54  ;;  %v7936_v53 = vld [vmem:[%s11024_s0 + $0x78] sm:$0xff] }
  0x33   :  { %546 = vperm.xlu1 %7307, %v7674_v46   ;;  %6339 = vmatprep.subr.mxu0 %v653_v55  ;;  %v7941_v54 = vld [vmem:[%s11024_s0 + $0x79] sm:$0xff] }
  0x34   :  { %6395 = vmatprep.subr.mxu1 %v926_v56  ;;  %6259 = vmatprep.mubr.f32.mxu0 %v7725_v57 }
  0x35   :  { %6315 = vmatprep.mubr.f32.mxu1 %v7730_v58  ;;  %6340 = vmatpush3.msra.mxu0 %v653_v55  ;;  %v642_v55 = vld [vmem:[%s11023_s1 + $0x108] sm:$0xff] }
  0x36   :  { %6396 = vmatpush3.msra.mxu1 %v926_v56  ;;  %6260 = vmatmul.mubr.f32.gmra.mxu0 %v7736_v59  ;;  %v915_v56 = vld [vmem:[%s11023_s1 + $0x188] sm:$0xff] }
  0x37   :  { %6316 = vmatmul.mubr.f32.gmra.mxu1 %v7742_v60  ;;  %6341 = vmatprep.subr.mxu0 %v652_v61 }
  0x38   :  { %6397 = vmatprep.subr.mxu1 %v925_v62  ;;  %242 = vperm.xlu0 %7300, %v7523_v1  }
  0x39   :  { %6342 = vmatpush3.msra.mxu0 %v652_v61  ;;  %6398 = vmatpush3.msra.mxu1 %v925_v62  ;;  %v641_v61 = vld [vmem:[%s11023_s1 + $0x100] sm:$0xff] }
  0x3a   :  { %7308 = vset.pattern.permute.xlu1 %v11041_v36  ;;  %6343 = vmatprep.subr.mxu0 %v651_v63  ;;  %v914_v62 = vld [vmem:[%s11023_s1 + $0x180] sm:$0xff] }
  0x3b   :  { %6399 = vmatprep.subr.mxu1 %v924_v2  ;;  %1084 = vperm.xlu1 %7308, %v7560_v12  }
  0x3c   :  { %6262 = vmatprep.mubr.f32.mxu0 %v7763_v3  ;;  %6318 = vmatprep.mubr.f32.mxu1 %v7768_v5 }
  0x3d   :  { %6344 = vmatpush3.msra.mxu0 %v651_v63  ;;  %6400 = vmatpush3.msra.mxu1 %v924_v2  ;;  %v625_v63 = vld [vmem:[%s11024_s0 + $0x2] sm:$0xff]  ;;  %v7967_v2 = vld [vmem:[%s11024_s0 + $0xa] sm:$0xff] }
  0x3e   :  { %6263 = vmatmul.mubr.f32.gmra.mxu0 %v7775_v6  ;;  %6319 = vmatmul.mubr.f32.gmra.mxu1 %v7780_v8 }
  0x3f   :  { %6345 = vmatprep.subr.mxu0 %v650_v9  ;;  %6401 = vmatprep.subr.mxu1 %v923_v10 }
  0x40   :  { %247 = vperm.xlu0 %7300, %v7542_v7   ;;  %6346 = vmatpush3.msra.mxu0 %v650_v9  ;;  %v1202_v9 = vld [vmem:[%s11023_s1 + $0x278] sm:$0xff] }
  0x41   :  { %6402 = vmatpush3.msra.mxu1 %v923_v10  ;;  %6347 = vmatprep.subr.mxu0 %v649_v11  ;;  %v1475_v10 = vld [vmem:[%s11023_s1 + $0x2f8] sm:$0xff] }
  0x42   :  { %6403 = vmatprep.subr.mxu1 %v922_v13  ;;  %7309 = vset.pattern.permute.xlu1 %v11037_v16 }
  0x43   :  { %6265 = vmatprep.mubr.f32.mxu0 %v7802_v14  ;;  %6321 = vmatprep.mubr.f32.mxu1 %v7807_v15 }
  0x44   :  { %6348 = vmatpush3.msra.mxu0 %v649_v11  ;;  %6404 = vmatpush3.msra.mxu1 %v922_v13  ;;  %v1201_v11 = vld [vmem:[%s11023_s1 + $0x270] sm:$0xff] }
  0x45   :  { %1349 = vperm.xlu1 %7309, %v7523_v1   ;;  %6266 = vmatmul.mubr.f32.gmra.mxu0 %v7813_v17  ;;  %v1474_v13 = vld [vmem:[%s11023_s1 + $0x2f0] sm:$0xff] }
  0x46   :  { %6322 = vmatmul.mubr.f32.gmra.mxu1 %v7820_v18  ;;  %6349 = vmatprep.subr.mxu0 %v648_v20 }
  0x47   :  { %6405 = vmatprep.subr.mxu1 %v921_v21  ;;  %252 = vperm.xlu0 %7300, %v7560_v12  }
  0x48   :  { %6350 = vmatpush3.msra.mxu0 %v648_v20  ;;  %6406 = vmatpush3.msra.mxu1 %v921_v21  ;;  %v7988_v20 = vld [vmem:[%s11024_s0 + $0x12] sm:$0xff]  ;;  %v1473_v21 = vld [vmem:[%s11023_s1 + $0x2e8] sm:$0xff] }
  0x49   :  { %6351 = vmatprep.subr.mxu0 %v647_v22  ;;  %6407 = vmatprep.subr.mxu1 %v920_v23 }
  0x4a   :  { %6268 = vmatprep.mubr.f32.mxu0 %v7841_v25  ;;  %6324 = vmatprep.mubr.f32.mxu1 %v7846_v26 }
  0x4b   :  { %6352 = vmatpush3.msra.mxu0 %v647_v22  ;;  %6408 = vmatpush3.msra.mxu1 %v920_v23  ;;  %v1472_v22 = vld [vmem:[%s11023_s1 + $0x2e0] sm:$0xff]  ;;  %v8017_v23 = vld [vmem:[%s11022_s3 + $0x30] sm:$0xff] }
  0x4c   :  { %7310 = vset.pattern.permute.xlu1 %v11049_v4  ;;  %6269 = vmatmul.mubr.f32.gmra.mxu0 %v7851_v27 }
  0x4d   :  { %6325 = vmatmul.mubr.f32.gmra.mxu1 %v7858_v28  ;;  %6353 = vmatprep.subr.mxu0 %v646_v29 }
  0x4e   :  { %6409 = vmatprep.subr.mxu1 %v919_v30  ;;  %267 = vperm.xlu1 %7310, %v7869_v31  }
  0x4f   :  { %7320 = vset.pattern.permute.xlu0 %v11045_v34  ;;  %6354 = vmatpush3.msra.mxu0 %v646_v29  ;;  %v8022_v29 = vld [vmem:[%s11024_s0 + $0x22] sm:$0xff] }
  0x50   :  { %6410 = vmatpush3.msra.mxu1 %v919_v30  ;;  %1899 = vperm.xlu0 %7320, %v7542_v7   ;;  %v1198_v30 = vld [vmem:[%s11023_s1 + $0x258] sm:$0xff] }
  0x51   :  { %6355 = vmatprep.subr.mxu0 %v645_v32  ;;  %6411 = vmatprep.subr.mxu1 %v918_v33 }
  0x52   :  { %6271 = vmatprep.mubr.f32.mxu0 %v7885_v35  ;;  %6327 = vmatprep.mubr.f32.mxu1 %v7890_v37 }
  0x53   :  { %6356 = vmatpush3.msra.mxu0 %v645_v32  ;;  %6412 = vmatpush3.msra.mxu1 %v918_v33  ;;  %v1471_v32 = vld [vmem:[%s11023_s1 + $0x2d8] sm:$0xff]  ;;  %v11039_v33 = vmov 5  }
  0x54   :  { %6272 = vmatmul.mubr.f32.gmra.mxu0 %v7896_v38  ;;  %6328 = vmatmul.mubr.f32.gmra.mxu1 %v7901_v39 }
  0x55   :  { %6357 = vmatprep.subr.mxu0 %v644_v40  ;;  %6413 = vmatprep.subr.mxu1 %v917_v41 }
  0x56   :  { %7311 = vset.pattern.permute.xlu1 %v11036_v0  ;;  %6358 = vmatpush3.msra.mxu0 %v644_v40  ;;  %v1470_v40 = vld [vmem:[%s11023_s1 + $0x2d0] sm:$0xff] }
  0x57   :  { %6414 = vmatpush3.msra.mxu1 %v917_v41  ;;  %550 = vperm.xlu1 %7311, %v7869_v31   ;;  %v8050_v41 = vld [vmem:[%s11022_s3 + $0x38] sm:$0xff] }
  0x58   :  { %7321 = vset.pattern.permute.xlu0 %v11043_v19  ;;  %6359 = vmatprep.subr.mxu0 %v643_v44 }
  0x59   :  { %6415 = vmatprep.subr.mxu1 %v916_v45  ;;  %803 = vperm.xlu0 %7321, %v7523_v1  }
  0x5a   :  { %6274 = vmatprep.mubr.f32.mxu0 %v7924_v47  ;;  %6330 = vmatprep.mubr.f32.mxu1 %v7929_v48 }
  0x5b   :  { %6360 = vmatpush3.msra.mxu0 %v643_v44  ;;  %6416 = vmatpush3.msra.mxu1 %v916_v45  ;;  %v8062_v44 = vld [vmem:[%s11024_s0 + $0x3a] sm:$0xff]  ;;  %v1469_v45 = vld [vmem:[%s11023_s1 + $0x2c8] sm:$0xff] }
  0x5c   :  { %6275 = vmatmul.mubr.f32.gmra.mxu0 %v7936_v53  ;;  %6331 = vmatmul.mubr.f32.gmra.mxu1 %v7941_v54 }
  0x5d   :  { %6361 = vmatprep.subr.mxu0 %v642_v55  ;;  %6417 = vmatprep.subr.mxu1 %v915_v56 }
  0x5e   :  { %6362 = vmatpush3.msra.mxu0 %v642_v55  ;;  %6418 = vmatpush3.msra.mxu1 %v915_v56  ;;  %v1468_v55 = vld [vmem:[%s11023_s1 + $0x2c0] sm:$0xff] }
  0x5f   :  { %7312 = vset.pattern.permute.xlu1 %v11041_v36  ;;  %6363 = vmatprep.subr.mxu0 %v641_v61  ;;  %v8084_v56 = vld [vmem:[%s11024_s0 + $0x42] sm:$0xff] }
  0x60   :  { %6419 = vmatprep.subr.mxu1 %v914_v62  ;;  %1088 = vperm.xlu1 %7312, %v7598_v24  }
  0x61   :  { %815 = vperm.xlu0 %7321, %v7598_v24   ;;  %6364 = vmatpush3.msra.mxu0 %v641_v61  ;;  %v1194_v61 = vld [vmem:[%s11023_s1 + $0x238] sm:$0xff] }
  0x62   :  { %6365 = vmatprep.mubr.f32.mxu0 %v625_v63  ;;  %6420 = vmatpush3.msra.mxu1 %v914_v62  ;;  %v1467_v62 = vld [vmem:[%s11023_s1 + $0x2b8] sm:$0xff]  ;;  %v1466_v63 = vld [vmem:[%s11023_s1 + $0x2b0] sm:$0xff] }
  0x63   :  { %6421 = vmatprep.mubr.f32.mxu1 %v7657_v42  ;;  %6366 = vmatmul.mubr.f32.vlgmr.msra.gmra.mxu0 %v7967_v2  ;;  %v7996_v42 = vld [vmem:[%s11024_s0 + $0x1a] sm:$0xff] }
  0x64   :  { %6422 = vmatmul.mubr.f32.vlgmr.msra.gmra.mxu1 %v7687_v49  ;;  %6445 = vmatprep.subr.mxu0 %v1202_v9  ;;  %v1200_v49 = vld [vmem:[%s11023_s1 + $0x268] sm:$0xff] }
  0x65   :  { %6501 = vmatprep.subr.mxu1 %v1475_v10  ;;  %6446 = vmatpush3.msra.mxu0 %v1202_v9  ;;  %v8113_v9 = vld [vmem:[%s11024_s0 + $0x52] sm:$0xff] }
  0x66   :  { %6502 = vmatpush3.msra.mxu1 %v1475_v10  ;;  %6447 = vmatprep.subr.mxu0 %v1201_v11  ;;  %v1192_v10 = vld [vmem:[%s11023_s1 + $0x228] sm:$0xff] }
  0x67   :  { %6503 = vmatprep.subr.mxu1 %v1474_v13  ;;  %7313 = vset.pattern.permute.xlu1 %v11037_v16 }
  0x68   :  { %819 = vperm.xlu0 %7321, %v7674_v46   ;;  %6368 = vmatprep.mubr.f32.mxu0 %v7988_v20 }
  0x69   :  { %6424 = vmatprep.mubr.f32.mxu1 %v7698_v51  ;;  %6448 = vmatpush3.msra.mxu0 %v1201_v11  ;;  %v1199_v51 = vld [vmem:[%s11023_s1 + $0x260] sm:$0xff]  ;;  %v1465_v11 = vld [vmem:[%s11023_s1 + $0x2a8] sm:$0xff] }
  0x6a   :  { %6504 = vmatpush3.msra.mxu1 %v1474_v13  ;;  %1357 = vperm.xlu1 %7313, %v7560_v12   ;;  %v1191_v13 = vld [vmem:[%s11023_s1 + $0x220] sm:$0xff] }
  0x6b   :  { %6369 = vmatmul.mubr.f32.gmra.mxu0 %v7996_v42  ;;  %6425 = vmatmul.mubr.f32.gmra.mxu1 %v7725_v57  ;;  %v8029_v57 = vld [vmem:[%s11024_s0 + $0x2a] sm:$0xff] }
  0x6c   :  { %6449 = vmatprep.subr.mxu0 %v1200_v49  ;;  %6505 = vmatprep.subr.mxu1 %v1473_v21 }
  0x6d   :  { %6450 = vmatpush3.msra.mxu0 %v1200_v49  ;;  %6506 = vmatpush3.msra.mxu1 %v1473_v21  ;;  %v8142_v49 = vld [vmem:[%s11024_s0 + $0x62] sm:$0xff]  ;;  %v8150_v21 = vld [vmem:[%s11024_s0 + $0x6a] sm:$0xff] }
  0x6e   :  { %6451 = vmatprep.subr.mxu0 %v1199_v51  ;;  %6507 = vmatprep.subr.mxu1 %v1472_v22 }
  0x6f   :  { %827 = vperm.xlu0 %7321, %v8017_v23   ;;  %6371 = vmatprep.mubr.f32.mxu0 %v8022_v29 }
  0x70   :  { %6427 = vmatprep.mubr.f32.mxu1 %v7736_v59  ;;  %6452 = vmatpush3.msra.mxu0 %v1199_v51  ;;  %v1197_v59 = vld [vmem:[%s11023_s1 + $0x250] sm:$0xff]  ;;  %v1190_v51 = vld [vmem:[%s11023_s1 + $0x218] sm:$0xff] }
  0x71   :  { %6508 = vmatpush3.msra.mxu1 %v1472_v22  ;;  %7314 = vset.pattern.permute.xlu1 %v11039_v33  ;;  %v1463_v22 = vld [vmem:[%s11023_s1 + $0x298] sm:$0xff] }
  0x72   :  { %6372 = vmatmul.mubr.f32.gmra.mxu0 %v8029_v57  ;;  %6428 = vmatmul.mubr.f32.gmra.mxu1 %v7763_v3  ;;  %v8056_v3 = vld [vmem:[%s11024_s0 + $0x32] sm:$0xff] }
  0x73   :  { %6453 = vmatprep.subr.mxu0 %v1198_v30  ;;  %6509 = vmatprep.subr.mxu1 %v1471_v32 }
  0x74   :  { %1626 = vperm.xlu1 %7314, %v7542_v7   ;;  %6454 = vmatpush3.msra.mxu0 %v1198_v30  ;;  %v1196_v7 = vld [vmem:[%s11023_s1 + $0x248] sm:$0xff]  ;;  %v1189_v30 = vld [vmem:[%s11023_s1 + $0x210] sm:$0xff] }
  0x75   :  { %6510 = vmatpush3.msra.mxu1 %v1471_v32  ;;  %6455 = vmatprep.subr.mxu0 %v1197_v59  ;;  %v1462_v32 = vld [vmem:[%s11023_s1 + $0x290] sm:$0xff] }
  0x76   :  { %6511 = vmatprep.subr.mxu1 %v1470_v40  ;;  %831 = vperm.xlu0 %7321, %v8050_v41  }
  0x77   :  { %6374 = vmatprep.mubr.f32.mxu0 %v8056_v3  ;;  %6430 = vmatprep.mubr.f32.mxu1 %v7775_v6  ;;  %v1195_v6 = vld [vmem:[%s11023_s1 + $0x240] sm:$0xff] }
  0x78   :  { %6456 = vmatpush3.msra.mxu0 %v1197_v59  ;;  %6512 = vmatpush3.msra.mxu1 %v1470_v40  ;;  %v8171_v59 = vld [vmem:[%s11024_s0 + $0x72] sm:$0xff]  ;;  %v8178_v40 = vld [vmem:[%s11024_s0 + $0x7a] sm:$0xff] }
  0x79   :  { %6375 = vmatmul.mubr.f32.gmra.mxu0 %v8062_v44  ;;  %6431 = vmatmul.mubr.f32.gmra.mxu1 %v7802_v14  ;;  %v8092_v14 = vld [vmem:[%s11024_s0 + $0x4a] sm:$0xff] }
  0x7a   :  { %6457 = vmatprep.subr.mxu0 %v1196_v7  ;;  %6513 = vmatprep.subr.mxu1 %v1469_v45 }
  0x7b   :  { %7315 = vset.pattern.permute.xlu1 %v11049_v4  ;;  %6458 = vmatpush3.msra.mxu0 %v1196_v7  ;;  %v8183_v7 = vld [vmem:[%s11024_s0 + $0x80] sm:$0xff] }
  0x7c   :  { %6514 = vmatpush3.msra.mxu1 %v1469_v45  ;;  %272 = vperm.xlu1 %7315, %v8017_v23   ;;  %v1188_v45 = vld [vmem:[%s11023_s1 + $0x208] sm:$0xff] }
  0x7d   :  { %6459 = vmatprep.subr.mxu0 %v1195_v6  ;;  %6515 = vmatprep.subr.mxu1 %v1468_v55 }
  0x7e   :  { %7330 = vset.pattern.permute.xlu0 %v11039_v33  ;;  %6377 = vmatprep.mubr.f32.mxu0 %v8084_v56 }
  0x7f   :  { %6433 = vmatprep.mubr.f32.mxu1 %v7813_v17  ;;  %6460 = vmatpush3.msra.mxu0 %v1195_v6  ;;  %v1193_v17 = vld [vmem:[%s11023_s1 + $0x230] sm:$0xff]  ;;  %v1461_v6 = vld [vmem:[%s11023_s1 + $0x288] sm:$0xff] }
  0x80   :  { %6516 = vmatpush3.msra.mxu1 %v1468_v55  ;;  %1622 = vperm.xlu0 %7330, %v7523_v1   ;;  %v11051_v55 = vmov 8  }
  0x81   :  { %6378 = vmatmul.mubr.f32.gmra.mxu0 %v8092_v14  ;;  %6434 = vmatmul.mubr.f32.gmra.mxu1 %v7841_v25  ;;  %v8120_v25 = vld [vmem:[%s11024_s0 + $0x5a] sm:$0xff] }
  0x82   :  { %6461 = vmatprep.subr.mxu0 %v1194_v61  ;;  %6517 = vmatprep.subr.mxu1 %v1467_v62 }
  0x83   :  { %6462 = vmatpush3.msra.mxu0 %v1194_v61  ;;  %6518 = vmatpush3.msra.mxu1 %v1467_v62  ;;  %v1187_v61 = vld [vmem:[%s11023_s1 + $0x200] sm:$0xff] }
  0x84   :  { %7316 = vset.pattern.permute.xlu1 %v11043_v19  ;;  %6463 = vmatprep.subr.mxu0 %v1193_v17  ;;  %v1460_v62 = vld [vmem:[%s11023_s1 + $0x280] sm:$0xff] }
  0x85   :  { %6519 = vmatprep.subr.mxu1 %v1466_v63  ;;  %823 = vperm.xlu1 %7316, %v7869_v31  }
  0x86   :  { %6380 = vmatprep.mubr.f32.mxu0 %v8113_v9  ;;  %6436 = vmatprep.mubr.f32.mxu1 %v7851_v27  ;;  %v1464_v27 = vld [vmem:[%s11023_s1 + $0x2a0] sm:$0xff] }
  0x87   :  { %6464 = vmatpush3.msra.mxu0 %v1193_v17  ;;  %6520 = vmatpush3.msra.mxu1 %v1466_v63  ;;  %v1748_v17 = vld [vmem:[%s11023_s1 + $0x378] sm:$0xff] }
  0x88   :  { %1634 = vperm.xlu0 %7330, %v7598_v24   ;;  %6381 = vmatmul.mubr.f32.gmra.mxu0 %v8120_v25  ;;  %v2021_v63 = vld [vmem:[%s11023_s1 + $0x3f8] sm:$0xff] }
  0x89   :  { %6437 = vmatmul.mubr.f32.gmra.mxu1 %v7885_v35  ;;  %6465 = vmatprep.subr.mxu0 %v1192_v10 }
  0x8a   :  { %6521 = vmatprep.subr.mxu1 %v1465_v11  ;;  %6466 = vmatpush3.msra.mxu0 %v1192_v10  ;;  %v2017_v10 = vld [vmem:[%s11023_s1 + $0x3d8] sm:$0xff] }
  0x8b   :  { %6522 = vmatpush3.msra.mxu1 %v1465_v11  ;;  %6467 = vmatprep.subr.mxu0 %v1191_v13  ;;  %v8256_v11 = vld [vmem:[%s11022_s3 + $0x48] sm:$0xff] }
  0x8c   :  { %6523 = vmatprep.subr.mxu1 %v1464_v27  ;;  %7317 = vset.pattern.permute.xlu1 %v11041_v36 }
  0x8d   :  { %6383 = vmatprep.mubr.f32.mxu0 %v8142_v49  ;;  %6439 = vmatprep.mubr.f32.mxu1 %v7896_v38 }
  0x8e   :  { %6468 = vmatpush3.msra.mxu0 %v1191_v13  ;;  %6524 = vmatpush3.msra.mxu1 %v1464_v27  ;;  %v2016_v13 = vld [vmem:[%s11023_s1 + $0x3d0] sm:$0xff]  ;;  %v1742_v27 = vld [vmem:[%s11023_s1 + $0x348] sm:$0xff] }
  0x8f   :  { %1092 = vperm.xlu1 %7317, %v7674_v46   ;;  %1638 = vperm.xlu0 %7330, %v7674_v46  }
  0x90   :  { %6384 = vmatmul.mubr.f32.gmra.mxu0 %v8150_v21  ;;  %6440 = vmatmul.mubr.f32.gmra.mxu1 %v7924_v47 }
  0x91   :  { %6469 = vmatprep.subr.mxu0 %v1190_v51  ;;  %6525 = vmatprep.subr.mxu1 %v1463_v22 }
  0x92   :  { %6470 = vmatpush3.msra.mxu0 %v1190_v51  ;;  %6526 = vmatpush3.msra.mxu1 %v1463_v22  ;;  %v2015_v51 = vld [vmem:[%s11023_s1 + $0x3c8] sm:$0xff]  ;;  %v1741_v22 = vld [vmem:[%s11023_s1 + $0x340] sm:$0xff] }
  0x93   :  { %6471 = vmatprep.subr.mxu0 %v1189_v30  ;;  %6527 = vmatprep.subr.mxu1 %v1462_v32 }
  0x94   :  { %6386 = vmatprep.mubr.f32.mxu0 %v8171_v59  ;;  %6442 = vmatprep.mubr.f32.mxu1 %v7936_v53 }
  0x95   :  { %6472 = vmatpush3.msra.mxu0 %v1189_v30  ;;  %6528 = vmatpush3.msra.mxu1 %v1462_v32  ;;  %v2014_v30 = vld [vmem:[%s11023_s1 + $0x3c0] sm:$0xff] }
  0x96   :  { %7318 = vset.pattern.permute.xlu1 %v11039_v33  ;;  %7335 = vset.pattern.permute.xlu0 %v11051_v55 }
  0x97   :  { %6387 = vmatmul.mubr.f32.gmra.mxu0 %v8178_v40  ;;  %6443 = vmatmul.mubr.f32.gmra.mxu1 %v8183_v7 }
  0x98   :  { %6473 = vmatprep.subr.mxu0 %v1188_v45  ;;  %6529 = vmatprep.subr.mxu1 %v1461_v6 }
  0x99   :  { %1630 = vperm.xlu1 %7318, %v7560_v12   ;;  %2441 = vperm.xlu0 %7335, %v7523_v1   ;;  %v1747_v12 = vld [vmem:[%s11023_s1 + $0x370] sm:$0xff] }
  0x9a   :  { %6474 = vmatpush3.msra.mxu0 %v1188_v45  ;;  %6530 = vmatpush3.msra.mxu1 %v1461_v6  ;;  %v1739_v45 = vld [vmem:[%s11023_s1 + $0x330] sm:$0xff] }
  0x9b   :  { %6475 = vmatprep.subr.mxu0 %v1187_v61  ;;  %6531 = vmatprep.subr.mxu1 %v1460_v62  ;;  %v2012_v6 = vld [vmem:[%s11023_s1 + $0x3b0] sm:$0xff] }
  0x9c   :  { %6476 = vmatpush3.msra.mxu0 %v1187_v61  ;;  %6477 = vmatprep.mubr.f32.mxu0 %v7662_v43  ;;  %v2020_v43 = vld [vmem:[%s11023_s1 + $0x3f0] sm:$0xff] }
  0x9d   :  { %6532 = vmatpush3.msra.mxu1 %v1460_v62  ;;  %6533 = vmatprep.mubr.f32.mxu1 %v7967_v2  ;;  %v2019_v2 = vld [vmem:[%s11023_s1 + $0x3e8] sm:$0xff] }
  0x9e   :  { %6478 = vmatmul.mubr.f32.vlgmr.msra.gmra.mxu0 %v7693_v50  ;;  %6534 = vmatmul.mubr.f32.vlgmr.msra.gmra.mxu1 %v7988_v20  ;;  %v1746_v50 = vld [vmem:[%s11023_s1 + $0x368] sm:$0xff] }
  0x9f   :  { %6557 = vmatprep.subr.mxu0 %v1748_v17  ;;  %6613 = vmatprep.subr.mxu1 %v2021_v63 }
  0xa0   :  { %7319 = vset.pattern.permute.xlu1 %v11045_v34  ;;  %7336 = vset.pattern.permute.xlu0 %v11036_v0 }
  0xa1   :  { %6558 = vmatpush3.msra.mxu0 %v1748_v17  ;;  %6614 = vmatpush3.msra.mxu1 %v2021_v63  ;;  %v2009_v17 = vld [vmem:[%s11023_s1 + $0x398] sm:$0xff]  ;;  %v1186_v63 = vld [vmem:[%s11024_s0 + $0x81] sm:$0xff] }
  0xa2   :  { %1895 = vperm.xlu1 %7319, %v7523_v1   ;;  %542 = vperm.xlu0 %7336, %v7598_v24   ;;  %v1745_v1 = vld [vmem:[%s11023_s1 + $0x360] sm:$0xff] }
  0xa3   :  { %6559 = vmatprep.subr.mxu0 %v1747_v12  ;;  %6615 = vmatprep.subr.mxu1 %v2020_v43  ;;  %v2018_v24 = vld [vmem:[%s11023_s1 + $0x3e0] sm:$0xff] }
  0xa4   :  { %6480 = vmatprep.mubr.f32.mxu0 %v7704_v52  ;;  %6536 = vmatprep.mubr.f32.mxu1 %v7996_v42  ;;  %v8241_v52 = vpop.permute.xlu1 %530 }
  0xa5   :  { %6560 = vmatpush3.msra.mxu0 %v1747_v12  ;;  %6616 = vmatpush3.msra.mxu1 %v2020_v43  ;;  %v1459_v12 = vld [vmem:[%s11024_s0 + $0x82] sm:$0xff] }
  0xa6   :  { %6481 = vmatmul.mubr.f32.gmra.mxu0 %v7730_v58  ;;  %6537 = vmatmul.mubr.f32.gmra.mxu1 %v8022_v29  ;;  %v1744_v58 = vld [vmem:[%s11023_s1 + $0x358] sm:$0xff] }
  0xa7   :  { %6561 = vmatprep.subr.mxu0 %v1746_v50  ;;  %6617 = vmatprep.subr.mxu1 %v2019_v2 }
  0xa8   :  { %6562 = vmatpush3.msra.mxu0 %v1746_v50  ;;  %6618 = vmatpush3.msra.mxu1 %v2019_v2  ;;  %v1734_v50 = vld [vmem:[%s11023_s1 + $0x308] sm:$0xff] }
  0xa9   :  { %7322 = vset.pattern.permute.xlu1 %v11049_v4  ;;  %554 = vperm.xlu0 %7336, %v8017_v23   ;;  %v2007_v2 = vld [vmem:[%s11023_s1 + $0x388] sm:$0xff] }
  0xaa   :  { %6563 = vmatprep.subr.mxu0 %v1745_v1  ;;  %6619 = vmatprep.subr.mxu1 %v2018_v24 }
  0xab   :  { %277 = vperm.xlu1 %7322, %v8050_v41   ;;  %6483 = vmatprep.mubr.f32.mxu0 %v7742_v60  ;;  %v1743_v60 = vld [vmem:[%s11023_s1 + $0x350] sm:$0xff] }
  0xac   :  { %6539 = vmatprep.mubr.f32.mxu1 %v8029_v57  ;;  %6564 = vmatpush3.msra.mxu0 %v1745_v1  ;;  %v8398_v1 = vld [vmem:[%s11022_s3 + $0x70] sm:$0xff] }
  0xad   :  { %6620 = vmatpush3.msra.mxu1 %v2018_v24  ;;  %6484 = vmatmul.mubr.f32.gmra.mxu0 %v7768_v5  ;;  %v8266_v5 = vpop.permute.xlu1 %534  ;;  %v1717_v24 = vld [vmem:[%s11024_s0 + $0x10] sm:$0xff] }
  0xae   :  { %6540 = vmatmul.mubr.f32.gmra.mxu1 %v8056_v3  ;;  %6565 = vmatprep.subr.mxu0 %v1744_v58 }
  0xaf   :  { %6621 = vmatprep.subr.mxu1 %v2017_v10  ;;  %6566 = vmatpush3.msra.mxu0 %v1744_v58 }
  0xb0   :  { %6622 = vmatpush3.msra.mxu1 %v2017_v10  ;;  %566 = vperm.xlu0 %7336, %v8256_v11   ;;  %v1990_v10 = vld [vmem:[%s11024_s0 + $0x11] sm:$0xff] }
  0xb1   :  { %6567 = vmatprep.subr.mxu0 %v1743_v60  ;;  %6623 = vmatprep.subr.mxu1 %v2016_v13  ;;  %v8291_v32 = vpop.permute.xlu1 %538 }
  0xb2   :  { %7323 = vset.pattern.permute.xlu1 %v11036_v0  ;;  %6486 = vmatprep.mubr.f32.mxu0 %v7780_v8  ;;  %v8283_v8 = vld [vmem:[%s11022_s3 + $0x50] sm:$0xff] }
  0xb3   :  { %6542 = vmatprep.mubr.f32.mxu1 %v8062_v44  ;;  %6568 = vmatpush3.msra.mxu0 %v1743_v60  ;;  %v8385_v43 = vpop.permute.xlu0 %242 }
  0xb4   :  { %6624 = vmatpush3.msra.mxu1 %v2016_v13  ;;  %558 = vperm.xlu1 %7323, %v8050_v41   ;;  %v11047_v13 = vmov 7  }
  0xb5   :  { %6487 = vmatmul.mubr.f32.gmra.mxu0 %v7807_v15  ;;  %6543 = vmatmul.mubr.f32.gmra.mxu1 %v8084_v56  ;;  %v1740_v15 = vld [vmem:[%s11023_s1 + $0x338] sm:$0xff] }
  0xb6   :  { %6569 = vmatprep.subr.mxu0 %v1742_v27  ;;  %6625 = vmatprep.subr.mxu1 %v2015_v51  ;;  %v2013_v56 = vld [vmem:[%s11023_s1 + $0x3b8] sm:$0xff] }
  0xb7   :  { %6570 = vmatpush3.msra.mxu0 %v1742_v27  ;;  %6626 = vmatpush3.msra.mxu1 %v2015_v51  ;;  %v1718_v27 = vld [vmem:[%s11024_s0 + $0x18] sm:$0xff] }
  0xb8   :  { %570 = vperm.xlu0 %7336, %v8283_v8   ;;  %6571 = vmatprep.subr.mxu0 %v1741_v22  ;;  %v1991_v51 = vld [vmem:[%s11024_s0 + $0x19] sm:$0xff] }
  0xb9   :  { %6627 = vmatprep.subr.mxu1 %v2014_v30  ;;  %6489 = vmatprep.mubr.f32.mxu0 %v7820_v18  ;;  %v8308_v18 = vld [vmem:[%s11022_s3 + $0x58] sm:$0xff] }
  0xba   :  { %6545 = vmatprep.mubr.f32.mxu1 %v8092_v14  ;;  %6572 = vmatpush3.msra.mxu0 %v1741_v22  ;;  %v8310_v14 = vpop.permute.xlu1 %807  ;;  %v2294_v22 = vld [vmem:[%s11023_s1 + $0x478] sm:$0xff] }
  0xbb   :  { %6628 = vmatpush3.msra.mxu1 %v2014_v30  ;;  %7324 = vset.pattern.permute.xlu1 %v11041_v36  ;;  %v8415_v60 = vpop.permute.xlu0 %247  ;;  %v8430_v30 = vld [vmem:[%s11022_s3 + $0x78] sm:$0xff] }
  0xbc   :  { %6490 = vmatmul.mubr.f32.gmra.mxu0 %v7846_v26  ;;  %6546 = vmatmul.mubr.f32.gmra.mxu1 %v8113_v9  ;;  %v1738_v26 = vld [vmem:[%s11023_s1 + $0x328] sm:$0xff] }
  0xbd   :  { %6573 = vmatprep.subr.mxu0 %v1740_v15  ;;  %6629 = vmatprep.subr.mxu1 %v2013_v56  ;;  %v2011_v9 = vld [vmem:[%s11023_s1 + $0x3a8] sm:$0xff] }
  0xbe   :  { %1096 = vperm.xlu1 %7324, %v7869_v31   ;;  %6574 = vmatpush3.msra.mxu0 %v1740_v15  ;;  %v8328_v61 = vpop.permute.xlu1 %257  ;;  %v7422_v15 = vld [vmem:[%s11022_s3] sm:$0xff] }
  0xbf   :  { %6630 = vmatpush3.msra.mxu1 %v2013_v56  ;;  %574 = vperm.xlu0 %7336, %v8308_v18   ;;  %v2293_v56 = vld [vmem:[%s11023_s1 + $0x470] sm:$0xff] }
  0xc0   :  { %6575 = vmatprep.subr.mxu0 %v1739_v45  ;;  %6631 = vmatprep.subr.mxu1 %v2012_v6 }
  0xc1   :  { %6492 = vmatprep.mubr.f32.mxu0 %v7858_v28  ;;  %6548 = vmatprep.mubr.f32.mxu1 %v8120_v25  ;;  %v8335_v28 = vld [vmem:[%s11022_s3 + $0x60] sm:$0xff] }
  0xc2   :  { %6576 = vmatpush3.msra.mxu0 %v1739_v45  ;;  %6632 = vmatpush3.msra.mxu1 %v2012_v6  ;;  %v1737_v25 = vld [vmem:[%s11023_s1 + $0x320] sm:$0xff]  ;;  %v8350_v62 = vpop.permute.xlu1 %811 }
  0xc3   :  { %6493 = vmatmul.mubr.f32.gmra.mxu0 %v7890_v37  ;;  %6549 = vmatmul.mubr.f32.gmra.mxu1 %v8142_v49  ;;  %v2010_v37 = vld [vmem:[%s11023_s1 + $0x3a0] sm:$0xff]  ;;  %v1736_v49 = vld [vmem:[%s11023_s1 + $0x318] sm:$0xff] }
  0xc4   :  { %6577 = vmatprep.subr.mxu0 %v1738_v26  ;;  %6633 = vmatprep.subr.mxu1 %v2011_v9  ;;  %v1719_v45 = vld [vmem:[%s11024_s0 + $0x20] sm:$0xff] }
  0xc5   :  { %7325 = vset.pattern.permute.xlu1 %v11037_v16  ;;  %6578 = vmatpush3.msra.mxu0 %v1738_v26  ;;  %v1992_v6 = vld [vmem:[%s11024_s0 + $0x21] sm:$0xff] }
  0xc6   :  { %6634 = vmatpush3.msra.mxu1 %v2011_v9  ;;  %1365 = vperm.xlu1 %7325, %v7674_v46   ;;  %v8361_v46 = vld [vmem:[%s11022_s3 + $0x68] sm:$0xff] }
  0xc7   :  { %578 = vperm.xlu0 %7336, %v8335_v28   ;;  %6579 = vmatprep.subr.mxu0 %v1737_v25  ;;  %v1720_v9 = vld [vmem:[%s11024_s0 + $0x28] sm:$0xff] }
  0xc8   :  { %6635 = vmatprep.subr.mxu1 %v2010_v37  ;;  %6495 = vmatprep.mubr.f32.mxu0 %v7901_v39  ;;  %v1735_v39 = vld [vmem:[%s11023_s1 + $0x310] sm:$0xff] }
  0xc9   :  { %6551 = vmatprep.mubr.f32.mxu1 %v8150_v21  ;;  %6580 = vmatpush3.msra.mxu0 %v1737_v25  ;;  %v2008_v21 = vld [vmem:[%s11023_s1 + $0x390] sm:$0xff]  ;;  %v8450_v25 = vpop.permute.xlu0 %252 }
  0xca   :  { %6636 = vmatpush3.msra.mxu1 %v2010_v37  ;;  %6496 = vmatmul.mubr.f32.gmra.mxu0 %v7929_v48  ;;  %v8371_v48 = vpop.permute.xlu1 %1076  ;;  %v1993_v37 = vld [vmem:[%s11024_s0 + $0x29] sm:$0xff] }
  0xcb   :  { %6552 = vmatmul.mubr.f32.gmra.mxu1 %v8171_v59  ;;  %6581 = vmatprep.subr.mxu0 %v1736_v49  ;;  %v8376_v59 = vld [vmem:[%s11022_s3 + $0x10] sm:$0xff] }
  0xcc   :  { %6637 = vmatprep.subr.mxu1 %v2009_v17  ;;  %6582 = vmatpush3.msra.mxu0 %v1736_v49  ;;  %v2292_v49 = vld [vmem:[%s11023_s1 + $0x468] sm:$0xff] }
  0xcd   :  { %6638 = vmatpush3.msra.mxu1 %v2009_v17  ;;  %7326 = vset.pattern.permute.xlu1 %v11045_v34  ;;  %v8461_v17 = vld [vmem:[%s11022_s3 + $0x40] sm:$0xff] }
  0xce   :  { %582 = vperm.xlu0 %7336, %v8361_v46   ;;  %6583 = vmatprep.subr.mxu0 %v1735_v39  ;;  %v8409_v58 = vpop.permute.xlu1 %262 }
  0xcf   :  { %6639 = vmatprep.subr.mxu1 %v2008_v21  ;;  %1903 = vperm.xlu1 %7326, %v8376_v59  }
  0xd0   :  { %6498 = vmatprep.mubr.f32.mxu0 %v7941_v54  ;;  %6554 = vmatprep.mubr.f32.mxu1 %v8178_v40  ;;  %v1733_v54 = vld [vmem:[%s11023_s1 + $0x300] sm:$0xff] }
  0xd1   :  { %6584 = vmatpush3.msra.mxu0 %v1735_v39  ;;  %6640 = vmatpush3.msra.mxu1 %v2008_v21  ;;  %v2006_v40 = vld [vmem:[%s11023_s1 + $0x380] sm:$0xff]  ;;  %v1721_v21 = vld [vmem:[%s11024_s0 + $0x30] sm:$0xff] }
  0xd2   :  { %6499 = vmatmul.mubr.f32.gmra.mxu0 %v1186_v63  ;;  %6555 = vmatmul.mubr.f32.gmra.mxu1 %v1459_v12  ;;  %v8444_v26 = vpop.permute.xlu1 %546  ;;  %v2291_v39 = vld [vmem:[%s11023_s1 + $0x460] sm:$0xff]  ;;  %v1994_v63 = vld [vmem:[%s11024_s0 + $0x31] sm:$0xff] }
  0xd3   :  { %6585 = vmatprep.subr.mxu0 %v1734_v50  ;;  %6641 = vmatprep.subr.mxu1 %v2007_v2 }
  0xd4   :  { %6586 = vmatpush3.msra.mxu0 %v1734_v50  ;;  %6642 = vmatpush3.msra.mxu1 %v2007_v2  ;;  %v1722_v50 = vld [vmem:[%s11024_s0 + $0x38] sm:$0xff] }
  0xd5   :  { %586 = vperm.xlu0 %7336, %v8398_v1   ;;  %6587 = vmatprep.subr.mxu0 %v1733_v54  ;;  %v2290_v2 = vld [vmem:[%s11023_s1 + $0x458] sm:$0xff] }
  0xd6   :  { %6643 = vmatprep.subr.mxu1 %v2006_v40  ;;  %7327 = vset.pattern.permute.xlu1 %v11047_v13  ;;  %v8474_v12 = vpop.permute.xlu1 %1084 }
  0xd7   :  { %6588 = vmatpush3.msra.mxu0 %v1733_v54  ;;  %6589 = vmatprep.mubr.f32.mxu0 %v1717_v24  ;;  %v8483_v54 = vpop.permute.xlu0 %1899  ;;  %v1995_v24 = vld [vmem:[%s11024_s0 + $0x39] sm:$0xff] }
  0xd8   :  { %6644 = vmatpush3.msra.mxu1 %v2006_v40  ;;  %6645 = vmatprep.mubr.f32.mxu1 %v1990_v10  ;;  %v8488_v40 = vld [vmem:[%s11022_s3 + $0x8] sm:$0xff]  ;;  %v2289_v10 = vld [vmem:[%s11023_s1 + $0x450] sm:$0xff] }
  0xd9   :  { %2168 = vperm.xlu1 %7327, %v7422_v15   ;;  %6590 = vmatmul.mubr.f32.vlgmr.msra.gmra.mxu0 %v1718_v27  ;;  %v1723_v27 = vld [vmem:[%s11024_s0 + $0x40] sm:$0xff] }
  0xda   :  { %6646 = vmatmul.mubr.f32.vlgmr.msra.gmra.mxu1 %v1991_v51  ;;  %6669 = vmatprep.subr.mxu0 %v2294_v22  ;;  %v1724_v51 = vld [vmem:[%s11024_s0 + $0x48] sm:$0xff]  ;;  %v8508_v15 = vpop.permute.xlu1 %1349 }
  0xdb   :  { %6670 = vmatpush3.msra.mxu0 %v2294_v22  ;;  %590 = vperm.xlu0 %7336, %v8430_v30   ;;  %v2288_v22 = vld [vmem:[%s11023_s1 + $0x448] sm:$0xff] }
  0xdc   :  { %6671 = vmatprep.subr.mxu0 %v2293_v56  ;;  %6592 = vmatprep.mubr.f32.mxu0 %v1719_v45  ;;  %v2287_v45 = vld [vmem:[%s11023_s1 + $0x440] sm:$0xff] }
  0xdd   :  { %6648 = vmatprep.mubr.f32.mxu1 %v1992_v6  ;;  %6672 = vmatpush3.msra.mxu0 %v2293_v56  ;;  %v8510_v56 = vpop.permute.xlu0 %803  ;;  %v1725_v6 = vld [vmem:[%s11024_s0 + $0x50] sm:$0xff] }
  0xde   :  { %7328 = vset.pattern.permute.xlu1 %v11049_v4  ;;  %6593 = vmatmul.mubr.f32.gmra.mxu0 %v1720_v9 }
  0xdf   :  { %6649 = vmatmul.mubr.f32.gmra.mxu1 %v1993_v37  ;;  %6673 = vmatprep.subr.mxu0 %v2292_v49 }
  0xe0   :  { %282 = vperm.xlu1 %7328, %v8461_v17   ;;  %6674 = vmatpush3.msra.mxu0 %v2292_v49  ;;  %v1726_v49 = vld [vmem:[%s11024_s0 + $0x58] sm:$0xff] }
  0xe1   :  { %7375 = vset.pattern.permute.xlu0 %v11041_v36  ;;  %6675 = vmatprep.subr.mxu0 %v2291_v39 }
  0xe2   :  { %1080 = vperm.xlu0 %7375, %v8488_v40   ;;  %6595 = vmatprep.mubr.f32.mxu0 %v1721_v21 }
  0xe3   :  { %6676 = vmatpush3.msra.mxu0 %v2291_v39  ;;  %6651 = vmatprep.mubr.f32.mxu1 %v1994_v63  ;;  %v2286_v39 = vld [vmem:[%s11023_s1 + $0x438] sm:$0xff] }
  0xe4   :  { %6596 = vmatmul.mubr.f32.gmra.mxu0 %v1722_v50  ;;  %6677 = vmatprep.subr.mxu0 %v2290_v2 }
  0xe5   :  { %7329 = vset.pattern.permute.xlu1 %v11036_v0  ;;  %6678 = vmatpush3.msra.mxu0 %v2290_v2  ;;  %v2285_v2 = vld [vmem:[%s11023_s1 + $0x430] sm:$0xff] }
  0xe6   :  { %562 = vperm.xlu1 %7329, %v8461_v17   ;;  %6652 = vmatmul.mubr.f32.gmra.mxu1 %v1995_v24  ;;  %v268_v24 = vpop.permute.xlu1 %267 }
  0xe7   :  { %6679 = vmatprep.subr.mxu0 %v2289_v10  ;;  %6598 = vmatprep.mubr.f32.mxu0 %v1723_v27 }
  0xe8   :  { %6680 = vmatpush3.msra.mxu0 %v2289_v10  ;;  %1132 = vperm.xlu0 %7375, %v8398_v1  }
  0xe9   :  { %6599 = vmatmul.mubr.f32.gmra.mxu0 %v1724_v51  ;;  %6681 = vmatprep.subr.mxu0 %v2288_v22  ;;  %v6255_v9 = vpop.f32.mrf.mxu0  ;;  %v6311_v37 = vpop.f32.mrf.mxu1 }
  0xea   :  { %6682 = vmatpush3.msra.mxu0 %v2288_v22  ;;  %7331 = vset.pattern.permute.xlu1 %v11041_v36  ;;  %v321_v21 = vmul.f32 %v6255_v9, %v8415_v60  ;;  %v594_v63 = vmul.f32 %v6311_v37, %v8266_v5  ;;  %v8538_v60 = vpop.permute.xlu0 %815  ;;  %v2284_v5 = vld [vmem:[%s11023_s1 + $0x428] sm:$0xff]  ;;  %v2283_v22 = vld [vmem:[%s11023_s1 + $0x420] sm:$0xff]  ;;  %v551_v9 = vpop.permute.xlu1 %550 }
  0xeb   :  { %6683 = vmatprep.subr.mxu0 %v2287_v45  ;;  %1100 = vperm.xlu1 %7331, %v8017_v23   ;;  %v8529_v50 = vpop.f32.mrf.mxu0  ;;  %v8536_v27 = vpop.f32.mrf.mxu1 }
  0xec   :  { %6601 = vmatprep.mubr.f32.mxu0 %v1725_v6  ;;  %6684 = vmatpush3.msra.mxu0 %v2287_v45  ;;  %v8534_v10 = vadd.f32 %v594_v63, %v321_v21  ;;  %v2282_v6 = vld [vmem:[%s11023_s1 + $0x418] sm:$0xff]  ;;  %v2280_v21 = vld [vmem:[%s11023_s1 + $0x408] sm:$0xff] }
  0xed   :  { %6602 = vmatmul.mubr.f32.gmra.mxu0 %v1726_v49  ;;  %6685 = vmatprep.subr.mxu0 %v2286_v39 }
  0xee   :  { %6686 = vmatpush3.msra.mxu0 %v2286_v39  ;;  %6604 = vmatprep.mubr.f32.mxu0 %v7885_v35  ;;  %v8560_v49 = vpop.permute.xlu0 %819 }
  0xef   :  { %6687 = vmatprep.subr.mxu0 %v2285_v2  ;;  %7332 = vset.pattern.permute.xlu1 %v11037_v16  ;;  %v8545_v51 = vpop.f32.mrf.mxu0 }
  0xf0   :  { %6688 = vmatpush3.msra.mxu0 %v2285_v2  ;;  %1369 = vperm.xlu1 %7332, %v7869_v31   ;;  %v8551_v45 = vpop.f32.mrf.mxu1 }
  0xf1   :  { %6605 = vmatmul.mubr.f32.gmra.mxu0 %v7896_v38  ;;  %6689 = vmatprep.subr.mxu0 %v2284_v5  ;;  %v171_v35 = vpop.f32.mrf.mxu0 }
  0xf2   :  { %6690 = vmatpush3.msra.mxu0 %v2284_v5  ;;  %6607 = vmatprep.mubr.f32.mxu0 %v7924_v47  ;;  %v322_v31 = vmul.f32 %v8450_v25, %v171_v35  ;;  %v460_v37 = vpop.f32.mrf.mxu1  ;;  %v2281_v47 = vld [vmem:[%s11023_s1 + $0x410] sm:$0xff]  ;;  %v8573_v25 = vld [vmem:[%s11022_s3 + $0x18] sm:$0xff]  ;;  %v8584_v5 = vpop.permute.xlu1 %1088 }
  0xf3   :  { %6691 = vmatprep.subr.mxu0 %v2283_v22  ;;  %1136 = vperm.xlu0 %7375, %v8430_v30   ;;  %v595_v38 = vmul.f32 %v8291_v32, %v460_v37  ;;  %v1732_v32 = vld [vmem:[%s11024_s0 + $0x88] sm:$0xff] }
  0xf4   :  { %6692 = vmatpush3.msra.mxu0 %v2283_v22  ;;  %7333 = vset.pattern.permute.xlu1 %v11045_v34 }
  0xf5   :  { %6608 = vmatmul.mubr.f32.gmra.mxu0 %v7936_v53  ;;  %6693 = vmatprep.subr.mxu0 %v2282_v6  ;;  %v8568_v39 = vadd.f32 %v595_v38, %v322_v31  ;;  %v8589_v31 = vpop.permute.xlu0 %827 }
  0xf6   :  { %1907 = vperm.xlu1 %7333, %v8573_v25   ;;  %6694 = vmatpush3.msra.mxu0 %v2282_v6  ;;  %v6261_v53 = vpop.f32.mrf.mxu0  ;;  %v2279_v6 = vld [vmem:[%s11023_s1 + $0x400] sm:$0xff] }
  0xf7   :  { %6695 = vmatprep.subr.mxu0 %v2281_v47  ;;  %6610 = vmatprep.mubr.f32.mxu0 %v8183_v7  ;;  %v325_v63 = vmul.f32 %v6261_v53, %v268_v24  ;;  %v6317_v2 = vpop.f32.mrf.mxu1  ;;  %v1996_v24 = vld [vmem:[%s11024_s0 + $0x41] sm:$0xff]  ;;  %v1999_v53 = vld [vmem:[%s11024_s0 + $0x59] sm:$0xff] }
  0xf8   :  { %6696 = vmatpush3.msra.mxu0 %v2281_v47  ;;  %7386 = vset.pattern.permute.xlu0 %v11037_v16  ;;  %v598_v22 = vmul.f32 %v6317_v2, %v551_v9  ;;  %v181_v35 = vpop.f32.mrf.mxu0  ;;  %v2269_v2 = vld [vmem:[%s11024_s0 + $0x42] sm:$0xff] }
  0xf9   :  { %6611 = vmatmul.mubr.f32.gmra.mxu0 %v1732_v32  ;;  %6697 = vmatprep.subr.mxu0 %v2280_v21  ;;  %v324_v37 = vmul.f32 %v8409_v58, %v181_v35  ;;  %v470_v7 = vpop.f32.mrf.mxu1  ;;  %v1997_v58 = vld [vmem:[%s11024_s0 + $0x49] sm:$0xff]  ;;  %v8608_v32 = vpop.permute.xlu1 %1357 }
  0xfa   :  { %7334 = vset.pattern.permute.xlu1 %v11047_v13  ;;  %6698 = vmatpush3.msra.mxu0 %v2280_v21  ;;  %v8596_v9 = vadd.f32 %v598_v22, %v325_v63  ;;  %v597_v38 = vmul.f32 %v8444_v26, %v470_v7  ;;  %v1998_v21 = vld [vmem:[%s11024_s0 + $0x51] sm:$0xff]  ;;  %v2272_v7 = vld [vmem:[%s11024_s0 + $0x5a] sm:$0xff]  ;;  %v323_v13 = vmul.f32 %v8545_v51, %v8328_v61 }
  0xfb   :  { %2176 = vperm.xlu1 %7334, %v8376_v59   ;;  %1353 = vperm.xlu0 %7386, %v8488_v40   ;;  %v2003_v61 = vld [vmem:[%s11024_s0 + $0x79] sm:$0xff] }
  0xfc   :  { %6699 = vmatprep.subr.mxu0 %v2279_v6  ;;  %6701 = vmatprep.mubr.f32.mxu0 %v7988_v20  ;;  %v8605_v47 = vadd.f32 %v597_v38, %v324_v37  ;;  %v8617_v20 = vpop.permute.xlu0 %831 }
  0xfd   :  { %6700 = vmatpush3.msra.mxu0 %v2279_v6  ;;  %6654 = vmatprep.mubr.f32.mxu1 %v1996_v24  ;;  %v8630_v63 = vpop.permute.xlu1 %1626 }
  0xfe   :  { %6702 = vmatmul.mubr.f32.vlgmr.msra.gmra.mxu0 %v7996_v42  ;;  %6655 = vmatmul.mubr.f32.gmra.mxu1 %v1997_v58  ;;  %v8610_v26 = vpop.f32.mrf.mxu0 }
  0xff   :  { %7337 = vset.pattern.permute.xlu1 %v11051_v55  ;;  %1361 = vperm.xlu0 %7386, %v8573_v25   ;;  %v2002_v55 = vld [vmem:[%s11024_s0 + $0x71] sm:$0xff] }
 0x100   :  { %2445 = vperm.xlu1 %7337, %v8488_v40   ;;  %6704 = vmatprep.mubr.f32.mxu0 %v8022_v29  ;;  %v8624_v42 = vpop.f32.mrf.mxu0  ;;  %v8636_v29 = vpop.permute.xlu0 %1622 }
 0x101   :  { %6657 = vmatprep.mubr.f32.mxu1 %v1998_v21  ;;  %v273_v35 = vpop.permute.xlu1 %272 }
 0x102   :  { %6705 = vmatmul.mubr.f32.gmra.mxu0 %v8029_v57  ;;  %6658 = vmatmul.mubr.f32.gmra.mxu1 %v1999_v53  ;;  %v8641_v57 = vpop.f32.mrf.mxu1 }
 0x103   :  { %1373 = vperm.xlu0 %7386, %v8017_v23   ;;  %6707 = vmatprep.mubr.f32.mxu0 %v8056_v3  ;;  %v2270_v23 = vld [vmem:[%s11024_s0 + $0x4a] sm:$0xff] }
 0x104   :  { %7338 = vset.pattern.permute.xlu1 %v11049_v4  ;;  %v8651_v6 = vpop.f32.mrf.mxu1  ;;  %v8657_v37 = vpop.permute.xlu0 %1634 }
 0x105   :  { %287 = vperm.xlu1 %7338, %v8256_v11   ;;  %v8638_v22 = vpop.f32.mrf.mxu0  ;;  %v8669_v58 = vpop.permute.xlu1 %823 }
 0x106   :  { %11133 = vst [vmem:[#allocation3_spill] sm:$0xff] %v8638_v22  ;;  %6708 = vmatmul.mubr.f32.gmra.mxu0 %v8062_v44  ;;  %v2271_v44 = vld [vmem:[%s11024_s0 + $0x52] sm:$0xff]  ;;  %v8665_v38 = vpop.f32.mrf.mxu1 }
 0x107   :  { %1377 = vperm.xlu0 %7386, %v8050_v41   ;;  %6710 = vmatprep.mubr.f32.mxu0 %v2269_v2  ;;  %v8648_v3 = vpop.f32.mrf.mxu0 }
 0x108   :  { %11134 = vst [vmem:[#allocation4_spill] sm:$0xff] %v8648_v3  ;;  %v8675_v2 = vpop.f32.mrf.mxu1 }
 0x109   :  { %7339 = vset.pattern.permute.xlu1 %v11043_v19  ;;  %11137 = vst [vmem:[#allocation7_spill] sm:$0xff] %v8675_v2 }
 0x10a   :  { %835 = vperm.xlu1 %7339, %v8461_v17   ;;  %6711 = vmatmul.mubr.f32.gmra.mxu0 %v2270_v23  ;;  %v8671_v21 = vpop.permute.xlu0 %1638  ;;  %v8682_v23 = vld [vmem:[%s11022_s3 + $0x28] sm:$0xff] }
 0x10b   :  { %1381 = vperm.xlu0 %7386, %v8461_v17   ;;  %6713 = vmatprep.mubr.f32.mxu0 %v2271_v44 }
 0x10c   :  { %v8662_v24 = vpop.f32.mrf.mxu0 }
 0x10d   :  { %11135 = vst [vmem:[#allocation5_spill] sm:$0xff] %v8662_v24  ;;  %v8687_v44 = vpop.f32.mrf.mxu1  ;;  %v11143_v24 = vmov 0  }
 0x10e   :  { %7340 = vset.pattern.permute.xlu1 %v11041_v36  ;;  %6714 = vmatmul.mubr.f32.gmra.mxu0 %v2272_v7  ;;  %v8673_v53 = vpop.f32.mrf.mxu0  ;;  %v8690_v7 = vpop.permute.xlu1 %1092  ;;  %v2000_v36 = vld [vmem:[%s11024_s0 + $0x61] sm:$0xff] }
 0x10f   :  { %1104 = vperm.xlu1 %7340, %v8050_v41   ;;  %1385 = vperm.xlu0 %7386, %v8256_v11   ;;  %11136 = vst [vmem:[#allocation6_spill] sm:$0xff] %v8673_v53  ;;  %v8706_v19 = vpop.f32.mrf.mxu1  ;;  %v11141_v53 = vmov 8  }
 0x110   :  { %6660 = vmatprep.mubr.f32.mxu1 %v2000_v36 }
 0x113   :  { %7341 = vset.pattern.permute.xlu1 %v11039_v33  ;;  %1389 = vperm.xlu0 %7386, %v8283_v8   ;;  %v8700_v33 = vld [vmem:[%s11022_s3 + $0x20] sm:$0xff] }
 0x114   :  { %1642 = vperm.xlu1 %7341, %v8682_v23   ;;  %v8685_v41 = vpop.f32.mrf.mxu0  ;;  %v8692_v0 = vpop.permute.xlu0 %2441 }
 0x115   :  { %11138 = vst [vmem:[#allocation8_spill] sm:$0xff] %v8685_v41  ;;  %v8720_v3 = vpop.permute.xlu1 %1630 }
 0x116   :  { %v8695_v16 = vpop.f32.mrf.mxu0 }
 0x117   :  { %1393 = vperm.xlu0 %7386, %v8308_v18   ;;  %11139 = vst [vmem:[#allocation9_spill] sm:$0xff] %v8695_v16 }
 0x118   :  { %7342 = vset.pattern.permute.xlu1 %v11045_v34  ;;  %v2001_v34 = vld [vmem:[%s11024_s0 + $0x69] sm:$0xff] }
 0x119   :  { %1911 = vperm.xlu1 %7342, %v8700_v33   ;;  %6661 = vmatmul.mubr.f32.gmra.mxu1 %v2001_v34  ;;  %v8724_v34 = vpop.f32.mrf.mxu1 }
 0x11a   :  { %6663 = vmatprep.mubr.f32.mxu1 %v2002_v55  ;;  %v320_v55 = vmul.f32 %v8385_v43, %v8529_v50 }
 0x11b   :  { %1397 = vperm.xlu0 %7386, %v8335_v28  }
 0x11c   :  { %v8714_v4 = vpop.f32.mrf.mxu0 }
 0x11d   :  { %11140 = vst [vmem:[#allocation10_spill] sm:$0xff] %v8714_v4  ;;  %7343 = vset.pattern.permute.xlu1 %v11141_v53  ;;  %v543_v36 = vpop.permute.xlu0 %542  ;;  %6664 = vmatmul.mubr.f32.gmra.mxu1 %v2003_v61  ;;  %v8741_v22 = vpop.permute.xlu1 %1895 }
 0x11e   :  { %2449 = vperm.xlu1 %7343, %v8376_v59   ;;  %v596_v2 = vmul.f32 %v8551_v45, %v543_v36  ;;  %v8730_v51 = vpop.f32.mrf.mxu0  ;;  %v593_v59 = vmul.f32 %v8241_v52, %v8536_v27  ;;  %v8737_v45 = vpop.f32.mrf.mxu1  ;;  %v11144_v36 = vmov 7  }
 0x11f   :  { %1409 = vperm.xlu0 %7386, %v8430_v30   ;;  %11142 = vst [vmem:[#allocation11_spill] sm:$0xff] %v8730_v51  ;;  %v326_v51 = vmul.f32 %v273_v35, %v8624_v42 }
 0x120   :  { %v612_v4 = vadd.f32 %v596_v2, %v323_v13  ;;  %v609_v52 = vadd.f32 %v593_v59, %v320_v55  ;;  %v8747_v27 = vpop.f32.mrf.mxu1  ;;  %v11146_v59 = vmov 3  }
 0x122   :  { %7344 = vset.pattern.permute.xlu1 %v11143_v24  ;;  %v8758_v35 = vpop.f32.mrf.mxu1 }
 0x123   :  { %292 = vperm.xlu1 %7344, %v8283_v8   ;;  %7391 = vset.pattern.permute.xlu0 %v11144_v36  ;;  %v6367_v61 = vpop.f32.mrf.mxu0  ;;  %v11145_v36 = vmov 2  }
 0x124   :  { %2172 = vperm.xlu0 %7391, %v8488_v40   ;;  %v555_v13 = vpop.permute.xlu0 %554  ;;  %v867_v2 = vmul.f32 %v6367_v61, %v8310_v14 }
 0x125   :  { %v599_v43 = vmul.f32 %v555_v13, %v8651_v6  ;;  %v723_v50 = vpop.f32.mrf.mxu0 }
 0x126   :  { %v8750_v16 = vadd.f32 %v867_v2, %v8534_v10  ;;  %v866_v41 = vmul.f32 %v8510_v56, %v723_v50  ;;  %v278_v14 = vpop.permute.xlu1 %277 }
 0x127   :  { %7345 = vset.pattern.permute.xlu1 %v11145_v36  ;;  %v615_v42 = vadd.f32 %v599_v43, %v326_v51  ;;  %v8771_v43 = vpop.f32.mrf.mxu1 }
 0x128   :  { %839 = vperm.xlu1 %7345, %v8256_v11   ;;  %2180 = vperm.xlu0 %7391, %v8573_v25   ;;  %v8756_v40 = vadd.f32 %v866_v41, %v609_v52  ;;  %v327_v41 = vmul.f32 %v8610_v26, %v278_v14  ;;  %v8782_v26 = vld [vmem:[%s11022_s3 + $0x30] sm:$0xff] }
 0x129   :  { %v8785_v14 = vpop.f32.mrf.mxu1 }
 0x12b   :  { %v567_v6 = vpop.permute.xlu0 %566  ;;  %v6370_v55 = vpop.f32.mrf.mxu0 }
 0x12c   :  { %7346 = vset.pattern.permute.xlu1 %v11146_v59  ;;  %2184 = vperm.xlu0 %7391, %v8700_v33   ;;  %v8763_v56 = vmul.f32 %v8665_v38, %v567_v6  ;;  %v869_v10 = vmul.f32 %v6370_v55, %v8538_v60  ;;  %v11148_v60 = vmov 5  }
 0x12d   :  { %1108 = vperm.xlu1 %7346, %v8461_v17   ;;  %v733_v51 = vpop.f32.mrf.mxu0 }
 0x12e   :  { %11147 = vst [vmem:[#allocation12_spill] sm:$0xff] %v8763_v56  ;;  %v8768_v61 = vadd.f32 %v869_v10, %v612_v4  ;;  %v868_v13 = vmul.f32 %v8350_v62, %v733_v51  ;;  %v11151_v51 = vmov 6  }
 0x12f   :  { %v559_v2 = vpop.permute.xlu1 %558 }
 0x130   :  { %2188 = vperm.xlu0 %7391, %v8682_v23   ;;  %v600_v50 = vmul.f32 %v8641_v57, %v559_v2  ;;  %v8776_v38 = vadd.f32 %v868_v13, %v8568_v39 }
 0x131   :  { %7347 = vset.pattern.permute.xlu1 %v11148_v60 }
 0x132   :  { %1646 = vperm.xlu1 %7347, %v8782_v26   ;;  %v616_v4 = vadd.f32 %v600_v50, %v327_v41  ;;  %v6373_v62 = vpop.f32.mrf.mxu0  ;;  %v8798_v41 = vpop.f32.mrf.mxu1 }
 0x133   :  { %v571_v52 = vpop.permute.xlu0 %570  ;;  %v871_v6 = vmul.f32 %v6373_v62, %v8669_v58 }
 0x134   :  { %v8789_v57 = vmul.f32 %v571_v52, %v8706_v19  ;;  %2192 = vperm.xlu0 %7391, %v8782_v26   ;;  %v743_v39 = vpop.f32.mrf.mxu0  ;;  %v2273_v19 = vld [vmem:[%s11024_s0 + $0x62] sm:$0xff]  ;;  %v8820_v62 = vpop.f32.mrf.mxu1 }
 0x135   :  { %v8793_v55 = vadd.f32 %v871_v6, %v8596_v9  ;;  %v870_v10 = vmul.f32 %v8560_v49, %v743_v39  ;;  %v8809_v9 = vld [vmem:[%s11022_s3 + $0x38] sm:$0xff]  ;;  %6716 = vmatprep.mubr.f32.mxu0 %v2273_v19  ;;  %v2274_v49 = vld [vmem:[%s11024_s0 + $0x6a] sm:$0xff] }
 0x136   :  { %11149 = vst [vmem:[#allocation13_spill] sm:$0xff] %v8789_v57  ;;  %7348 = vset.pattern.permute.xlu1 %v11151_v51  ;;  %6717 = vmatmul.mubr.f32.gmra.mxu0 %v2274_v49  ;;  %v8829_v19 = vpop.f32.mrf.mxu1 }
 0x137   :  { %11150 = vst [vmem:[#allocation14_spill] sm:$0xff] %v8793_v55  ;;  %1915 = vperm.xlu1 %7348, %v8682_v23   ;;  %v8801_v13 = vadd.f32 %v870_v10, %v8605_v47  ;;  %11155 = vst [vmem:[#allocation18_spill] sm:$0xff] %v8829_v19 }
 0x138   :  { %2196 = vperm.xlu0 %7391, %v8809_v9  }
 0x139   :  { %v6376_v58 = vpop.f32.mrf.mxu0 }
 0x13a   :  { %v575_v47 = vpop.permute.xlu0 %574  ;;  %v873_v2 = vmul.f32 %v6376_v58, %v8617_v20 }
 0x13b   :  { %7349 = vset.pattern.permute.xlu1 %v11141_v53  ;;  %v8818_v50 = vmul.f32 %v8687_v44, %v575_v47  ;;  %v753_v52 = vpop.f32.mrf.mxu0 }
 0x13c   :  { %2453 = vperm.xlu1 %7349, %v8573_v25   ;;  %v8823_v6 = vadd.f32 %v873_v2, %v616_v4  ;;  %v872_v39 = vmul.f32 %v8589_v31, %v753_v52  ;;  %2200 = vperm.xlu0 %7391, %v8461_v17   ;;  %v8836_v25 = vpop.permute.xlu1 %1096  ;;  %v8841_v31 = vpop.f32.mrf.mxu1 }
 0x13d   :  { %11152 = vst [vmem:[#allocation15_spill] sm:$0xff] %v8818_v50  ;;  %11157 = vst [vmem:[#allocation20_spill] sm:$0xff] %v8836_v25  ;;  %v9106_v25 = vld [vmem:[%s11022_s3 + $0x50] sm:$0xff] }
 0x13e   :  { %11153 = vst [vmem:[#allocation16_spill] sm:$0xff] %v8823_v6  ;;  %v8827_v10 = vadd.f32 %v872_v39, %v615_v42  ;;  %v8848_v49 = vpop.f32.mrf.mxu1  ;;  %11225 = vst [vmem:[#allocation88_spill] sm:$0xff] %v9106_v25 }
 0x13f   :  { %11160 = vst [vmem:[#allocation23_spill] sm:$0xff] %v8848_v49 }
 0x140   :  { %11154 = vst [vmem:[#allocation17_spill] sm:$0xff] %v8827_v10  ;;  %7350 = vset.pattern.permute.xlu1 %v11143_v24  ;;  %2204 = vperm.xlu0 %7391, %v8256_v11   ;;  %v8861_v52 = vpop.f32.mrf.mxu1 }
 0x141   :  { %297 = vperm.xlu1 %7350, %v8308_v18   ;;  %v8834_v20 = vpop.f32.mrf.mxu0  ;;  %v8853_v47 = vpop.permute.xlu1 %1365  ;;  %11163 = vst [vmem:[#allocation26_spill] sm:$0xff] %v8861_v52 }
 0x142   :  { %11156 = vst [vmem:[#allocation19_spill] sm:$0xff] %v8834_v20  ;;  %v579_v44 = vpop.permute.xlu0 %578  ;;  %v8869_v6 = vpop.f32.mrf.mxu1 }
 0x143   :  { %v8839_v4 = vmul.f32 %v579_v44, %v8737_v45  ;;  %v8843_v42 = vpop.f32.mrf.mxu0  ;;  %11165 = vst [vmem:[#allocation28_spill] sm:$0xff] %v8869_v6 }
 0x144   :  { %11159 = vst [vmem:[#allocation22_spill] sm:$0xff] %v8843_v42  ;;  %2216 = vperm.xlu0 %7391, %v8335_v28  }
 0x145   :  { %11158 = vst [vmem:[#allocation21_spill] sm:$0xff] %v8839_v4  ;;  %7351 = vset.pattern.permute.xlu1 %v11145_v36 }
 0x146   :  { %843 = vperm.xlu1 %7351, %v8283_v8  }
 0x148   :  { %v8850_v58 = vpop.f32.mrf.mxu0  ;;  %7394 = vset.pattern.permute.xlu0 %v11151_v51 }
 0x149   :  { %11161 = vst [vmem:[#allocation24_spill] sm:$0xff] %v8850_v58  ;;  %v583_v45 = vpop.permute.xlu0 %582  ;;  %1939 = vperm.xlu0 %7394, %v8308_v18  }
 0x14a   :  { %7352 = vset.pattern.permute.xlu1 %v11146_v59  ;;  %v8858_v2 = vmul.f32 %v8724_v34, %v583_v45  ;;  %v8863_v39 = vpop.f32.mrf.mxu0  ;;  %v8867_v44 = vpop.permute.xlu1 %1903 }
 0x14b   :  { %1112 = vperm.xlu1 %7352, %v8256_v11   ;;  %11164 = vst [vmem:[#allocation27_spill] sm:$0xff] %v8863_v39  ;;  %v8881_v45 = vpop.f32.mrf.mxu1  ;;  %v2275_v39 = vld [vmem:[%s11024_s0 + $0x72] sm:$0xff] }
 0x14c   :  { %11162 = vst [vmem:[#allocation25_spill] sm:$0xff] %v8858_v2  ;;  %11169 = vst [vmem:[#allocation32_spill] sm:$0xff] %v8881_v45  ;;  %6719 = vmatprep.mubr.f32.mxu0 %v2275_v39  ;;  %v2004_v45 = vld [vmem:[%s11024_s0 + $0x81] sm:$0xff] }
 0x14d   :  { %1943 = vperm.xlu0 %7394, %v8335_v28   ;;  %v8898_v52 = vpop.f32.mrf.mxu1  ;;  %6666 = vmatprep.mubr.f32.mxu1 %v2004_v45 }
 0x14e   :  { %11172 = vst [vmem:[#allocation35_spill] sm:$0xff] %v8898_v52 }
 0x14f   :  { %7353 = vset.pattern.permute.xlu1 %v11148_v60 }
 0x150   :  { %1650 = vperm.xlu1 %7353, %v8809_v9   ;;  %v587_v49 = vpop.permute.xlu0 %586  ;;  %v8872_v57 = vpop.f32.mrf.mxu0 }
 0x151   :  { %11166 = vst [vmem:[#allocation29_spill] sm:$0xff] %v8872_v57  ;;  %v8875_v34 = vmul.f32 %v587_v49, %v8758_v35  ;;  %1951 = vperm.xlu0 %7394, %v8398_v1   ;;  %v2276_v35 = vld [vmem:[%s11024_s0 + $0x7a] sm:$0xff] }
 0x152   :  { %v8878_v11 = vpop.f32.mrf.mxu0  ;;  %6720 = vmatmul.mubr.f32.gmra.mxu0 %v2276_v35 }
 0x153   :  { %11167 = vst [vmem:[#allocation30_spill] sm:$0xff] %v8875_v34  ;;  %11168 = vst [vmem:[#allocation31_spill] sm:$0xff] %v8878_v11 }
 0x154   :  { %7354 = vset.pattern.permute.xlu1 %v11151_v51  ;;  %v8887_v10 = vpop.permute.xlu1 %2168 }
 0x155   :  { %1919 = vperm.xlu1 %7354, %v8782_v26   ;;  %1955 = vperm.xlu0 %7394, %v8430_v30  }
 0x156   :  { %v591_v49 = vpop.permute.xlu0 %590 }
 0x157   :  { %v8894_v57 = vmul.f32 %v8747_v27, %v591_v49  ;;  %v8896_v34 = vpop.f32.mrf.mxu0  ;;  %v2005_v27 = vld [vmem:[%s11024_s0 + $0x89] sm:$0xff]  ;;  %v8914_v49 = vpop.f32.mrf.mxu1 }
 0x158   :  { %11171 = vst [vmem:[#allocation34_spill] sm:$0xff] %v8896_v34  ;;  %11175 = vst [vmem:[#allocation38_spill] sm:$0xff] %v8914_v49  ;;  %6667 = vmatmul.mubr.f32.gmra.mxu1 %v2005_v27  ;;  %v2277_v27 = vld [vmem:[%s11024_s0 + $0x82] sm:$0xff] }
 0x159   :  { %11170 = vst [vmem:[#allocation33_spill] sm:$0xff] %v8894_v57  ;;  %7355 = vset.pattern.permute.xlu1 %v11141_v53  ;;  %v8902_v39 = vpop.f32.mrf.mxu0  ;;  %7400 = vset.pattern.permute.xlu0 %v11141_v53  ;;  %v8925_v57 = vpop.f32.mrf.mxu1 }
 0x15a   :  { %2457 = vperm.xlu1 %7355, %v8700_v33   ;;  %11173 = vst [vmem:[#allocation36_spill] sm:$0xff] %v8902_v39  ;;  %2493 = vperm.xlu0 %7400, %v8361_v46   ;;  %11176 = vst [vmem:[#allocation39_spill] sm:$0xff] %v8925_v57 }
 0x15b   :  { %v8908_v35 = vpop.permute.xlu1 %282  ;;  %6722 = vmatprep.mubr.f32.mxu0 %v2277_v27 }
 0x15c   :  { %11174 = vst [vmem:[#allocation37_spill] sm:$0xff] %v8908_v35 }
 0x15d   :  { %v1081_v33 = vpop.permute.xlu0 %1080 }
 0x15e   :  { %7356 = vset.pattern.permute.xlu1 %v11143_v24  ;;  %v1140_v34 = vmul.f32 %v8771_v43, %v1081_v33  ;;  %v8918_v39 = vpop.f32.mrf.mxu0  ;;  %2501 = vperm.xlu0 %7400, %v8430_v30   ;;  %v2278_v43 = vld [vmem:[%s11024_s0 + $0x8a] sm:$0xff] }
 0x15f   :  { %302 = vperm.xlu1 %7356, %v8335_v28   ;;  %6723 = vmatmul.mubr.f32.gmra.mxu0 %v2278_v43 }
 0x160   :  { %v8923_v45 = vadd.f32 %v1140_v34, %v8750_v16  ;;  %v8932_v49 = vpop.f32.mrf.mxu0  ;;  %v8939_v16 = vpop.f32.mrf.mxu1 }
 0x161   :  { %v8927_v52 = vpop.permute.xlu1 %562  ;;  %11178 = vst [vmem:[#allocation41_spill] sm:$0xff] %v8939_v16 }
 0x162   :  { %11177 = vst [vmem:[#allocation40_spill] sm:$0xff] %v8927_v52  ;;  %7403 = vset.pattern.permute.xlu0 %v11143_v24  ;;  %v8947_v27 = vpop.f32.mrf.mxu1 }
 0x163   :  { %7357 = vset.pattern.permute.xlu1 %v11145_v36  ;;  %11180 = vst [vmem:[#allocation43_spill] sm:$0xff] %v8947_v27  ;;  %v8957_v16 = vpop.permute.xlu0 %1132 }
 0x164   :  { %847 = vperm.xlu1 %7357, %v8308_v18   ;;  %v8954_v43 = vpop.f32.mrf.mxu1  ;;  %11183 = vst [vmem:[#allocation46_spill] sm:$0xff] %v8957_v16 }
 0x165   :  { %11182 = vst [vmem:[#allocation45_spill] sm:$0xff] %v8954_v43 }
 0x166   :  { %v8942_v34 = vpop.permute.xlu1 %1100  ;;  %v8944_v33 = vpop.f32.mrf.mxu0 }
 0x167   :  { %11179 = vst [vmem:[#allocation42_spill] sm:$0xff] %v8942_v34  ;;  %v8962_v34 = vpop.f32.mrf.mxu1 }
 0x168   :  { %7358 = vset.pattern.permute.xlu1 %v11146_v59  ;;  %v8950_v57 = vpop.f32.mrf.mxu0 }
 0x169   :  { %1116 = vperm.xlu1 %7358, %v8283_v8   ;;  %v8972_v43 = vpop.f32.mrf.mxu1 }
 0x16b   :  { %v8952_v50 = vpop.permute.xlu1 %1369  ;;  %v8980_v56 = vpop.f32.mrf.mxu1 }
 0x16c   :  { %11181 = vst [vmem:[#allocation44_spill] sm:$0xff] %v8952_v50 }
 0x16d   :  { %7359 = vset.pattern.permute.xlu1 %v11148_v60  ;;  %v8959_v42 = vpop.f32.mrf.mxu0 }
 0x16e   :  { %11184 = vst [vmem:[#allocation47_spill] sm:$0xff] %v8959_v42  ;;  %1654 = vperm.xlu1 %7359, %v8461_v17   ;;  %v8970_v8 = vpop.permute.xlu0 %1136 }
 0x16f   :  { %v8966_v27 = vpop.f32.mrf.mxu0  ;;  %11185 = vst [vmem:[#allocation48_spill] sm:$0xff] %v8970_v8  ;;  %v8989_v8 = vpop.f32.mrf.mxu1 }
 0x171   :  { %v8964_v35 = vpop.permute.xlu1 %1907  ;;  %v9000_v2 = vpop.f32.mrf.mxu1 }
 0x172   :  { %7360 = vset.pattern.permute.xlu1 %v11151_v51  ;;  %11191 = vst [vmem:[#allocation54_spill] sm:$0xff] %v9000_v2 }
 0x173   :  { %1923 = vperm.xlu1 %7360, %v8809_v9   ;;  %v9006_v55 = vpop.f32.mrf.mxu1 }
 0x175   :  { %v8974_v6 = vpop.f32.mrf.mxu0 }
 0x176   :  { %11186 = vst [vmem:[#allocation49_spill] sm:$0xff] %v8974_v6  ;;  %v8976_v16 = vpop.permute.xlu1 %2176  ;;  %v8984_v52 = vpop.permute.xlu0 %1353 }
 0x177   :  { %7361 = vset.pattern.permute.xlu1 %v11141_v53  ;;  %v8982_v58 = vpop.f32.mrf.mxu0 }
 0x178   :  { %2461 = vperm.xlu1 %7361, %v8682_v23   ;;  %11187 = vst [vmem:[#allocation50_spill] sm:$0xff] %v8982_v58 }
 0x17a   :  { %v8994_v6 = vpop.permute.xlu0 %1361 }
 0x17b   :  { %v8986_v11 = vpop.permute.xlu1 %2445 }
 0x17c   :  { %7362 = vset.pattern.permute.xlu1 %v11143_v24  ;;  %v8991_v4 = vpop.f32.mrf.mxu0 }
 0x17d   :  { %11188 = vst [vmem:[#allocation51_spill] sm:$0xff] %v8991_v4  ;;  %307 = vperm.xlu1 %7362, %v8361_v46  }
 0x17e   :  { %v8996_v20 = vpop.f32.mrf.mxu0  ;;  %v9008_v42 = vpop.permute.xlu0 %1373 }
 0x17f   :  { %11189 = vst [vmem:[#allocation52_spill] sm:$0xff] %v8996_v20  ;;  %11193 = vst [vmem:[#allocation56_spill] sm:$0xff] %v9008_v42  ;;  %v9030_v42 = vld [vmem:[%s11022_s3 + $0x48] sm:$0xff] }
 0x180   :  { %v8998_v23 = vpop.permute.xlu1 %287 }
 0x181   :  { %11190 = vst [vmem:[#allocation53_spill] sm:$0xff] %v8998_v23  ;;  %7363 = vset.pattern.permute.xlu1 %v11145_v36  ;;  %v9016_v23 = vpop.f32.mrf.mxu1 }
 0x182   :  { %851 = vperm.xlu1 %7363, %v8335_v28   ;;  %11196 = vst [vmem:[#allocation59_spill] sm:$0xff] %v9016_v23  ;;  %v9020_v50 = vpop.permute.xlu0 %1377 }
 0x183   :  { %v9004_v58 = vpop.f32.mrf.mxu0  ;;  %11198 = vst [vmem:[#allocation61_spill] sm:$0xff] %v9020_v50 }
 0x184   :  { %11192 = vst [vmem:[#allocation55_spill] sm:$0xff] %v9004_v58  ;;  %v9025_v58 = vpop.f32.mrf.mxu1 }
 0x185   :  { %v9010_v4 = vpop.permute.xlu1 %835  ;;  %v9014_v20 = vpop.f32.mrf.mxu0  ;;  %11200 = vst [vmem:[#allocation63_spill] sm:$0xff] %v9025_v58 }
 0x186   :  { %11194 = vst [vmem:[#allocation57_spill] sm:$0xff] %v9010_v4  ;;  %7364 = vset.pattern.permute.xlu1 %v11146_v59  ;;  %11195 = vst [vmem:[#allocation58_spill] sm:$0xff] %v9014_v20  ;;  %v9037_v20 = vpop.f32.mrf.mxu1  ;;  %v9040_v50 = vpop.permute.xlu0 %1381 }
 0x187   :  { %1120 = vperm.xlu1 %7364, %v8308_v18   ;;  %11203 = vst [vmem:[#allocation66_spill] sm:$0xff] %v9037_v20  ;;  %11204 = vst [vmem:[#allocation67_spill] sm:$0xff] %v9040_v50 }
 0x18a   :  { %v9018_v2 = vpop.permute.xlu1 %1104  ;;  %v9023_v28 = vpop.f32.mrf.mxu0 }
 0x18b   :  { %11197 = vst [vmem:[#allocation60_spill] sm:$0xff] %v9018_v2  ;;  %7365 = vset.pattern.permute.xlu1 %v11148_v60  ;;  %11199 = vst [vmem:[#allocation62_spill] sm:$0xff] %v9023_v28  ;;  %v9045_v2 = vpop.f32.mrf.mxu1 }
 0x18c   :  { %1658 = vperm.xlu1 %7365, %v9030_v42   ;;  %v9033_v18 = vpop.f32.mrf.mxu0  ;;  %11206 = vst [vmem:[#allocation69_spill] sm:$0xff] %v9045_v2 }
 0x18d   :  { %11201 = vst [vmem:[#allocation64_spill] sm:$0xff] %v9033_v18  ;;  %v9053_v18 = vpop.permute.xlu0 %1385  ;;  %v9055_v20 = vpop.f32.mrf.mxu1 }
 0x18e   :  { %11209 = vst [vmem:[#allocation72_spill] sm:$0xff] %v9053_v18  ;;  %11210 = vst [vmem:[#allocation73_spill] sm:$0xff] %v9055_v20 }
 0x18f   :  { %v9035_v23 = vpop.permute.xlu1 %1642  ;;  %v9065_v2 = vpop.f32.mrf.mxu1 }
 0x190   :  { %11202 = vst [vmem:[#allocation65_spill] sm:$0xff] %v9035_v23  ;;  %7366 = vset.pattern.permute.xlu1 %v11151_v51  ;;  %11212 = vst [vmem:[#allocation75_spill] sm:$0xff] %v9065_v2  ;;  %v9087_v2 = vld [vmem:[%s11022_s3 + $0x60] sm:$0xff] }
 0x191   :  { %1927 = vperm.xlu1 %7366, %v8461_v17   ;;  %v9075_v18 = vpop.f32.mrf.mxu1  ;;  %11218 = vst [vmem:[#allocation81_spill] sm:$0xff] %v9087_v2 }
 0x192   :  { %v9043_v28 = vpop.f32.mrf.mxu0  ;;  %11214 = vst [vmem:[#allocation77_spill] sm:$0xff] %v9075_v18 }
 0x193   :  { %11205 = vst [vmem:[#allocation68_spill] sm:$0xff] %v9043_v28  ;;  %v9063_v28 = vpop.permute.xlu0 %1389 }
 0x194   :  { %v9047_v58 = vpop.permute.xlu1 %1911  ;;  %v9050_v4 = vpop.f32.mrf.mxu0  ;;  %11211 = vst [vmem:[#allocation74_spill] sm:$0xff] %v9063_v28 }
 0x195   :  { %11207 = vst [vmem:[#allocation70_spill] sm:$0xff] %v9047_v58  ;;  %7367 = vset.pattern.permute.xlu1 %v11141_v53  ;;  %11208 = vst [vmem:[#allocation71_spill] sm:$0xff] %v9050_v4 }
 0x196   :  { %2465 = vperm.xlu1 %7367, %v8782_v26  }
 0x199   :  { %v9057_v23 = vpop.permute.xlu1 %2449  ;;  %v6591_v50 = vpop.f32.mrf.mxu0 }
 0x19a   :  { %7368 = vset.pattern.permute.xlu1 %v11143_v24 }
 0x19b   :  { %312 = vperm.xlu1 %7368, %v8398_v1   ;;  %v9061_v17 = vpop.f32.mrf.mxu0  ;;  %v9079_v1 = vpop.permute.xlu0 %1393 }
 0x19c   :  { %11216 = vst [vmem:[#allocation79_spill] sm:$0xff] %v9079_v1 }
 0x19e   :  { %v9067_v4 = vpop.permute.xlu1 %292  ;;  %v9069_v26 = vpop.f32.mrf.mxu0 }
 0x19f   :  { %11213 = vst [vmem:[#allocation76_spill] sm:$0xff] %v9067_v4  ;;  %7369 = vset.pattern.permute.xlu1 %v11145_v36 }
 0x1a0   :  { %855 = vperm.xlu1 %7369, %v8361_v46   ;;  %v9073_v20 = vpop.f32.mrf.mxu0  ;;  %v9090_v46 = vpop.f32.mrf.mxu1 }
 0x1a1   :  { %11219 = vst [vmem:[#allocation82_spill] sm:$0xff] %v9090_v46 }
 0x1a3   :  { %v9077_v19 = vpop.permute.xlu1 %839 }
 0x1a4   :  { %11215 = vst [vmem:[#allocation78_spill] sm:$0xff] %v9077_v19  ;;  %7370 = vset.pattern.permute.xlu1 %v11146_v59  ;;  %v9082_v28 = vpop.f32.mrf.mxu0  ;;  %v9099_v19 = vpop.permute.xlu0 %1397 }
 0x1a5   :  { %11217 = vst [vmem:[#allocation80_spill] sm:$0xff] %v9082_v28  ;;  %1124 = vperm.xlu1 %7370, %v9087_v2   ;;  %11223 = vst [vmem:[#allocation86_spill] sm:$0xff] %v9099_v19  ;;  %v9101_v28 = vpop.f32.mrf.mxu1 }
 0x1a6   :  { %v9092_v4 = vpop.f32.mrf.mxu0  ;;  %11224 = vst [vmem:[#allocation87_spill] sm:$0xff] %v9101_v28 }
 0x1a7   :  { %11220 = vst [vmem:[#allocation83_spill] sm:$0xff] %v9092_v4  ;;  %v9115_v58 = vpop.f32.mrf.mxu1 }
 0x1a8   :  { %v9094_v18 = vpop.permute.xlu1 %1108  ;;  %11229 = vst [vmem:[#allocation92_spill] sm:$0xff] %v9115_v58  ;;  %v9121_v19 = vpop.permute.xlu0 %1409  ;;  %v1139_v58 = vmul.f32 %v8371_v48, %v8785_v14  ;;  %v1141_v14 = vmul.f32 %v8474_v12, %v8820_v62  ;;  %v1688_v62 = vmul.f32 %v8980_v56, %v8657_v37 }
 0x1a9   :  { %11221 = vst [vmem:[#allocation84_spill] sm:$0xff] %v9094_v18  ;;  %7371 = vset.pattern.permute.xlu1 %v11148_v60  ;;  %v9097_v1 = vpop.f32.mrf.mxu0  ;;  %11231 = vst [vmem:[#allocation94_spill] sm:$0xff] %v9121_v19  ;;  %v1142_v19 = vmul.f32 %v8798_v41, %v8584_v5 }
 0x1aa   :  { %11222 = vst [vmem:[#allocation85_spill] sm:$0xff] %v9097_v1  ;;  %1662 = vperm.xlu1 %7371, %v9106_v25   ;;  %v1413_v1 = vmul.f32 %v8918_v39, %v8984_v52  ;;  %v1155_v52 = vadd.f32 %v1139_v58, %v8756_v40  ;;  %v1686_v40 = vmul.f32 %v8962_v34, %v8630_v63 }
 0x1ab   :  { %v9109_v46 = vpop.f32.mrf.mxu0  ;;  %v1157_v12 = vadd.f32 %v1141_v14, %v8776_v38  ;;  %v1958_v63 = vmul.f32 %v8741_v22, %v9061_v17  ;;  %v9176_v22 = vld [vmem:[%s11025_s2] sm:$0x7] }
 0x1ac   :  { %11226 = vst [vmem:[#allocation89_spill] sm:$0xff] %v9109_v46  ;;  %v6647_v46 = vpop.f32.mrf.mxu1  ;;  %v1429_v39 = vadd.f32 %v1413_v1, %v8923_v45  ;;  %v2173_v5 = vpop.permute.xlu0 %2172  ;;  %v1959_v45 = vmul.f32 %v6591_v50, %v8483_v54  ;;  %v1960_v1 = vmul.f32 %v8867_v44, %v9073_v20 }
 0x1ad   :  { %v9111_v2 = vpop.permute.xlu1 %1646  ;;  %v9113_v18 = vpop.f32.mrf.mxu0  ;;  %v2232_v38 = vmul.f32 %v6647_v46, %v2173_v5 }
 0x1ae   :  { %11227 = vst [vmem:[#allocation90_spill] sm:$0xff] %v9111_v2  ;;  %11228 = vst [vmem:[#allocation91_spill] sm:$0xff] %v9113_v18  ;;  %7372 = vset.pattern.permute.xlu1 %v11151_v51  ;;  %v2536_v2 = vlaneseq  ;;  %v1412_v18 = vmul.f32 %v8508_v15, %v8932_v49  ;;  %v1158_v15 = vadd.f32 %v1142_v19, %v8768_v61  ;;  %v1414_v49 = vmul.f32 %v8608_v32, %v8950_v57  ;;  %v2088_v41 = vpop.f32.mrf.mxu1 }
 0x1af   :  { %1931 = vperm.xlu1 %7372, %v9030_v42   ;;  %v9119_v28 = vpop.f32.mrf.mxu0  ;;  %v1702_v32 = vadd.f32 %v1686_v40, %v1429_v39 }
 0x1b0   :  { %11230 = vst [vmem:[#allocation93_spill] sm:$0xff] %v9119_v28  ;;  %v1428_v58 = vadd.f32 %v1412_v18, %v1155_v52  ;;  %v1430_v54 = vadd.f32 %v1414_v49, %v1157_v12  ;;  %v2181_v37 = vpop.permute.xlu0 %2180 }
 0x1b1   :  { %v9125_v4 = vpop.f32.mrf.mxu0  ;;  %v1975_v34 = vadd.f32 %v1959_v45, %v1702_v32 }
 0x1b2   :  { %11232 = vst [vmem:[#allocation95_spill] sm:$0xff] %v9125_v4  ;;  %v9127_v25 = vpop.permute.xlu1 %1915  ;;  %v1415_v4 = vmul.f32 %v8944_v33, %v8994_v6  ;;  %v1685_v6 = vmul.f32 %v8636_v29, %v8972_v43  ;;  %v1961_v33 = vmul.f32 %v9069_v26, %v8964_v35  ;;  %v2231_v26 = vmul.f32 %v8887_v10, %v2088_v41 }
 0x1b3   :  { %7373 = vset.pattern.permute.xlu1 %v11141_v53  ;;  %v9134_v28 = vpop.f32.mrf.mxu0 }
 0x1b4   :  { %2469 = vperm.xlu1 %7373, %v8809_v9   ;;  %v9150_v9 = vshrl.u32 %v2536_v2, 7  ;;  %v1431_v57 = vadd.f32 %v1415_v4, %v1158_v15  ;;  %v1701_v2 = vadd.f32 %v1685_v6, %v1428_v58  ;;  %v6650_v4 = vpop.f32.mrf.mxu1 }
 0x1b5   :  { %v9143_v48 = vpop.f32.mrf.mxu0  ;;  %v2234_v44 = vmul.f32 %v6650_v4, %v2181_v37  ;;  %v1416_v4 = vmul.f32 %v8853_v47, %v8966_v27 }
 0x1b6   :  { %11233 = vst [vmem:[#allocation96_spill] sm:$0xff] %v9150_v9  ;;  %v11059_v50 = vsub.s32 2, %v9150_v9  ;;  %v1704_v18 = vadd.f32 %v1688_v62, %v1431_v57  ;;  %v1974_v17 = vadd.f32 %v1958_v63, %v1701_v2  ;;  %v2098_v39 = vpop.f32.mrf.mxu1 }
 0x1b7   :  { %v2454_v61 = vpop.permute.xlu1 %2453  ;;  %v9157_v19 = vpop.f32.mrf.mxu0  ;;  %v2233_v58 = vmul.f32 %v8976_v16, %v2098_v39 }
 0x1b8   :  { %7374 = vset.pattern.permute.xlu1 %v11143_v24  ;;  %v9189_v52 = vrot.slane %v9176_v22, %v11059_v50  ;;  %v1977_v20 = vadd.f32 %v1961_v33, %v1704_v18  ;;  %v2247_v14 = vadd.f32 %v2231_v26, %v1974_v17  ;;  %v1143_v33 = vmul.f32 %v8690_v7, %v8841_v31  ;;  %v6653_v7 = vpop.f32.mrf.mxu1 }
 0x1b9   :  { %317 = vperm.xlu1 %7374, %v8430_v30   ;;  %v9166_v29 = vpop.f32.mrf.mxu0  ;;  %v1687_v30 = vmul.f32 %v8720_v3, %v8989_v8  ;;  %v9194_v3 = vld [vmem:[%s11022_s3 + $0x70] sm:$0xff]  ;;  %v2248_v8 = vadd.f32 %v2232_v38, %v1975_v34 }
 0x1ba   :  { %v2250_v45 = vadd.f32 %v2234_v44, %v1977_v20  ;;  %v1159_v17 = vadd.f32 %v1143_v33, %v8801_v13  ;;  %v11236_v13 = vld [vmem:[#allocation70_spill] sm:$0xff]  ;;  %v2185_v44 = vpop.permute.xlu0 %2184 }
 0x1bb   :  { %v9171_v43 = vpop.f32.mrf.mxu0  ;;  %v1703_v35 = vadd.f32 %v1687_v30, %v1430_v54 }
 0x1bc   :  { %v9180_v56 = vpop.permute.xlu1 %297  ;;  %v1432_v27 = vadd.f32 %v1416_v4, %v1159_v17  ;;  %v11239_v4 = vmov 7   ;;  %v11241_v17 = vld [vmem:[#allocation18_spill] sm:$0xff] }
 0x1bd   :  { %7376 = vset.pattern.permute.xlu1 %v11145_v36  ;;  %v1976_v49 = vadd.f32 %v1960_v1, %v1703_v35  ;;  %v1689_v1 = vmul.f32 %v8671_v21, %v9006_v55 }
 0x1be   :  { %v6703_v46 = vpop.f32.mrf.mxu0  ;;  %859 = vperm.xlu1 %7376, %v9194_v3  }
 0x1bf   :  { %v2505_v15 = vmul.f32 %v6703_v46, %v8986_v11  ;;  %v9209_v11 = vld [vmem:[%s11022_s3 + $0x68] sm:$0xff]  ;;  %v2249_v62 = vadd.f32 %v2233_v58, %v1976_v49 }
 0x1c0   :  { %v2361_v10 = vpop.f32.mrf.mxu0  ;;  %v11234_v46 = vld [vmem:[#allocation88_spill] sm:$0xff] }
 0x1c1   :  { %v2521_v5 = vadd.f32 %v2505_v15, %v2248_v8  ;;  %v2504_v41 = vmul.f32 %v8692_v0, %v2361_v10  ;;  %v9199_v40 = vpop.permute.xlu1 %843  ;;  %v11235_v8 = vld [vmem:[#allocation83_spill] sm:$0xff]  ;;  %v2108_v15 = vpop.f32.mrf.mxu1 }
 0x1c2   :  { %v6706_v6 = vpop.f32.mrf.mxu0  ;;  %7377 = vset.pattern.permute.xlu1 %v11146_v59  ;;  %v1962_v20 = vmul.f32 %v11236_v13, %v11235_v8  ;;  %v2235_v55 = vmul.f32 %v2185_v44, %v2108_v15  ;;  %v11244_v8 = vld [vmem:[#allocation14_spill] sm:$0xff] }
 0x1c3   :  { %v9204_v12 = vadd.f32 %v9189_v52, %v2521_v5  ;;  %v2520_v32 = vadd.f32 %v2504_v41, %v2247_v14  ;;  %v2507_v57 = vmul.f32 %v6706_v6, %v2454_v61  ;;  %1128 = vperm.xlu1 %7377, %v9209_v11   ;;  %v1705_v14 = vadd.f32 %v1689_v1, %v1432_v27  ;;  %v7435_v5 = vld [vmem:[%s11022_s3 + $0x40] sm:$0xff]  ;;  %v11242_v27 = vld [vmem:[#allocation44_spill] sm:$0xff] }
 0x1c4   :  { %v2371_v0 = vpop.f32.mrf.mxu0  ;;  %v11243_v1 = vld [vmem:[#allocation47_spill] sm:$0xff]  ;;  %v11246_v44 = vld [vmem:[#allocation54_spill] sm:$0xff] }
 0x1c5   :  { %v9213_v16 = vadd.f32 %v9189_v52, %v2520_v32  ;;  %v2523_v63 = vadd.f32 %v2507_v57, %v2250_v45  ;;  %v2506_v54 = vmul.f32 %v9057_v23, %v2371_v0  ;;  %v2558_v61 = vsel %vm2556_vm0, %v9204_v12, 0.0  ;;  %v9230_v23 = vld [vmem:[%s11022_s3 + $0x58] sm:$0xff] }
 0x1c6   :  { %v9216_v2 = vpop.permute.xlu1 %1112  ;;  %v6709_v10 = vpop.f32.mrf.mxu0  ;;  %v1978_v21 = vadd.f32 %v1962_v20, %v1705_v14  ;;  %v9262_v32 = vld [vmem:[%s11022_s3 + $0x78] sm:$0xff]  ;;  %v11247_v14 = vld [vmem:[#allocation80_spill] sm:$0xff] }
 0x1c7   :  { %v2557_v34 = vsel %vm2556_vm0, %v9213_v16, 0.0  ;;  %v2522_v38 = vadd.f32 %v2506_v54, %v2249_v62  ;;  %7378 = vset.pattern.permute.xlu1 %v11148_v60  ;;  %v9234_v37 = vadd.f32 %v9189_v52, %v2523_v63  ;;  %v11237_v63 = vmov 4   ;;  %v11245_v20 = vld [vmem:[#allocation65_spill] sm:$0xff] }
 0x1c8   :  { %v2559_v30 = vadd.f32 %v2558_v61, %v2557_v34  ;;  %1666 = vperm.xlu1 %7378, %v9230_v23   ;;  %v2381_v41 = vpop.f32.mrf.mxu0  ;;  %v2251_v6 = vadd.f32 %v2235_v55, %v1978_v21  ;;  %v1963_v21 = vmul.f32 %v11247_v14, %v9127_v25  ;;  %v2189_v55 = vpop.permute.xlu0 %2188 }
 0x1c9   :  { %v9237_v18 = vadd.f32 %v9189_v52, %v2522_v38  ;;  %v2562_v26 = vsel %vm2556_vm0, %v9234_v37, 0.0  ;;  %v11238_v38 = vld [vmem:[#allocation81_spill] sm:$0xff] }
 0x1cb   :  { %v2560_v31 = vsel %vm2556_vm0, %v9237_v18, 0.0  ;;  %v9242_v47 = vpop.permute.xlu1 %1650 }
 0x1cc   :  { %v2561_v35 = vadd.f32 %v2560_v31, %v2559_v30  ;;  %7379 = vset.pattern.permute.xlu1 %v11151_v51  ;;  %v11240_v30 = vld [vmem:[#allocation20_spill] sm:$0xff] }
 0x1cd   :  { %1935 = vperm.xlu1 %7379, %v11234_v46   ;;  %v1144_v31 = vmul.f32 %v11241_v17, %v11240_v30  ;;  %v11248_v17 = vld [vmem:[#allocation8_spill] sm:$0xff] }
 0x1ce   :  { %v2563_v39 = vadd.f32 %v2562_v26, %v2561_v35  ;;  %v1417_v35 = vmul.f32 %v11243_v1, %v11242_v27  ;;  %v11249_v27 = vld [vmem:[#allocation9_spill] sm:$0xff] }
 0x1cf   :  { %v1160_v13 = vadd.f32 %v1144_v31, %v11244_v8 }
 0x1d0   :  { %v9252_v49 = vpop.permute.xlu1 %1919 }
 0x1d1   :  { %7380 = vset.pattern.permute.xlu1 %v11141_v53  ;;  %v1433_v15 = vadd.f32 %v1417_v35, %v1160_v13  ;;  %v11250_v35 = vld [vmem:[#allocation25_spill] sm:$0xff] }
 0x1d2   :  { %2473 = vperm.xlu1 %7380, %v7435_v5   ;;  %v11251_v13 = vld [vmem:[#allocation53_spill] sm:$0xff] }
 0x1d5   :  { %v2458_v58 = vpop.permute.xlu1 %2457 }
 0x1d6   :  { %v2508_v45 = vmul.f32 %v2458_v58, %v2381_v41  ;;  %7381 = vset.pattern.permute.xlu1 %v11145_v36 }
 0x1d7   :  { %863 = vperm.xlu1 %7381, %v9262_v32  }
 0x1d8   :  { %v2524_v57 = vadd.f32 %v2508_v45, %v2251_v6  ;;  %v2236_v6 = vmul.f32 %v6653_v7, %v2189_v55  ;;  %v11255_v55 = vld [vmem:[#allocation19_spill] sm:$0xff] }
 0x1da   :  { %v9266_v0 = vadd.f32 %v9189_v52, %v2524_v57  ;;  %v303_v62 = vpop.permute.xlu1 %302 }
 0x1db   :  { %7382 = vset.pattern.permute.xlu1 %v11237_v63  ;;  %v332_v7 = vmul.f32 %v303_v62, %v11249_v27 }
 0x1dc   :  { %v2564_v54 = vsel %vm2556_vm0, %v9266_v0, 0.0  ;;  %1401 = vperm.xlu1 %7382, %v9209_v11  }
 0x1dd   :  { %v2565_v61 = vadd.f32 %v2564_v54, %v2563_v39  ;;  %v1690_v39 = vmul.f32 %v11246_v44, %v11245_v20  ;;  %v11252_v20 = vld [vmem:[#allocation3_spill] sm:$0xff] }
 0x1de   :  { %v329_v44 = vmul.f32 %v11252_v20, %v11251_v13  ;;  %v11265_v20 = vld [vmem:[#allocation22_spill] sm:$0xff] }
 0x1df   :  { %v848_v34 = vpop.permute.xlu1 %847  ;;  %v1706_v5 = vadd.f32 %v1690_v39, %v1433_v15  ;;  %v11253_v39 = vld [vmem:[#allocation5_spill] sm:$0xff] }
 0x1e0   :  { %7383 = vset.pattern.permute.xlu1 %v11148_v60  ;;  %v331_v15 = vmul.f32 %v11253_v39, %v9180_v56  ;;  %v11262_v56 = vld [vmem:[#allocation28_spill] sm:$0xff]  ;;  %v11266_v39 = vld [vmem:[#allocation57_spill] sm:$0xff] }
 0x1e1   :  { %1670 = vperm.xlu1 %7383, %v11238_v38   ;;  %v1979_v58 = vadd.f32 %v1963_v21, %v1706_v5  ;;  %v11254_v21 = vld [vmem:[#allocation78_spill] sm:$0xff]  ;;  %v11256_v5 = vld [vmem:[#allocation21_spill] sm:$0xff]  ;;  %v1148_v27 = vmul.f32 %v11262_v56, %v9216_v2  ;;  %v11271_v2 = vld [vmem:[#allocation72_spill] sm:$0xff] }
 0x1e2   :  { %v875_v62 = vmul.f32 %v11255_v55, %v11254_v21  ;;  %v11267_v21 = vld [vmem:[#allocation15_spill] sm:$0xff] }
 0x1e3   :  { %v2252_v57 = vadd.f32 %v2236_v6, %v1979_v58  ;;  %v621_v58 = vadd.f32 %v11256_v5, %v332_v7  ;;  %v11257_v6 = vld [vmem:[#allocation31_spill] sm:$0xff]  ;;  %v11264_v7 = vld [vmem:[#allocation37_spill] sm:$0xff]  ;;  %v620_v55 = vadd.f32 %v11267_v21, %v331_v15  ;;  %v11273_v15 = vld [vmem:[#allocation26_spill] sm:$0xff] }
 0x1e4   :  { %v9274_v33 = vpop.permute.xlu1 %1116 }
 0x1e5   :  { %7384 = vset.pattern.permute.xlu1 %v11239_v4 }
 0x1e6   :  { %2208 = vperm.xlu1 %7384, %v11234_v46  }
 0x1e9   :  { %v9282_v26 = vpop.permute.xlu1 %1654 }
 0x1ea   :  { %7385 = vset.pattern.permute.xlu1 %v11141_v53 }
 0x1eb   :  { %2477 = vperm.xlu1 %7385, %v9030_v42  }
 0x1ee   :  { %v9291_v41 = vpop.permute.xlu1 %1923 }
 0x1ef   :  { %7387 = vset.pattern.permute.xlu1 %v11237_v63 }
 0x1f0   :  { %1405 = vperm.xlu1 %7387, %v9194_v3  }
 0x1f3   :  { %v2462_v45 = vpop.permute.xlu1 %2461 }
 0x1f4   :  { %v2509_v54 = vmul.f32 %v6709_v10, %v2462_v45  ;;  %7388 = vset.pattern.permute.xlu1 %v11148_v60 }
 0x1f5   :  { %1674 = vperm.xlu1 %7388, %v9209_v11  }
 0x1f6   :  { %v2525_v42 = vadd.f32 %v2509_v54, %v2252_v57  ;;  %v11259_v57 = vld [vmem:[#allocation40_spill] sm:$0xff] }
 0x1f8   :  { %v9298_v25 = vadd.f32 %v9189_v52, %v2525_v42  ;;  %v308_v30 = vpop.permute.xlu1 %307  ;;  %v11260_v42 = vld [vmem:[#allocation24_spill] sm:$0xff] }
 0x1f9   :  { %v333_v31 = vmul.f32 %v11248_v17, %v308_v30  ;;  %7389 = vset.pattern.permute.xlu1 %v11239_v4  ;;  %v877_v30 = vmul.f32 %v11260_v42, %v848_v34  ;;  %v11261_v17 = vld [vmem:[#allocation12_spill] sm:$0xff]  ;;  %v11270_v42 = vld [vmem:[#allocation35_spill] sm:$0xff] }
 0x1fa   :  { %v2566_v1 = vsel %vm2556_vm0, %v9298_v25, 0.0  ;;  %2212 = vperm.xlu1 %7389, %v9230_v23  }
 0x1fb   :  { %v9306_v10 = vadd.f32 %v2566_v1, %v2565_v61  ;;  %v9309_v8 = vadd.f32 %v11250_v35, %v333_v31  ;;  %v11258_v61 = vld [vmem:[#allocation7_spill] sm:$0xff]  ;;  %v618_v31 = vadd.f32 %v11261_v17, %v329_v44  ;;  %v11263_v35 = vld [vmem:[#allocation4_spill] sm:$0xff]  ;;  %v893_v44 = vadd.f32 %v877_v30, %v620_v55 }
 0x1fc   :  { %v601_v54 = vmul.f32 %v11259_v57, %v11258_v61  ;;  %v328_v13 = vmul.f32 %v11264_v7, %v11263_v35  ;;  %v11268_v61 = vld [vmem:[#allocation32_spill] sm:$0xff] }
 0x1fd   :  { %v852_v14 = vpop.permute.xlu1 %851  ;;  %v891_v5 = vadd.f32 %v875_v62, %v618_v31  ;;  %v11274_v62 = vld [vmem:[#allocation42_spill] sm:$0xff]  ;;  %v11277_v30 = vld [vmem:[#allocation52_spill] sm:$0xff] }
 0x1fe   :  { %v878_v45 = vmul.f32 %v852_v14, %v11257_v6  ;;  %7390 = vset.pattern.permute.xlu1 %v11141_v53  ;;  %v874_v14 = vmul.f32 %v11266_v39, %v11265_v20  ;;  %v617_v34 = vadd.f32 %v601_v54, %v328_v13  ;;  %v1145_v54 = vmul.f32 %v11274_v62, %v11273_v15  ;;  %v11275_v31 = vld [vmem:[#allocation50_spill] sm:$0xff]  ;;  %v11276_v13 = vld [vmem:[#allocation56_spill] sm:$0xff]  ;;  %v11278_v39 = vld [vmem:[#allocation67_spill] sm:$0xff]  ;;  %v2193_v62 = vpop.permute.xlu0 %2192 }
 0x1ff   :  { %2481 = vperm.xlu1 %7390, %v11234_v46   ;;  %v11269_v46 = vld [vmem:[#allocation84_spill] sm:$0xff]  ;;  %v1164_v56 = vadd.f32 %v1148_v27, %v891_v5  ;;  %v1418_v20 = vmul.f32 %v11276_v13, %v11275_v31  ;;  %v1420_v21 = vmul.f32 %v11278_v39, %v11277_v30  ;;  %v11280_v5 = vld [vmem:[#allocation63_spill] sm:$0xff]  ;;  %v9363_v30 = vpop.f32.mrf.mxu0 }
 0x200   :  { %v9327_v1 = vadd.f32 %v878_v45, %v621_v58  ;;  %v1147_v57 = vmul.f32 %v11269_v46, %v11268_v61  ;;  %v11272_v58 = vld [vmem:[#allocation51_spill] sm:$0xff]  ;;  %v890_v35 = vadd.f32 %v874_v14, %v617_v34  ;;  %v11279_v46 = vld [vmem:[#allocation17_spill] sm:$0xff] }
 0x201   :  { %v1421_v45 = vmul.f32 %v11272_v58, %v11271_v2  ;;  %v1161_v27 = vadd.f32 %v1145_v54, %v11279_v46  ;;  %v11283_v2 = vld [vmem:[#allocation69_spill] sm:$0xff] }
 0x202   :  { %v1121_v6 = vpop.permute.xlu1 %1120  ;;  %v1163_v55 = vadd.f32 %v1147_v57, %v890_v35  ;;  %v1693_v58 = vmul.f32 %v9282_v26, %v11283_v2  ;;  %v11284_v57 = vld [vmem:[#allocation89_spill] sm:$0xff] }
 0x203   :  { %v1150_v17 = vmul.f32 %v11270_v42, %v1121_v6  ;;  %7392 = vset.pattern.permute.xlu1 %v11148_v60  ;;  %v9349_v6 = vpop.f32.mrf.mxu1  ;;  %v11281_v42 = vld [vmem:[#allocation90_spill] sm:$0xff]  ;;  %v1437_v34 = vadd.f32 %v1421_v45, %v1164_v56  ;;  %v1434_v15 = vadd.f32 %v1418_v20, %v1161_v27  ;;  %v1964_v35 = vmul.f32 %v9252_v49, %v11284_v57  ;;  %v2391_v49 = vpop.f32.mrf.mxu0 }
 0x204   :  { %1678 = vperm.xlu1 %7392, %v9194_v3   ;;  %v1691_v14 = vmul.f32 %v11281_v42, %v11280_v5  ;;  %v1436_v13 = vadd.f32 %v1420_v21, %v1163_v55  ;;  %v11288_v57 = vld [vmem:[#allocation6_spill] sm:$0xff] }
 0x205   :  { %v9341_v7 = vadd.f32 %v1150_v17, %v893_v44  ;;  %v11282_v44 = vld [vmem:[#allocation66_spill] sm:$0xff]  ;;  %v2118_v54 = vpop.f32.mrf.mxu1 }
 0x206   :  { %v1707_v45 = vadd.f32 %v1691_v14, %v1434_v15  ;;  %v1709_v39 = vadd.f32 %v1693_v58, %v1436_v13  ;;  %v2237_v5 = vmul.f32 %v2193_v62, %v2118_v54  ;;  %v11287_v58 = vld [vmem:[#allocation30_spill] sm:$0xff]  ;;  %v11290_v13 = vld [vmem:[#allocation27_spill] sm:$0xff] }
 0x207   :  { %v1659_v61 = vpop.permute.xlu1 %1658 }
 0x208   :  { %v1694_v17 = vmul.f32 %v11282_v44, %v1659_v61  ;;  %7393 = vset.pattern.permute.xlu1 %v11151_v51  ;;  %v11285_v61 = vld [vmem:[#allocation93_spill] sm:$0xff]  ;;  %v1980_v26 = vadd.f32 %v1964_v35, %v1707_v45  ;;  %v11286_v44 = vld [vmem:[#allocation11_spill] sm:$0xff]  ;;  %v11289_v35 = vld [vmem:[#allocation76_spill] sm:$0xff]  ;;  %v876_v45 = vmul.f32 %v9199_v40, %v11290_v13 }
 0x209   :  { %1947 = vperm.xlu1 %7393, %v9209_v11   ;;  %v330_v62 = vmul.f32 %v11289_v35, %v11288_v57  ;;  %v11301_v57 = vld [vmem:[#allocation16_spill] sm:$0xff] }
 0x20a   :  { %v9361_v31 = vadd.f32 %v1694_v17, %v1437_v34  ;;  %v2253_v42 = vadd.f32 %v2237_v5, %v1980_v26  ;;  %v11294_v5 = vld [vmem:[#allocation60_spill] sm:$0xff] }
 0x20c   :  { %v1928_v56 = vpop.permute.xlu1 %1927 }
 0x20d   :  { %v1966_v46 = vmul.f32 %v1928_v56, %v11285_v61  ;;  %7395 = vset.pattern.permute.xlu1 %v11141_v53  ;;  %v11291_v56 = vld [vmem:[#allocation29_spill] sm:$0xff] }
 0x20e   :  { %2485 = vperm.xlu1 %7395, %v9230_v23   ;;  %v11292_v61 = vld [vmem:[#allocation13_spill] sm:$0xff] }
 0x20f   :  { %v9368_v20 = vadd.f32 %v1966_v46, %v1709_v39  ;;  %v619_v46 = vadd.f32 %v11292_v61, %v330_v62 }
 0x211   :  { %v2466_v27 = vpop.permute.xlu1 %2465 }
 0x212   :  { %v2510_v34 = vmul.f32 %v2466_v27, %v2391_v49  ;;  %7396 = vset.pattern.permute.xlu1 %v11148_v60  ;;  %v11295_v49 = vld [vmem:[#allocation23_spill] sm:$0xff] }
 0x213   :  { %1682 = vperm.xlu1 %7396, %v9262_v32   ;;  %v1146_v27 = vmul.f32 %v11295_v49, %v11294_v5 }
 0x214   :  { %v2526_v21 = vadd.f32 %v2510_v34, %v2253_v42  ;;  %v892_v42 = vadd.f32 %v876_v45, %v619_v46  ;;  %v11304_v46 = vld [vmem:[#allocation85_spill] sm:$0xff] }
 0x215   :  { %v1162_v35 = vadd.f32 %v1146_v27, %v11301_v57  ;;  %v11305_v27 = vld [vmem:[#allocation91_spill] sm:$0xff]  ;;  %v11308_v57 = vld [vmem:[#allocation36_spill] sm:$0xff] }
 0x216   :  { %v9373_v55 = vadd.f32 %v9189_v52, %v2526_v21  ;;  %v313_v14 = vpop.permute.xlu1 %312  ;;  %v11296_v21 = vld [vmem:[#allocation41_spill] sm:$0xff] }
 0x217   :  { %v334_v17 = vmul.f32 %v313_v14, %v11286_v44  ;;  %7397 = vset.pattern.permute.xlu1 %v11239_v4  ;;  %v11297_v14 = vld [vmem:[#allocation58_spill] sm:$0xff] }
 0x218   :  { %v2568_v23 = vsel %vm2556_vm0, %v9373_v55, 0.0  ;;  %2220 = vperm.xlu1 %7397, %v9209_v11   ;;  %v11293_v11 = vld [vmem:[#allocation38_spill] sm:$0xff] }
 0x219   :  { %v2569_v2 = vadd.f32 %v2568_v23, %v9306_v10  ;;  %v623_v15 = vadd.f32 %v11287_v58, %v334_v17  ;;  %v1149_v10 = vmul.f32 %v9274_v33, %v11293_v11  ;;  %v11298_v44 = vld [vmem:[#allocation74_spill] sm:$0xff]  ;;  %v11299_v33 = vld [vmem:[#allocation61_spill] sm:$0xff]  ;;  %v1965_v11 = vmul.f32 %v11304_v46, %v9291_v41  ;;  %v11313_v46 = vld [vmem:[#allocation55_spill] sm:$0xff] }
 0x21a   :  { %v1422_v17 = vmul.f32 %v11298_v44, %v11297_v14 }
 0x21b   :  { %v856_v54 = vpop.permute.xlu1 %855 }
 0x21c   :  { %v879_v39 = vmul.f32 %v11291_v56, %v856_v54  ;;  %7398 = vset.pattern.permute.xlu1 %v11141_v53  ;;  %v11302_v54 = vld [vmem:[#allocation59_spill] sm:$0xff] }
 0x21d   :  { %2489 = vperm.xlu1 %7398, %v11238_v38   ;;  %v1165_v38 = vadd.f32 %v1149_v10, %v892_v42  ;;  %v1692_v13 = vmul.f32 %v11302_v54, %v9242_v47  ;;  %v11303_v56 = vld [vmem:[#allocation75_spill] sm:$0xff]  ;;  %v2197_v10 = vpop.permute.xlu0 %2196 }
 0x21e   :  { %v895_v26 = vadd.f32 %v879_v39, %v9309_v8  ;;  %v11300_v8 = vld [vmem:[#allocation49_spill] sm:$0xff] }
 0x21f   :  { %v1419_v58 = vmul.f32 %v11300_v8, %v11299_v33  ;;  %v1438_v45 = vadd.f32 %v1422_v17, %v1165_v38  ;;  %v11306_v38 = vld [vmem:[#allocation10_spill] sm:$0xff] }
 0x220   :  { %v1125_v34 = vpop.permute.xlu1 %1124 }
 0x221   :  { %v1151_v40 = vmul.f32 %v1125_v34, %v11296_v21  ;;  %7399 = vset.pattern.permute.xlu1 %v11239_v4  ;;  %v1435_v61 = vadd.f32 %v1419_v58, %v1162_v35  ;;  %v2238_v34 = vmul.f32 %v9349_v6, %v2197_v10  ;;  %v11307_v6 = vld [vmem:[#allocation33_spill] sm:$0xff] }
 0x222   :  { %2224 = vperm.xlu1 %7399, %v9194_v3  }
 0x223   :  { %v9401_v23 = vadd.f32 %v1151_v40, %v9327_v1  ;;  %v1708_v5 = vadd.f32 %v1692_v13, %v1435_v61  ;;  %v11312_v61 = vld [vmem:[#allocation79_spill] sm:$0xff] }
 0x225   :  { %v1663_v62 = vpop.permute.xlu1 %1662  ;;  %v1981_v47 = vadd.f32 %v1965_v11, %v1708_v5  ;;  %v1423_v11 = vmul.f32 %v11313_v46, %v11312_v61 }
 0x226   :  { %v1695_v39 = vmul.f32 %v1663_v62, %v11303_v56  ;;  %2228 = vperm.xlu1 %7399, %v9262_v32   ;;  %v11310_v62 = vld [vmem:[#allocation46_spill] sm:$0xff]  ;;  %v11311_v56 = vld [vmem:[#allocation39_spill] sm:$0xff] }
 0x227   :  { %v2254_v40 = vadd.f32 %v2238_v34, %v1981_v47  ;;  %v2201_v47 = vpop.permute.xlu0 %2200 }
 0x228   :  { %v1711_v1 = vadd.f32 %v1695_v39, %v1438_v45 }
 0x22a   :  { %7401 = vset.pattern.permute.xlu1 %v11141_v53  ;;  %v1932_v49 = vpop.permute.xlu1 %1931 }
 0x22b   :  { %v1967_v42 = vmul.f32 %v11305_v27, %v1932_v49  ;;  %2497 = vperm.xlu1 %7401, %v9194_v3   ;;  %v1439_v49 = vadd.f32 %v1423_v11, %v9341_v7  ;;  %v11314_v27 = vld [vmem:[#allocation73_spill] sm:$0xff] }
 0x22d   :  { %v1983_v21 = vadd.f32 %v1967_v42, %v9361_v31 }
 0x22f   :  { %v2470_v32 = vpop.permute.xlu1 %2469  ;;  %7402 = vset.pattern.permute.xlu1 %v11143_v24  ;;  %v11309_v24 = vld [vmem:[#allocation45_spill] sm:$0xff] }
 0x230   :  { %v2511_v41 = vmul.f32 %v9363_v30, %v2470_v32  ;;  %v1153_v54 = vmul.f32 %v11310_v62, %v11309_v24  ;;  %v11316_v62 = vld [vmem:[#allocation48_spill] sm:$0xff] }
 0x232   :  { %v2527_v14 = vadd.f32 %v2511_v41, %v2254_v40 }
 0x234   :  { %v9420_v44 = vadd.f32 %v9189_v52, %v2527_v14  ;;  %v318_v17 = vpop.permute.xlu1 %317 }
 0x235   :  { %v335_v33 = vmul.f32 %v11306_v38, %v318_v17 }
 0x236   :  { %v2570_v3 = vsel %vm2556_vm0, %v9420_v44, 0.0 }
 0x237   :  { %v2571_v8 = vadd.f32 %v2570_v3, %v2569_v2  ;;  %v624_v58 = vadd.f32 %v11307_v6, %v335_v33  ;;  %v6659_v2 = vpop.f32.mrf.mxu1 }
 0x239   :  { %v860_v31 = vpop.permute.xlu1 %859  ;;  %v2128_v32 = vpop.f32.mrf.mxu1 }
 0x23a   :  { %v880_v35 = vmul.f32 %v860_v31, %v11308_v57  ;;  %v2239_v14 = vmul.f32 %v2201_v47, %v2128_v32  ;;  %v11315_v57 = vld [vmem:[#allocation34_spill] sm:$0xff] }
 0x23c   :  { %v896_v30 = vadd.f32 %v880_v35, %v623_v15  ;;  %v6715_v15 = vpop.f32.mrf.mxu0 }
 0x23e   :  { %v1129_v13 = vpop.permute.xlu1 %1128  ;;  %v9429_v45 = vadd.f32 %v1153_v54, %v896_v30  ;;  %v2401_v38 = vpop.f32.mrf.mxu0  ;;  %v11317_v54 = vld [vmem:[#allocation43_spill] sm:$0xff] }
 0x23f   :  { %v1152_v39 = vmul.f32 %v11311_v56, %v1129_v13 }
 0x241   :  { %v9434_v10 = vadd.f32 %v1152_v39, %v895_v26  ;;  %v2255_v26 = vadd.f32 %v2239_v14, %v9368_v20  ;;  %v2205_v39 = vpop.permute.xlu0 %2204 }
 0x242   :  { %v2240_v46 = vmul.f32 %v6659_v2, %v2205_v39 }
 0x243   :  { %v1667_v5 = vpop.permute.xlu1 %1666 }
 0x244   :  { %v1696_v42 = vmul.f32 %v11314_v27, %v1667_v5  ;;  %v2256_v5 = vadd.f32 %v2240_v46, %v1983_v21 }
 0x246   :  { %v1712_v34 = vadd.f32 %v1696_v42, %v1439_v49 }
 0x248   :  { %v1936_v40 = vpop.permute.xlu1 %1935 }
 0x249   :  { %v1968_v41 = vmul.f32 %v1936_v40, %v9134_v28  ;;  %v1154_v28 = vmul.f32 %v11317_v54, %v11316_v62  ;;  %v6662_v40 = vpop.f32.mrf.mxu1  ;;  %v11318_v54 = vld [vmem:[#allocation95_spill] sm:$0xff] }
 0x24b   :  { %v1984_v17 = vadd.f32 %v1968_v41, %v1711_v1  ;;  %v6718_v41 = vpop.f32.mrf.mxu0 }
 0x24d   :  { %v2474_v33 = vpop.permute.xlu1 %2473  ;;  %v2411_v2 = vpop.f32.mrf.mxu0 }
 0x24e   :  { %v2512_v3 = vmul.f32 %v2474_v33, %v2401_v38  ;;  %v2138_v38 = vpop.f32.mrf.mxu1 }
 0x250   :  { %v2528_v6 = vadd.f32 %v2512_v3, %v2255_v26  ;;  %v2217_v26 = vpop.permute.xlu0 %2216 }
 0x252   :  { %v9441_v31 = vadd.f32 %v9189_v52, %v2528_v6  ;;  %v864_v7 = vpop.permute.xlu1 %863 }
 0x253   :  { %v881_v35 = vmul.f32 %v11315_v57, %v864_v7 }
 0x254   :  { %v2572_v24 = vsel %vm2556_vm0, %v9441_v31, 0.0 }
 0x255   :  { %v2573_v30 = vadd.f32 %v2572_v24, %v2571_v8  ;;  %v897_v1 = vadd.f32 %v881_v35, %v624_v58  ;;  %v1940_v35 = vpop.permute.xlu0 %1939 }
 0x257   :  { %v9448_v13 = vadd.f32 %v1154_v28, %v897_v1  ;;  %v1402_v56 = vpop.permute.xlu1 %1401  ;;  %v1969_v28 = vmul.f32 %v11318_v54, %v1940_v35 }
 0x25c   :  { %v1671_v20 = vpop.permute.xlu1 %1670 }
 0x261   :  { %v2209_v61 = vpop.permute.xlu1 %2208 }
 0x262   :  { %v2241_v33 = vmul.f32 %v2209_v61, %v2138_v38  ;;  %v1985_v61 = vadd.f32 %v1969_v28, %v1712_v34  ;;  %v11321_v38 = vld [vmem:[#allocation62_spill] sm:$0xff] }
 0x266   :  { %v2478_v11 = vpop.permute.xlu1 %2477 }
 0x267   :  { %v2513_v49 = vmul.f32 %v6715_v15, %v2478_v11  ;;  %v2257_v15 = vadd.f32 %v2241_v33, %v1984_v17  ;;  %v1425_v33 = vmul.f32 %v11321_v38, %v1402_v56 }
 0x269   :  { %v2529_v27 = vadd.f32 %v2513_v49, %v2256_v5  ;;  %v11319_v49 = vld [vmem:[#allocation64_spill] sm:$0xff] }
 0x26b   :  { %v9451_v42 = vadd.f32 %v9189_v52, %v2529_v27  ;;  %v9453_v47 = vpop.permute.xlu1 %1405  ;;  %v11320_v27 = vld [vmem:[#allocation86_spill] sm:$0xff] }
 0x26d   :  { %v2574_v8 = vsel %vm2556_vm0, %v9451_v42, 0.0 }
 0x26e   :  { %v2575_v58 = vadd.f32 %v2574_v8, %v2573_v30  ;;  %v1944_v30 = vpop.permute.xlu0 %1943  ;;  %v1424_v8 = vmul.f32 %v11320_v27, %v11319_v49 }
 0x270   :  { %v1675_v32 = vpop.permute.xlu1 %1674 }
 0x272   :  { %v1952_v46 = vpop.permute.xlu0 %1951 }
 0x275   :  { %v2213_v14 = vpop.permute.xlu1 %2212 }
 0x276   :  { %v2242_v39 = vmul.f32 %v6662_v40, %v2213_v14  ;;  %v1956_v35 = vpop.permute.xlu0 %1955  ;;  %v1440_v40 = vadd.f32 %v1424_v8, %v9401_v23 }
 0x278   :  { %v2258_v17 = vadd.f32 %v2242_v39, %v1985_v61 }
 0x27a   :  { %v2482_v21 = vpop.permute.xlu1 %2481  ;;  %v2494_v61 = vpop.permute.xlu0 %2493 }
 0x27b   :  { %v2514_v3 = vmul.f32 %v2482_v21, %v2411_v2  ;;  %v11322_v21 = vld [vmem:[#allocation82_spill] sm:$0xff] }
 0x27d   :  { %v2530_v6 = vadd.f32 %v2514_v3, %v2257_v15  ;;  %v1697_v15 = vmul.f32 %v1671_v20, %v11322_v21  ;;  %v6665_v3 = vpop.f32.mrf.mxu1  ;;  %v1970_v20 = vmul.f32 %v1944_v30, %v9157_v19  ;;  %v11324_v21 = vld [vmem:[#allocation94_spill] sm:$0xff]  ;;  %v11326_v30 = vld [vmem:[#allocation87_spill] sm:$0xff] }
 0x27f   :  { %v9458_v7 = vadd.f32 %v9189_v52, %v2530_v6  ;;  %v1679_v57 = vpop.permute.xlu1 %1678  ;;  %v1713_v54 = vadd.f32 %v1697_v15, %v1440_v40  ;;  %v2148_v28 = vpop.f32.mrf.mxu1  ;;  %v11325_v15 = vld [vmem:[#allocation68_spill] sm:$0xff] }
 0x280   :  { %v2243_v23 = vmul.f32 %v2217_v26, %v2148_v28  ;;  %v1427_v19 = vmul.f32 %v11325_v15, %v11324_v21  ;;  %v11328_v26 = vld [vmem:[#allocation92_spill] sm:$0xff]  ;;  %v2708_v28 = vld [vmem:[%s11026_s4] sm:$0xff] }
 0x281   :  { %v2576_v24 = vsel %vm2556_vm0, %v9458_v7, 0.0  ;;  %v1986_v27 = vadd.f32 %v1970_v20, %v1713_v54  ;;  %6741 = vmatprep.mubr.msk.f32.mxu1 %vm2556_vm0, %v2708_v28 }
 0x282   :  { %v2577_v62 = vadd.f32 %v2576_v24, %v2575_v58  ;;  %v11323_v58 = vld [vmem:[#allocation77_spill] sm:$0xff] }
 0x283   :  { %v1698_v6 = vmul.f32 %v11323_v58, %v1675_v32  ;;  %v11327_v58 = vld [vmem:[#allocation71_spill] sm:$0xff] }
 0x284   :  { %v1948_v1 = vpop.permute.xlu1 %1947 }
 0x285   :  { %v1971_v14 = vmul.f32 %v9143_v48, %v1948_v1  ;;  %v2259_v1 = vadd.f32 %v2243_v23, %v1986_v27 }
 0x289   :  { %v2486_v11 = vpop.permute.xlu1 %2485 }
 0x28a   :  { %v2515_v5 = vmul.f32 %v6718_v41, %v2486_v11  ;;  %v1441_v41 = vadd.f32 %v1425_v33, %v9434_v10  ;;  %v6721_v11 = vpop.f32.mrf.mxu0 }
 0x28b   :  { %v2517_v8 = vmul.f32 %v6721_v11, %v2494_v61 }
 0x28c   :  { %v2531_v2 = vadd.f32 %v2515_v5, %v2258_v17  ;;  %v1714_v32 = vadd.f32 %v1698_v6, %v1441_v41  ;;  %v2421_v38 = vpop.f32.mrf.mxu0  ;;  %v1426_v6 = vmul.f32 %v9453_v47, %v11327_v58  ;;  %v6668_v41 = vpop.f32.mrf.mxu1 }
 0x28e   :  { %v9469_v24 = vadd.f32 %v9189_v52, %v2531_v2  ;;  %v1683_v34 = vpop.permute.xlu1 %1682  ;;  %v1987_v5 = vadd.f32 %v1971_v14, %v1714_v32  ;;  %v1699_v14 = vmul.f32 %v1679_v57, %v11328_v26  ;;  %v1442_v47 = vadd.f32 %v1426_v6, %v9429_v45  ;;  %v2158_v61 = vpop.f32.mrf.mxu1 }
 0x28f   :  { %v6724_v11 = vpop.f32.mrf.mxu0 }
 0x290   :  { %v2578_v56 = vsel %vm2556_vm0, %v9469_v24, 0.0 }
 0x291   :  { %v2579_v39 = vadd.f32 %v2578_v56, %v2577_v62  ;;  %v1700_v62 = vmul.f32 %v11326_v30, %v1683_v34 }
 0x293   :  { %v2221_v17 = vpop.permute.xlu1 %2220 }
 0x294   :  { %v2244_v49 = vmul.f32 %v6665_v3, %v2221_v17  ;;  %v1443_v3 = vadd.f32 %v1427_v19, %v9448_v13  ;;  %v1973_v13 = vmul.f32 %v9166_v29, %v1956_v35  ;;  %v2502_v17 = vpop.permute.xlu0 %2501 }
 0x296   :  { %v2260_v10 = vadd.f32 %v2244_v49, %v1987_v5  ;;  %v1716_v32 = vadd.f32 %v1700_v62, %v1443_v3  ;;  %v1715_v5 = vadd.f32 %v1699_v14, %v1442_v47  ;;  %v1972_v49 = vmul.f32 %v1952_v46, %v9171_v43 }
 0x298   :  { %v2490_v48 = vpop.permute.xlu1 %2489  ;;  %v2533_v33 = vadd.f32 %v2517_v8, %v2260_v10  ;;  %v1989_v8 = vadd.f32 %v1973_v13, %v1716_v32 }
 0x299   :  { %v2516_v2 = vmul.f32 %v2490_v48, %v2421_v38 }
 0x29a   :  { %v2553_v56 = vadd.f32 %v9189_v52, %v2533_v33  ;;  %v1988_v33 = vadd.f32 %v1972_v49, %v1715_v5 }
 0x29b   :  { %v2532_v40 = vadd.f32 %v2516_v2, %v2259_v1  ;;  %v2519_v1 = vmul.f32 %v6724_v11, %v2502_v17  ;;  %v2431_v2 = vpop.f32.mrf.mxu0 }
 0x29c   :  { %v2582_v27 = vsel %vm2556_vm0, %v2553_v56, 0.0 }
 0x29d   :  { %v2552_v54 = vadd.f32 %v9189_v52, %v2532_v40  ;;  %v2225_v20 = vpop.permute.xlu1 %2224 }
 0x29e   :  { %v2245_v48 = vmul.f32 %v2225_v20, %v2158_v61 }
 0x29f   :  { %v2580_v34 = vsel %vm2556_vm0, %v2552_v54, 0.0 }
 0x2a0   :  { %v2581_v57 = vadd.f32 %v2580_v34, %v2579_v39  ;;  %v2261_v15 = vadd.f32 %v2245_v48, %v1988_v33 }
 0x2a1   :  { %v2229_v23 = vpop.permute.xlu1 %2228 }
 0x2a2   :  { %v2246_v10 = vmul.f32 %v6668_v41, %v2229_v23  ;;  %v2583_v38 = vadd.f32 %v2582_v27, %v2581_v57 }
 0x2a4   :  { %v2262_v45 = vadd.f32 %v2246_v10, %v1989_v8 }
 0x2a6   :  { %v2498_v21 = vpop.permute.xlu1 %2497  ;;  %v2535_v29 = vadd.f32 %v2519_v1, %v2262_v45 }
 0x2a7   :  { %v2518_v35 = vmul.f32 %v2498_v21, %v2431_v2 }
 0x2a8   :  { %v2555_v19 = vadd.f32 %v9189_v52, %v2535_v29 }
 0x2a9   :  { %v2534_v39 = vadd.f32 %v2518_v35, %v2261_v15 }
 0x2aa   :  { %v2586_v62 = vsel %vm2556_vm0, %v2555_v19, 0.0 }
 0x2ab   :  { %v2554_v43 = vadd.f32 %v9189_v52, %v2534_v39 }
 0x2ad   :  { %v2584_v46 = vsel %vm2556_vm0, %v2554_v43, 0.0 }
 0x2ae   :  { %v2585_v30 = vadd.f32 %v2584_v46, %v2583_v38 }
 0x2b0   :  { %v2587_v58 = vadd.f32 %v2586_v62, %v2585_v30 }
 0x2b2   :  { %v2588_v6 = vrot.slane %v2587_v58, 4 }
 0x2b4   :  { %v2589_v40 = vadd.f32 %v2588_v6, %v2587_v58 }
 0x2b6   :  { %v2590_v41 = vrot.slane %v2589_v40, 2 }
 0x2b8   :  { %v2591_v3 = vadd.f32 %v2590_v41, %v2589_v40 }
 0x2ba   :  { %v2592_v26 = vrot.slane %v2591_v3, 1 }
 0x2bc   :  { %v2593_v14 = vadd.f32 %v2592_v26, %v2591_v3 }
 0x2be   :  { %v2594_v20 = vmul.f32 0.0078125, %v2593_v14 }
 0x2c0   :  { %v9499_v28 = vsub.f32 %v2554_v43, %v2594_v20  ;;  %v9502_v32 = vsub.f32 %v9213_v16, %v2594_v20  ;;  %v9505_v52 = vsub.f32 %v9204_v12, %v2594_v20  ;;  %v9508_v47 = vsub.f32 %v9237_v18, %v2594_v20 }
 0x2c1   :  { %v9511_v34 = vsub.f32 %v9234_v37, %v2594_v20  ;;  %v9514_v61 = vsub.f32 %v9266_v0, %v2594_v20  ;;  %v9517_v13 = vsub.f32 %v9298_v25, %v2594_v20  ;;  %v9520_v57 = vsub.f32 %v9373_v55, %v2594_v20 }
 0x2c2   :  { %v9523_v16 = vsub.f32 %v9420_v44, %v2594_v20  ;;  %v9526_v12 = vsub.f32 %v9441_v31, %v2594_v20  ;;  %v9529_v18 = vsub.f32 %v9451_v42, %v2594_v20  ;;  %v9532_v37 = vsub.f32 %v9458_v7, %v2594_v20 }
 0x2c3   :  { %v9535_v0 = vsub.f32 %v9469_v24, %v2594_v20  ;;  %v9537_v25 = vsub.f32 %v2552_v54, %v2594_v20  ;;  %v9539_v11 = vsub.f32 %v2553_v56, %v2594_v20  ;;  %v9541_v55 = vsub.f32 %v2555_v19, %v2594_v20 }
 0x2c4   :  { %v2611_v44 = vmul.f32 %v9502_v32, %v9502_v32  ;;  %v2612_v31 = vmul.f32 %v9505_v52, %v9505_v52  ;;  %v2613_v42 = vmul.f32 %v9508_v47, %v9508_v47  ;;  %v2614_v7 = vmul.f32 %v9511_v34, %v9511_v34 }
 0x2c5   :  { %v2615_v17 = vmul.f32 %v9514_v61, %v9514_v61  ;;  %v2616_v27 = vmul.f32 %v9517_v13, %v9517_v13  ;;  %v2617_v10 = vmul.f32 %v9520_v57, %v9520_v57  ;;  %v2618_v1 = vmul.f32 %v9523_v16, %v9523_v16 }
 0x2c6   :  { %v2627_v24 = vsel %vm2556_vm0, %v2611_v44, 0.0  ;;  %v2628_v54 = vsel %vm2556_vm0, %v2612_v31, 0.0  ;;  %v2630_v5 = vsel %vm2556_vm0, %v2613_v42, 0.0  ;;  %v2632_v23 = vsel %vm2556_vm0, %v2614_v7, 0.0 }
 0x2c7   :  { %v2629_v56 = vadd.f32 %v2628_v54, %v2627_v24  ;;  %v2634_v38 = vsel %vm2556_vm0, %v2615_v17, 0.0  ;;  %v2636_v45 = vsel %vm2556_vm0, %v2616_v27, 0.0  ;;  %v2619_v2 = vmul.f32 %v9526_v12, %v9526_v12 }
 0x2c8   :  { %v2638_v21 = vsel %vm2556_vm0, %v2617_v10, 0.0  ;;  %v2620_v29 = vmul.f32 %v9529_v18, %v9529_v18  ;;  %v2640_v35 = vsel %vm2556_vm0, %v2618_v1, 0.0  ;;  %v2621_v19 = vmul.f32 %v9532_v37, %v9532_v37 }
 0x2c9   :  { %v2631_v49 = vadd.f32 %v2630_v5, %v2629_v56  ;;  %v2642_v43 = vsel %vm2556_vm0, %v2619_v2, 0.0  ;;  %v2622_v30 = vmul.f32 %v9535_v0, %v9535_v0  ;;  %v2623_v6 = vmul.f32 %v9537_v25, %v9537_v25 }
 0x2ca   :  { %v2644_v62 = vsel %vm2556_vm0, %v2620_v29, 0.0  ;;  %v2646_v40 = vsel %vm2556_vm0, %v2621_v19, 0.0  ;;  %v2624_v3 = vmul.f32 %v9539_v11, %v9539_v11  ;;  %v2625_v20 = vmul.f32 %v9499_v28, %v9499_v28 }
 0x2cb   :  { %v2633_v8 = vadd.f32 %v2632_v23, %v2631_v49  ;;  %v2648_v26 = vsel %vm2556_vm0, %v2622_v30, 0.0  ;;  %v2650_v44 = vsel %vm2556_vm0, %v2623_v6, 0.0  ;;  %v2626_v42 = vmul.f32 %v9541_v55, %v9541_v55 }
 0x2cc   :  { %v2652_v7 = vsel %vm2556_vm0, %v2624_v3, 0.0  ;;  %v2654_v54 = vsel %vm2556_vm0, %v2625_v20, 0.0 }
 0x2cd   :  { %v2635_v48 = vadd.f32 %v2634_v38, %v2633_v8  ;;  %v2656_v17 = vsel %vm2556_vm0, %v2626_v42, 0.0 }
 0x2cf   :  { %v2637_v33 = vadd.f32 %v2636_v45, %v2635_v48  ;;  %v11058_v45 = vsub.s32 0, %v9150_v9 }
 0x2d1   :  { %v2639_v15 = vadd.f32 %v2638_v21, %v2637_v33  ;;  %v11057_v33 = vsub.s32 1, %v9150_v9 }
 0x2d3   :  { %v2641_v39 = vadd.f32 %v2640_v35, %v2639_v15  ;;  %v2691_v29 = vrot.slane %v9176_v22, %v11057_v33 }
 0x2d5   :  { %v2643_v46 = vadd.f32 %v2642_v43, %v2641_v39 }
 0x2d7   :  { %v2645_v58 = vadd.f32 %v2644_v62, %v2643_v46 }
 0x2d9   :  { %v2647_v41 = vadd.f32 %v2646_v40, %v2645_v58 }
 0x2db   :  { %v2649_v14 = vadd.f32 %v2648_v26, %v2647_v41 }
 0x2dd   :  { %v2651_v31 = vadd.f32 %v2650_v44, %v2649_v14 }
 0x2df   :  { %v2653_v24 = vadd.f32 %v2652_v7, %v2651_v31  ;;  %v9653_v7 = vld [vmem:[%s11026_s4 + $0x20] sm:$0xff] }
 0x2e1   :  { %v2655_v56 = vadd.f32 %v2654_v54, %v2653_v24  ;;  %v9662_v24 = vld [vmem:[%s11026_s4 + $0x28] sm:$0xff]  ;;  %v9667_v54 = vld [vmem:[%s11026_s4 + $0x30] sm:$0xff] }
 0x2e3   :  { %v2657_v5 = vadd.f32 %v2656_v17, %v2655_v56  ;;  %v9676_v56 = vld [vmem:[%s11026_s4 + $0x38] sm:$0xff] }
 0x2e4   :  { %v9683_v17 = vld [vmem:[%s11027_s5 + $0x38] sm:$0xff] }
 0x2e5   :  { %v2658_v49 = vrot.slane %v2657_v5, 4 }
 0x2e7   :  { %v2659_v27 = vadd.f32 %v2658_v49, %v2657_v5  ;;  %v9689_v5 = vld [vmem:[%s11027_s5 + $0x30] sm:$0xff]  ;;  %v9694_v49 = vld [vmem:[%s11027_s5 + $0x78] sm:$0xff] }
 0x2e8   :  { %6772 = vmatprep.subr.mxu0 %v9694_v49 }
 0x2e9   :  { %v2660_v23 = vrot.slane %v2659_v27, 2  ;;  %6773 = vmatpush3.msra.mxu0 %v9694_v49 }
 0x2eb   :  { %v2661_v8 = vadd.f32 %v2660_v23, %v2659_v27  ;;  %v9704_v27 = vld [vmem:[%s11027_s5 + $0x28] sm:$0xff]  ;;  %v9710_v23 = vld [vmem:[%s11027_s5 + $0x70] sm:$0xff] }
 0x2ec   :  { %6774 = vmatprep.subr.mxu0 %v9710_v23 }
 0x2ed   :  { %v2662_v10 = vrot.slane %v2661_v8, 1  ;;  %6775 = vmatpush3.msra.mxu0 %v9710_v23 }
 0x2ef   :  { %v2663_v38 = vadd.f32 %v2662_v10, %v2661_v8  ;;  %v9717_v8 = vld [vmem:[%s11027_s5 + $0x20] sm:$0xff]  ;;  %v9724_v10 = vld [vmem:[%s11027_s5 + $0x68] sm:$0xff] }
 0x2f0   :  { %6776 = vmatprep.subr.mxu0 %v9724_v10 }
 0x2f1   :  { %v2664_v48 = vmul.f32 0.0078125, %v2663_v38  ;;  %v9731_v38 = vld [vmem:[%s11027_s5 + $0x18] sm:$0xff]  ;;  %6777 = vmatpush3.msra.mxu0 %v9724_v10 }
 0x2f3   :  { %v2665_v1 = vadd.f32 1e-05, %v2664_v48  ;;  %v9738_v48 = vld [vmem:[%s11027_s5 + $0x60] sm:$0xff] }
 0x2f4   :  { %6778 = vmatprep.subr.mxu0 %v9738_v48 }
 0x2f5   :  { %7417 = vrsqrt.f32 %v2665_v1  ;;  %v9745_v1 = vld [vmem:[%s11027_s5 + $0x10] sm:$0xff]  ;;  %6779 = vmatpush3.msra.mxu0 %v9738_v48 }
 0x302   :  { %v7418_v2 = vpop.eup %7417 }
 0x303   :  { %v2667_v21 = vmul.f32 %v7418_v2, %v9176_v22  ;;  %v9752_v2 = vld [vmem:[%s11027_s5 + $0x58] sm:$0xff] }
 0x304   :  { %6780 = vmatprep.subr.mxu0 %v9752_v2 }
 0x305   :  { %v2671_v15 = vrot.slane %v2667_v21, %v11058_v45  ;;  %v9759_v21 = vld [vmem:[%s11027_s5 + $0x8] sm:$0xff]  ;;  %6781 = vmatpush3.msra.mxu0 %v9752_v2 }
 0x307   :  { %v2679_v35 = vmul.f32 %v2671_v15, %v9523_v16  ;;  %v2678_v39 = vmul.f32 %v2671_v15, %v9520_v57  ;;  %v2677_v19 = vmul.f32 %v2671_v15, %v9517_v13  ;;  %v2676_v62 = vmul.f32 %v2671_v15, %v9514_v61 }
 0x308   :  { %v2675_v58 = vmul.f32 %v2671_v15, %v9511_v34  ;;  %v2687_v6 = vmul.f32 %v2671_v15, %v9541_v55  ;;  %v2686_v40 = vmul.f32 %v2671_v15, %v9499_v28  ;;  %v2685_v22 = vmul.f32 %v2671_v15, %v9539_v11 }
 0x309   :  { %v2699_v43 = vadd.f32 %v2691_v29, %v2679_v35  ;;  %v2698_v46 = vadd.f32 %v2691_v29, %v2678_v39  ;;  %v2697_v30 = vadd.f32 %v2691_v29, %v2677_v19  ;;  %v2684_v16 = vmul.f32 %v2671_v15, %v9537_v25  ;;  %v9776_v35 = vld [vmem:[%s11027_s5 + $0x48] sm:$0xff]  ;;  %v9783_v39 = vld [vmem:[%s11027_s5 + $0xb8] sm:$0xff]  ;;  %v9790_v19 = vld [vmem:[%s11027_s5 + $0x40] sm:$0xff] }
 0x30a   :  { %v2683_v57 = vmul.f32 %v2671_v15, %v9535_v0  ;;  %v2682_v13 = vmul.f32 %v2671_v15, %v9532_v37  ;;  %v2681_v41 = vmul.f32 %v2671_v15, %v9529_v18  ;;  %v2680_v61 = vmul.f32 %v2671_v15, %v9526_v12 }
 0x30b   :  { %6725 = vmatprep.subr.mxu1 %v2699_v43  ;;  %v9612_v34 = vadd.f32 %v2691_v29, %v2687_v6  ;;  %v9614_v3 = vadd.f32 %v2691_v29, %v2686_v40  ;;  %v9616_v55 = vadd.f32 %v2691_v29, %v2685_v22  ;;  %v9618_v28 = vadd.f32 %v2691_v29, %v2684_v16 }
 0x30c   :  { %6726 = vmatpush3.msra.mxu1 %v2699_v43  ;;  %v9620_v25 = vadd.f32 %v2691_v29, %v2683_v57  ;;  %v9622_v11 = vadd.f32 %v2691_v29, %v2682_v13  ;;  %v9624_v0 = vadd.f32 %v2691_v29, %v2681_v41  ;;  %v9626_v37 = vadd.f32 %v2691_v29, %v2680_v61  ;;  %v9799_v43 = vld [vmem:[%s11027_s5 + $0xf8] sm:$0xff] }
 0x30d   :  { %6727 = vmatprep.subr.mxu1 %v2698_v46  ;;  %v2696_v12 = vadd.f32 %v2691_v29, %v2676_v62  ;;  %v2674_v18 = vmul.f32 %v2671_v15, %v9508_v47  ;;  %v2695_v26 = vadd.f32 %v2691_v29, %v2675_v58  ;;  %v2673_v14 = vmul.f32 %v2671_v15, %v9505_v52  ;;  %v9634_v47 = vld [vmem:[%s11026_s4 + $0x8] sm:$0xff]  ;;  %v9639_v52 = vld [vmem:[%s11026_s4 + $0x10] sm:$0xff] }
 0x30e   :  { %6728 = vmatpush3.msra.mxu1 %v2698_v46  ;;  %v2672_v44 = vmul.f32 %v2671_v15, %v9502_v32  ;;  %v9648_v32 = vld [vmem:[%s11026_s4 + $0x18] sm:$0xff]  ;;  %v9764_v15 = vld [vmem:[%s11027_s5 + $0x50] sm:$0xff]  ;;  %v2716_v46 = vld [vmem:[%s11028_s7] sm:$0xff] }
 0x30f   :  { %6729 = vmatprep.subr.mxu1 %v2697_v30  ;;  %v2694_v20 = vadd.f32 %v2691_v29, %v2674_v18  ;;  %v2693_v31 = vadd.f32 %v2691_v29, %v2673_v14  ;;  %6782 = vmatprep.subr.mxu0 %v9764_v15  ;;  %v2717_v62 = vld [vmem:[%s11028_s7 + $0x8] sm:$0xff] }
 0x310   :  { %6730 = vmatpush3.msra.mxu1 %v2697_v30  ;;  %v2692_v42 = vadd.f32 %v2691_v29, %v2672_v44  ;;  %v9769_v29 = vld [vmem:[%s11027_s5] sm:$0xff]  ;;  %6783 = vmatpush3.msra.mxu0 %v9764_v15  ;;  %v11329_v30 = vmov 1  }
 0x311   :  { %6731 = vmatprep.subr.mxu1 %v2696_v12  ;;  %6784 = vmatprep.subr.mxu0 %v9776_v35 }
 0x312   :  { %6732 = vmatpush3.msra.mxu1 %v2696_v12  ;;  %6785 = vmatpush3.msra.mxu0 %v9776_v35 }
 0x313   :  { %6733 = vmatprep.subr.mxu1 %v2695_v26  ;;  %6786 = vmatprep.subr.mxu0 %v9790_v19 }
 0x314   :  { %6734 = vmatpush3.msra.mxu1 %v2695_v26  ;;  %6787 = vmatpush3.msra.mxu0 %v9790_v19 }
 0x315   :  { %6735 = vmatprep.subr.mxu1 %v2694_v20  ;;  %6810 = vmatprep.subr.mxu0 %v9799_v43 }
 0x316   :  { %6736 = vmatpush3.msra.mxu1 %v2694_v20  ;;  %2956 = vperm.xlu1 %7402, %v2716_v46  }
 0x317   :  { %6737 = vmatprep.subr.mxu1 %v2693_v31  ;;  %2961 = vperm.xlu0 %7403, %v2717_v62  }
 0x318   :  { %6738 = vmatpush3.msra.mxu1 %v2693_v31 }
 0x319   :  { %6739 = vmatprep.subr.mxu1 %v2692_v42 }
 0x31a   :  { %6740 = vmatpush3.msra.mxu1 %v2692_v42  ;;  %7404 = vset.pattern.permute.xlu1 %v11329_v30 }
 0x31b   :  { %6742 = vmatmul.mubr.msk.f32.vlgmr.msra.gmra.mxu1 %vm2556_vm0, %v9634_v47  ;;  %6753 = vmatprep.subr.mxu1 %v9683_v17 }
 0x31c   :  { %6744 = vmatprep.mubr.msk.f32.mxu1 %vm2556_vm0, %v9639_v52  ;;  %6754 = vmatpush3.msra.mxu1 %v9683_v17 }
 0x31d   :  { %6755 = vmatprep.subr.mxu1 %v9689_v5  ;;  %3063 = vperm.xlu1 %7404, %v2716_v46  }
 0x31e   :  { %6756 = vmatpush3.msra.mxu1 %v9689_v5  ;;  %7405 = vset.pattern.permute.xlu0 %v11145_v36 }
 0x31f   :  { %6745 = vmatmul.mubr.msk.f32.gmra.mxu1 %vm2556_vm0, %v9648_v32  ;;  %6757 = vmatprep.subr.mxu1 %v9704_v27 }
 0x320   :  { %6747 = vmatprep.mubr.msk.f32.mxu1 %vm2556_vm0, %v9653_v7  ;;  %6758 = vmatpush3.msra.mxu1 %v9704_v27 }
 0x321   :  { %6759 = vmatprep.subr.mxu1 %v9717_v8  ;;  %3067 = vperm.xlu1 %7404, %v2717_v62  }
 0x322   :  { %6760 = vmatpush3.msra.mxu1 %v9717_v8  ;;  %3168 = vperm.xlu0 %7405, %v2716_v46  }
 0x323   :  { %6748 = vmatmul.mubr.msk.f32.gmra.mxu1 %vm2556_vm0, %v9662_v24  ;;  %6761 = vmatprep.subr.mxu1 %v9731_v38 }
 0x324   :  { %6750 = vmatprep.mubr.msk.f32.mxu1 %vm2556_vm0, %v9667_v54  ;;  %6762 = vmatpush3.msra.mxu1 %v9731_v38 }
 0x325   :  { %6763 = vmatprep.subr.mxu1 %v9745_v1  ;;  %7406 = vset.pattern.permute.xlu1 %v11145_v36 }
 0x326   :  { %6764 = vmatpush3.msra.mxu1 %v9745_v1  ;;  %3172 = vperm.xlu1 %7406, %v2717_v62  }
 0x327   :  { %6751 = vmatmul.mubr.msk.f32.gmra.mxu1 %vm2556_vm0, %v9676_v56  ;;  %6765 = vmatprep.subr.mxu1 %v9759_v21 }
 0x328   :  { %6766 = vmatpush3.msra.mxu1 %v9759_v21  ;;  %7408 = vset.pattern.permute.xlu0 %v11146_v59 }
 0x329   :  { %6767 = vmatprep.subr.mxu1 %v9769_v29  ;;  %3277 = vperm.xlu0 %7408, %v2717_v62  }
 0x32a   :  { %6768 = vmatpush3.msra.mxu1 %v9769_v29  ;;  %7407 = vset.pattern.permute.xlu1 %v11146_v59 }
 0x32b   :  { %6791 = vmatprep.subr.mxu1 %v9783_v39  ;;  %3273 = vperm.xlu1 %7407, %v2716_v46  }
 0x32d   :  { %7410 = vset.pattern.permute.xlu0 %v11148_v60 }
 0x32e   :  { %3483 = vperm.xlu0 %7410, %v2716_v46  }
 0x32f   :  { %7409 = vset.pattern.permute.xlu1 %v11237_v63 }
 0x330   :  { %3378 = vperm.xlu1 %7409, %v2716_v46  }
 0x332   :  { %7413 = vset.pattern.permute.xlu0 %v11151_v51 }
 0x333   :  { %3584 = vperm.xlu0 %7413, %v2717_v62  }
 0x334   :  { %3382 = vperm.xlu1 %7409, %v2717_v62  }
 0x337   :  { %7415 = vset.pattern.permute.xlu0 %v11141_v53 }
 0x338   :  { %3779 = vperm.xlu0 %7415, %v2716_v46   ;;  %7411 = vset.pattern.permute.xlu1 %v11148_v60 }
 0x339   :  { %3487 = vperm.xlu1 %7411, %v2717_v62  }
 0x33d   :  { %7412 = vset.pattern.permute.xlu1 %v11151_v51 }
 0x33e   :  { %3580 = vperm.xlu1 %7412, %v2716_v46  }
 0x342   :  { %7414 = vset.pattern.permute.xlu1 %v11239_v4 }
 0x343   :  { %3680 = vperm.xlu1 %7414, %v2716_v46  }
 0x347   :  { %3684 = vperm.xlu1 %7414, %v2717_v62  }
 0x34b   :  { %7416 = vset.pattern.permute.xlu1 %v11141_v53  ;;  %v9838_v53 = vld [vmem:[%s11027_s5 + $0xb0] sm:$0xff] }
 0x34c   :  { %3783 = vperm.xlu1 %7416, %v2717_v62  }
 0x3db   :  { %v6743_v36 = vpop.f32.mrf.mxu1 }
 0x3dd   :  { %v2809_v58 = vpop.f32.mrf.mxu1 }
 0x3df   :  { %v6746_v59 = vpop.f32.mrf.mxu1 }
 0x3e0   :  { %v2849_v16 = vmax.f32 %v6743_v36, %v6746_v59  ;;  %v9856_v59 = vld [vmem:[%s11027_s5 + $0xa8] sm:$0xff] }
 0x3e1   :  { %v2819_v6 = vpop.f32.mrf.mxu1 }
 0x3e2   :  { %v2848_v41 = vmax.f32 %v2809_v58, %v2819_v6 }
 0x3e3   :  { %v6749_v40 = vpop.f32.mrf.mxu1 }
 0x3e5   :  { %v2829_v63 = vpop.f32.mrf.mxu1 }
 0x3e7   :  { %v6752_v22 = vpop.f32.mrf.mxu1 }
 0x3e8   :  { %v2851_v57 = vmax.f32 %v6749_v40, %v6752_v22  ;;  %v9869_v22 = vld [vmem:[%s11027_s5 + $0xf0] sm:$0xff] }
 0x3e9   :  { %v2839_v13 = vpop.f32.mrf.mxu1 }
 0x3ea   :  { %v2853_v61 = vmax.f32 %v2849_v16, %v2851_v57  ;;  %v2850_v12 = vmax.f32 %v2829_v63, %v2839_v13  ;;  %v9876_v16 = vld [vmem:[%s11027_s5 + $0xa0] sm:$0xff]  ;;  %v9886_v13 = vld [vmem:[%s11027_s5 + $0xe8] sm:$0xff] }
 0x3ec   :  { %v2855_v60 = vmax.f32 %v2853_v61, 0.0  ;;  %v2852_v18 = vmax.f32 %v2848_v41, %v2850_v12  ;;  %v9893_v41 = vld [vmem:[%s11027_s5 + $0x98] sm:$0xff]  ;;  %v9900_v61 = vld [vmem:[%s11027_s5 + $0xe0] sm:$0xff]  ;;  %v9907_v12 = vld [vmem:[%s11027_s5 + $0x90] sm:$0xff] }
 0x3ee   :  { %v2860_v26 = vrot.slane %v2855_v60, 3  ;;  %v2854_v51 = vmax.f32 %v2852_v18, 0.0  ;;  %v9914_v60 = vld [vmem:[%s11027_s5 + $0xd8] sm:$0xff]  ;;  %v9921_v18 = vld [vmem:[%s11027_s5 + $0x88] sm:$0xff] }
 0x3f0   :  { %v9824_v14 = vsel %vm2858_vm1, %v2860_v26, 0.0  ;;  %v2859_v4 = vrot.slane %v2854_v51, 3  ;;  %v9935_v51 = vld [vmem:[%s11027_s5 + $0x80] sm:$0xff] }
 0x3f1   :  { %v11061_v31 = vrot.slane %v9824_v14, 1 }
 0x3f2   :  { %v9827_v20 = vsel %vm2858_vm1, %v2859_v4, %v2860_v26  ;;  %v9830_v44 = vsel %vm2858_vm1, 0.0, %v2859_v4  ;;  %v9928_v26 = vld [vmem:[%s11027_s5 + $0xd0] sm:$0xff]  ;;  %v9942_v4 = vld [vmem:[%s11027_s5 + $0xc8] sm:$0xff] }
 0x3f3   :  { %6769 = vmatprep.mubr.msk.f32.mxu1 %vm2556_vm0, %v9830_v44  ;;  %v2978_v42 = vrot.slane %v9830_v44, 1  ;;  %v2979_v46 = vrot.slane %v9827_v20, 1  ;;  %v3083_v30 = vrot.slane %v9830_v44, 2  ;;  %v3084_v62 = vrot.slane %v9827_v20, 2 }
 0x3f4   :  { %6770 = vmatmul.mubr.msk.f32.vlgmr.msra.gmra.mxu1 %vm2556_vm0, %v9827_v20  ;;  %v3188_v6 = vrot.slane %v9830_v44, 4  ;;  %v3189_v40 = vrot.slane %v9827_v20, 4  ;;  %v3398_v45 = vrot.slane %v9830_v44, 6  ;;  %v11062_v50 = vrot.slane %v9827_v20, 6 }
 0x3f5   :  { %6792 = vmatpush3.msra.mxu1 %v9783_v39  ;;  %v2980_v36 = vsel %vm2977_vm2, %v2978_v42, %v2979_v46  ;;  %v9851_v58 = vsel %vm2977_vm2, %v2979_v46, %v11061_v31  ;;  %v3085_v63 = vsel %vm3082_vm3, %v3083_v30, %v3084_v62  ;;  %v11060_v42 = vrot.slane %v9824_v14, 2  ;;  %v9994_v31 = vld [vmem:[%s11027_s5 + $0x128] sm:$0xff] }
 0x3f6   :  { %6793 = vmatprep.subr.mxu1 %v9838_v53  ;;  %6788 = vmatprep.mubr.msk.f32.mxu0 %vm2556_vm0, %v2980_v36  ;;  %v3190_v57 = vsel %vm3187_vm4, %v3188_v6, %v3189_v40  ;;  %v3293_v46 = vrot.slane %v9830_v44, 5  ;;  %v11063_v30 = vrot.slane %v9827_v20, 5  ;;  %v9954_v36 = vld [vmem:[%s11027_s5 + $0x138] sm:$0xff]  ;;  %v9959_v6 = vld [vmem:[%s11027_s5 + $0xc0] sm:$0xff] }
 0x3f7   :  { %6794 = vmatpush3.msra.mxu1 %v9838_v53  ;;  %6789 = vmatmul.mubr.msk.f32.vlgmr.msra.gmra.mxu0 %vm2556_vm0, %v9851_v58 }
 0x3f8   :  { %6795 = vmatprep.subr.mxu1 %v9856_v59  ;;  %6811 = vmatpush3.msra.mxu0 %v9799_v43  ;;  %v3295_v33 = vsel %vm3292_vm5, %v3293_v46, %v11063_v30  ;;  %v3400_v46 = vsel %vm3397_vm6, %v3398_v45, %v11062_v50  ;;  %v10030_v45 = vld [vmem:[%s11027_s5 + $0x118] sm:$0xff]  ;;  %v10058_v30 = vld [vmem:[%s11027_s5 + $0x108] sm:$0xff] }
 0x3f9   :  { %6796 = vmatpush3.msra.mxu1 %v9856_v59  ;;  %6807 = vmatprep.mubr.msk.f32.mxu1 %vm2556_vm0, %v3085_v63  ;;  %v9966_v63 = vsel %vm3082_vm3, %v3084_v62, %v11060_v42  ;;  %v3191_v62 = vrot.slane %v9824_v14, 4  ;;  %v9989_v42 = vld [vmem:[%s11027_s5 + $0x178] sm:$0xff]  ;;  %11333 = vst [vmem:[#allocation81_spill] sm:$0xff] %v10030_v45  ;;  %11337 = vst [vmem:[#allocation47_spill] sm:$0xff] %v10058_v30 }
 0x3fa   :  { %6812 = vmatprep.subr.mxu0 %v9869_v22  ;;  %6826 = vmatprep.mubr.msk.f32.mxu0 %vm2556_vm0, %v3190_v57  ;;  %v9974_v57 = vld [vmem:[%s11027_s5 + $0x130] sm:$0xff]  ;;  %v10051_v50 = vld [vmem:[%s11027_s5 + $0x158] sm:$0xff] }
 0x3fb   :  { %6797 = vmatprep.subr.mxu1 %v9876_v16  ;;  %6813 = vmatpush3.msra.mxu0 %v9869_v22  ;;  %v3192_v44 = vsel %vm3187_vm4, %v3189_v40, %v3191_v62  ;;  %v10016_v40 = vld [vmem:[%s11027_s5 + $0x120] sm:$0xff]  ;;  %v10023_v62 = vld [vmem:[%s11027_s5 + $0x168] sm:$0xff]  ;;  %11336 = vst [vmem:[#allocation44_spill] sm:$0xff] %v10051_v50 }
 0x3fc   :  { %6798 = vmatpush3.msra.mxu1 %v9876_v16  ;;  %6814 = vmatprep.subr.mxu0 %v9886_v13  ;;  %11331 = vst [vmem:[#allocation83_spill] sm:$0xff] %v10016_v40  ;;  %11332 = vst [vmem:[#allocation70_spill] sm:$0xff] %v10023_v62 }
 0x3fd   :  { %6799 = vmatprep.subr.mxu1 %v9893_v41  ;;  %6815 = vmatpush3.msra.mxu0 %v9886_v13 }
 0x3fe   :  { %6800 = vmatpush3.msra.mxu1 %v9893_v41  ;;  %6816 = vmatprep.subr.mxu0 %v9900_v61 }
 0x3ff   :  { %6801 = vmatprep.subr.mxu1 %v9907_v12  ;;  %6817 = vmatpush3.msra.mxu0 %v9900_v61 }
 0x400   :  { %6802 = vmatpush3.msra.mxu1 %v9907_v12  ;;  %6818 = vmatprep.subr.mxu0 %v9914_v60 }
 0x401   :  { %6803 = vmatprep.subr.mxu1 %v9921_v18  ;;  %6819 = vmatpush3.msra.mxu0 %v9914_v60 }
 0x402   :  { %6804 = vmatpush3.msra.mxu1 %v9921_v18  ;;  %6820 = vmatprep.subr.mxu0 %v9928_v26 }
 0x403   :  { %6805 = vmatprep.subr.mxu1 %v9935_v51  ;;  %6821 = vmatpush3.msra.mxu0 %v9928_v26 }
 0x404   :  { %6806 = vmatpush3.msra.mxu1 %v9935_v51  ;;  %6822 = vmatprep.subr.mxu0 %v9942_v4 }
 0x405   :  { %6808 = vmatmul.mubr.msk.f32.vlgmr.msra.gmra.mxu1 %vm2556_vm0, %v9966_v63  ;;  %6823 = vmatpush3.msra.mxu0 %v9942_v4 }
 0x406   :  { %6829 = vmatprep.subr.mxu1 %v9954_v36  ;;  %6824 = vmatprep.subr.mxu0 %v9959_v6 }
 0x407   :  { %6830 = vmatpush3.msra.mxu1 %v9954_v36  ;;  %6845 = vmatprep.mubr.msk.f32.mxu1 %vm2556_vm0, %v3295_v33  ;;  %v10006_v33 = vld [vmem:[%s11027_s5 + $0x170] sm:$0xff] }
 0x408   :  { %6825 = vmatpush3.msra.mxu0 %v9959_v6  ;;  %6831 = vmatprep.subr.mxu1 %v9974_v57  ;;  %11330 = vst [vmem:[#allocation88_spill] sm:$0xff] %v10006_v33 }
 0x409   :  { %6827 = vmatmul.mubr.msk.f32.vlgmr.msra.gmra.mxu0 %vm2556_vm0, %v3192_v44  ;;  %6832 = vmatpush3.msra.mxu1 %v9974_v57  ;;  %v10037_v44 = vld [vmem:[%s11027_s5 + $0x160] sm:$0xff] }
 0x40a   :  { %6848 = vmatprep.subr.mxu0 %v9989_v42  ;;  %6833 = vmatprep.subr.mxu1 %v9994_v31  ;;  %11334 = vst [vmem:[#allocation20_spill] sm:$0xff] %v10037_v44 }
 0x40b   :  { %6849 = vmatpush3.msra.mxu0 %v9989_v42  ;;  %6864 = vmatprep.mubr.msk.f32.mxu0 %vm2556_vm0, %v3400_v46  ;;  %v10044_v46 = vld [vmem:[%s11027_s5 + $0x110] sm:$0xff] }
 0x40c   :  { %6834 = vmatpush3.msra.mxu1 %v9994_v31  ;;  %6850 = vmatprep.subr.mxu0 %v10006_v33  ;;  %11335 = vst [vmem:[#allocation18_spill] sm:$0xff] %v10044_v46 }
 0x40d   :  { %6835 = vmatprep.subr.mxu1 %v10016_v40  ;;  %6851 = vmatpush3.msra.mxu0 %v10006_v33 }
 0x40e   :  { %6836 = vmatpush3.msra.mxu1 %v10016_v40  ;;  %6852 = vmatprep.subr.mxu0 %v10023_v62  ;;  %v10089_v40 = vld [vmem:[%s11027_s5 + $0x1b8] sm:$0xff] }
 0x40f   :  { %6837 = vmatprep.subr.mxu1 %v10030_v45  ;;  %6853 = vmatpush3.msra.mxu0 %v10023_v62  ;;  %v10065_v62 = vld [vmem:[%s11027_s5 + $0x150] sm:$0xff]  ;;  %11341 = vst [vmem:[#allocation80_spill] sm:$0xff] %v10089_v40 }
 0x410   :  { %6838 = vmatpush3.msra.mxu1 %v10030_v45  ;;  %6854 = vmatprep.subr.mxu0 %v10037_v44  ;;  %11338 = vst [vmem:[#allocation14_spill] sm:$0xff] %v10065_v62  ;;  %v10072_v45 = vld [vmem:[%s11027_s5 + $0x100] sm:$0xff] }
 0x411   :  { %6839 = vmatprep.subr.mxu1 %v10044_v46  ;;  %6855 = vmatpush3.msra.mxu0 %v10037_v44  ;;  %11339 = vst [vmem:[#allocation65_spill] sm:$0xff] %v10072_v45  ;;  %v10079_v44 = vld [vmem:[%s11027_s5 + $0x148] sm:$0xff] }
 0x412   :  { %6840 = vmatpush3.msra.mxu1 %v10044_v46  ;;  %6856 = vmatprep.subr.mxu0 %v10051_v50  ;;  %11340 = vst [vmem:[#allocation54_spill] sm:$0xff] %v10079_v44  ;;  %v3296_v46 = vrot.slane %v9824_v14, 5 }
 0x413   :  { %6841 = vmatprep.subr.mxu1 %v10058_v30  ;;  %6857 = vmatpush3.msra.mxu0 %v10051_v50  ;;  %v10094_v50 = vld [vmem:[%s11027_s5 + $0x140] sm:$0xff] }
 0x414   :  { %6842 = vmatpush3.msra.mxu1 %v10058_v30  ;;  %6858 = vmatprep.subr.mxu0 %v10065_v62  ;;  %11342 = vst [vmem:[#allocation8_spill] sm:$0xff] %v10094_v50  ;;  %v11343_v30 = vrot.slane %v9827_v20, 5 }
 0x415   :  { %6843 = vmatprep.subr.mxu1 %v10072_v45  ;;  %6859 = vmatpush3.msra.mxu0 %v10065_v62  ;;  %v10106_v62 = vld [vmem:[%s11027_s5 + $0x1b0] sm:$0xff] }
 0x416   :  { %6844 = vmatpush3.msra.mxu1 %v10072_v45  ;;  %6860 = vmatprep.subr.mxu0 %v10079_v44  ;;  %v3297_v33 = vsel %vm3292_vm5, %v11343_v30, %v3296_v46  ;;  %v3401_v45 = vrot.slane %v9824_v14, 6  ;;  %v10117_v30 = vld [vmem:[%s11027_s5 + $0x1f8] sm:$0xff]  ;;  %v11344_v46 = vrot.slane %v9827_v20, 6 }
 0x417   :  { %6846 = vmatmul.mubr.msk.f32.vlgmr.msra.gmra.mxu1 %vm2556_vm0, %v3297_v33  ;;  %6861 = vmatpush3.msra.mxu0 %v10079_v44  ;;  %v10122_v33 = vld [vmem:[%s11027_s5 + $0x1a8] sm:$0xff]  ;;  %v10134_v44 = vld [vmem:[%s11027_s5 + $0x1f0] sm:$0xff] }
 0x418   :  { %6867 = vmatprep.subr.mxu1 %v10089_v40  ;;  %6862 = vmatprep.subr.mxu0 %v10094_v50  ;;  %11345 = vst [vmem:[#allocation9_spill] sm:$0xff] %v10134_v44 }
 0x419   :  { %6868 = vmatpush3.msra.mxu1 %v10089_v40  ;;  %6883 = vmatprep.mubr.msk.f32.mxu1 %vm2556_vm0, %v9827_v20  ;;  %v3402_v40 = vsel %vm3397_vm6, %v11344_v46, %v3401_v45  ;;  %v10149_v20 = vld [vmem:[%s11027_s5 + $0x1e8] sm:$0xff]  ;;  %v10170_v45 = vld [vmem:[%s11027_s5 + $0x190] sm:$0xff]  ;;  %v10177_v46 = vld [vmem:[%s11027_s5 + $0x1d8] sm:$0xff] }
 0x41a   :  { %6863 = vmatpush3.msra.mxu0 %v10094_v50  ;;  %6869 = vmatprep.subr.mxu1 %v10106_v62  ;;  %v10141_v50 = vld [vmem:[%s11027_s5 + $0x1a0] sm:$0xff]  ;;  %11347 = vst [vmem:[#allocation53_spill] sm:$0xff] %v10149_v20  ;;  %11350 = vst [vmem:[#allocation78_spill] sm:$0xff] %v10170_v45 }
 0x41b   :  { %6865 = vmatmul.mubr.msk.f32.vlgmr.msra.gmra.mxu0 %vm2556_vm0, %v3402_v40  ;;  %6870 = vmatpush3.msra.mxu1 %v10106_v62  ;;  %11346 = vst [vmem:[#allocation25_spill] sm:$0xff] %v10141_v50  ;;  %v10156_v40 = vld [vmem:[%s11027_s5 + $0x198] sm:$0xff]  ;;  %11351 = vst [vmem:[#allocation19_spill] sm:$0xff] %v10177_v46 }
 0x41c   :  { %6886 = vmatprep.subr.mxu0 %v10117_v30  ;;  %6871 = vmatprep.subr.mxu1 %v10122_v33  ;;  %11348 = vst [vmem:[#allocation3_spill] sm:$0xff] %v10156_v40 }
 0x41d   :  { %6887 = vmatpush3.msra.mxu0 %v10117_v30  ;;  %6902 = vmatprep.mubr.msk.f32.mxu0 %vm2556_vm0, %v9851_v58  ;;  %v10163_v58 = vld [vmem:[%s11027_s5 + $0x1e0] sm:$0xff] }
 0x41e   :  { %6872 = vmatpush3.msra.mxu1 %v10122_v33  ;;  %6888 = vmatprep.subr.mxu0 %v10134_v44  ;;  %11349 = vst [vmem:[#allocation5_spill] sm:$0xff] %v10163_v58 }
 0x41f   :  { %6873 = vmatprep.subr.mxu1 %v10141_v50  ;;  %6889 = vmatpush3.msra.mxu0 %v10134_v44 }
 0x420   :  { %6874 = vmatpush3.msra.mxu1 %v10141_v50  ;;  %6890 = vmatprep.subr.mxu0 %v10149_v20  ;;  %v10184_v50 = vld [vmem:[%s11027_s5 + $0x188] sm:$0xff] }
 0x421   :  { %6875 = vmatprep.subr.mxu1 %v10156_v40  ;;  %6891 = vmatpush3.msra.mxu0 %v10149_v20  ;;  %11352 = vst [vmem:[#allocation21_spill] sm:$0xff] %v10184_v50  ;;  %v10191_v20 = vld [vmem:[%s11027_s5 + $0x1d0] sm:$0xff] }
 0x422   :  { %6876 = vmatpush3.msra.mxu1 %v10156_v40  ;;  %6892 = vmatprep.subr.mxu0 %v10163_v58  ;;  %11353 = vst [vmem:[#allocation31_spill] sm:$0xff] %v10191_v20  ;;  %v10198_v40 = vld [vmem:[%s11027_s5 + $0x180] sm:$0xff] }
 0x423   :  { %6877 = vmatprep.subr.mxu1 %v10170_v45  ;;  %6893 = vmatpush3.msra.mxu0 %v10163_v58  ;;  %11354 = vst [vmem:[#allocation7_spill] sm:$0xff] %v10198_v40  ;;  %v10205_v58 = vld [vmem:[%s11027_s5 + $0x1c8] sm:$0xff] }
 0x424   :  { %6878 = vmatpush3.msra.mxu1 %v10170_v45  ;;  %6894 = vmatprep.subr.mxu0 %v10177_v46  ;;  %11355 = vst [vmem:[#allocation40_spill] sm:$0xff] %v10205_v58  ;;  %v10214_v45 = vld [vmem:[%s11027_s5 + $0x238] sm:$0xff] }
 0x425   :  { %6879 = vmatprep.subr.mxu1 %v10184_v50  ;;  %6895 = vmatpush3.msra.mxu0 %v10177_v46  ;;  %v10219_v46 = vld [vmem:[%s11027_s5 + $0x1c0] sm:$0xff] }
 0x426   :  { %6880 = vmatpush3.msra.mxu1 %v10184_v50  ;;  %6896 = vmatprep.subr.mxu0 %v10191_v20  ;;  %v11108_v50 = vmov 0.0  }
 0x427   :  { %6881 = vmatprep.subr.mxu1 %v10198_v40  ;;  %6897 = vmatpush3.msra.mxu0 %v10191_v20  ;;  %v10224_v44 = vrot.slane %v11108_v50, 1  ;;  %v10232_v20 = vld [vmem:[%s11027_s5 + $0x230] sm:$0xff]  ;;  %v10242_v50 = vld [vmem:[%s11027_s5 + $0x228] sm:$0xff] }
 0x428   :  { %6882 = vmatpush3.msra.mxu1 %v10198_v40  ;;  %6898 = vmatprep.subr.mxu0 %v10205_v58 }
 0x429   :  { %6884 = vmatmul.mubr.msk.f32.vlgmr.msra.gmra.mxu1 %vm2556_vm0, %v9824_v14  ;;  %6899 = vmatpush3.msra.mxu0 %v10205_v58  ;;  %v11356_v58 = vrot.slane %v9824_v14, 1 }
 0x42a   :  { %6905 = vmatprep.subr.mxu1 %v10214_v45  ;;  %6900 = vmatprep.subr.mxu0 %v10219_v46 }
 0x42b   :  { %6906 = vmatpush3.msra.mxu1 %v10214_v45  ;;  %6921 = vmatprep.mubr.msk.f32.mxu1 %vm2556_vm0, %v9966_v63  ;;  %v3601_v40 = vsel %vm2977_vm2, %v11356_v58, %v10224_v44  ;;  %v10255_v63 = vld [vmem:[%s11027_s5 + $0x220] sm:$0xff]  ;;  %v10264_v58 = vld [vmem:[%s11027_s5 + $0x218] sm:$0xff] }
 0x42c   :  { %6901 = vmatpush3.msra.mxu0 %v10219_v46  ;;  %6907 = vmatprep.subr.mxu1 %v10232_v20  ;;  %11357 = vst [vmem:[#allocation24_spill] sm:$0xff] %v10264_v58 }
 0x42d   :  { %6903 = vmatmul.mubr.msk.f32.vlgmr.msra.gmra.mxu0 %vm2556_vm0, %v3601_v40  ;;  %6908 = vmatpush3.msra.mxu1 %v10232_v20  ;;  %v10273_v40 = vld [vmem:[%s11027_s5 + $0x210] sm:$0xff] }
 0x42e   :  { %6924 = vmatprep.subr.mxu0 %v9612_v34  ;;  %6909 = vmatprep.subr.mxu1 %v10242_v50 }
 0x42f   :  { %6925 = vmatpush3.msra.mxu0 %v9612_v34  ;;  %6910 = vmatpush3.msra.mxu1 %v10242_v50  ;;  %v10282_v34 = vld [vmem:[%s11027_s5 + $0x208] sm:$0xff] }
 0x430   :  { %6926 = vmatprep.subr.mxu0 %v9614_v3  ;;  %6911 = vmatprep.subr.mxu1 %v10255_v63 }
 0x431   :  { %6927 = vmatpush3.msra.mxu0 %v9614_v3  ;;  %6912 = vmatpush3.msra.mxu1 %v10255_v63  ;;  %v10291_v3 = vld [vmem:[%s11027_s5 + $0x200] sm:$0xff] }
 0x432   :  { %6928 = vmatprep.subr.mxu0 %v9616_v55  ;;  %6913 = vmatprep.subr.mxu1 %v10264_v58 }
 0x433   :  { %6929 = vmatpush3.msra.mxu0 %v9616_v55  ;;  %6914 = vmatpush3.msra.mxu1 %v10264_v58  ;;  %v11358_v55 = vmov 0.0  }
 0x434   :  { %6930 = vmatprep.subr.mxu0 %v9618_v28  ;;  %6915 = vmatprep.subr.mxu1 %v10273_v40  ;;  %v10294_v58 = vrot.slane %v11358_v55, 2 }
 0x435   :  { %6931 = vmatpush3.msra.mxu0 %v9618_v28  ;;  %6916 = vmatpush3.msra.mxu1 %v10273_v40  ;;  %v11359_v28 = vrot.slane %v9824_v14, 2 }
 0x436   :  { %6932 = vmatprep.subr.mxu0 %v9620_v25  ;;  %6917 = vmatprep.subr.mxu1 %v10282_v34 }
 0x437   :  { %6933 = vmatpush3.msra.mxu0 %v9620_v25  ;;  %6918 = vmatpush3.msra.mxu1 %v10282_v34  ;;  %v3700_v55 = vsel %vm3082_vm3, %v11359_v28, %v10294_v58  ;;  %v7437_v25 = vld [vmem:[%s11026_s4] sm:$0xff] }
 0x438   :  { %6934 = vmatprep.subr.mxu0 %v9622_v11  ;;  %6919 = vmatprep.subr.mxu1 %v10291_v3 }
 0x439   :  { %6935 = vmatpush3.msra.mxu0 %v9622_v11  ;;  %6920 = vmatpush3.msra.mxu1 %v10291_v3  ;;  %v10365_v11 = vpop.permute.xlu1 %2956 }
 0x43a   :  { %6936 = vmatprep.subr.mxu0 %v9624_v0  ;;  %6922 = vmatmul.mubr.msk.f32.vlgmr.msra.gmra.mxu1 %vm2556_vm0, %v3700_v55 }
 0x43b   :  { %6937 = vmatpush3.msra.mxu0 %v9624_v0  ;;  %6940 = vmatprep.mubr.msk.f32.mxu0 %vm2556_vm0, %v7437_v25 }
 0x43c   :  { %6938 = vmatprep.subr.mxu0 %v9626_v37  ;;  %6952 = vmatprep.subr.mxu1 %v9683_v17 }
 0x43d   :  { %6939 = vmatpush3.msra.mxu0 %v9626_v37  ;;  %6953 = vmatpush3.msra.mxu1 %v9683_v17  ;;  %v10367_v0 = vpop.permute.xlu1 %3063  ;;  %v10369_v37 = vpop.permute.xlu0 %2961 }
 0x43e   :  { %6941 = vmatmul.mubr.msk.f32.vlgmr.msra.gmra.mxu0 %vm2556_vm0, %v9634_v47  ;;  %6954 = vmatprep.subr.mxu1 %v9689_v5 }
 0x43f   :  { %6943 = vmatprep.mubr.msk.f32.mxu0 %vm2556_vm0, %v9639_v52  ;;  %6955 = vmatpush3.msra.mxu1 %v9689_v5 }
 0x440   :  { %6971 = vmatprep.subr.mxu0 %v9694_v49  ;;  %6956 = vmatprep.subr.mxu1 %v9704_v27 }
 0x441   :  { %6972 = vmatpush3.msra.mxu0 %v9694_v49  ;;  %6957 = vmatpush3.msra.mxu1 %v9704_v27 }
 0x442   :  { %6944 = vmatmul.mubr.msk.f32.gmra.mxu0 %vm2556_vm0, %v9648_v32  ;;  %6973 = vmatprep.subr.mxu0 %v9710_v23  ;;  %v10371_v32 = vpop.permute.xlu1 %3067 }
 0x443   :  { %6946 = vmatprep.mubr.msk.f32.mxu0 %vm2556_vm0, %v9653_v7  ;;  %6958 = vmatprep.subr.mxu1 %v9717_v8 }
 0x444   :  { %6974 = vmatpush3.msra.mxu0 %v9710_v23  ;;  %6959 = vmatpush3.msra.mxu1 %v9717_v8 }
 0x445   :  { %6975 = vmatprep.subr.mxu0 %v9724_v10  ;;  %6960 = vmatprep.subr.mxu1 %v9731_v38 }
 0x446   :  { %6947 = vmatmul.mubr.msk.f32.gmra.mxu0 %vm2556_vm0, %v9662_v24  ;;  %6961 = vmatpush3.msra.mxu1 %v9731_v38  ;;  %v10373_v24 = vpop.permute.xlu0 %3168  ;;  %v10376_v17 = vpop.permute.xlu1 %3172 }
 0x447   :  { %6949 = vmatprep.mubr.msk.f32.mxu0 %vm2556_vm0, %v9667_v54  ;;  %6976 = vmatpush3.msra.mxu0 %v9724_v10 }
 0x448   :  { %6977 = vmatprep.subr.mxu0 %v9738_v48  ;;  %6962 = vmatprep.subr.mxu1 %v9745_v1 }
 0x449   :  { %6978 = vmatpush3.msra.mxu0 %v9738_v48  ;;  %6963 = vmatpush3.msra.mxu1 %v9745_v1 }
 0x44a   :  { %6950 = vmatmul.mubr.msk.f32.gmra.mxu0 %vm2556_vm0, %v9676_v56  ;;  %6979 = vmatprep.subr.mxu0 %v9752_v2  ;;  %v10382_v48 = vpop.permute.xlu0 %3277 }
 0x44b   :  { %6964 = vmatprep.subr.mxu1 %v9759_v21  ;;  %6980 = vmatpush3.msra.mxu0 %v9752_v2 }
 0x44c   :  { %6965 = vmatpush3.msra.mxu1 %v9759_v21  ;;  %6981 = vmatprep.subr.mxu0 %v9764_v15 }
 0x44d   :  { %6966 = vmatprep.subr.mxu1 %v9769_v29  ;;  %6982 = vmatpush3.msra.mxu0 %v9764_v15 }
 0x44e   :  { %6967 = vmatpush3.msra.mxu1 %v9769_v29  ;;  %6983 = vmatprep.subr.mxu0 %v9776_v35  ;;  %v10385_v29 = vpop.permute.xlu1 %3273 }
 0x44f   :  { %6984 = vmatpush3.msra.mxu0 %v9776_v35  ;;  %6990 = vmatprep.subr.mxu1 %v9783_v39 }
 0x450   :  { %6985 = vmatprep.subr.mxu0 %v9790_v19 }
 0x451   :  { %6986 = vmatpush3.msra.mxu0 %v9790_v19 }
 0x452   :  { %7009 = vmatprep.subr.mxu0 %v9799_v43  ;;  %v10389_v25 = vpop.permute.xlu1 %3378 }
 0x453   :  { %11360 = vst [vmem:[#allocation12_spill] sm:$0xff] %v10389_v25 }
 0x4b4   :  { %v6771_v52 = vpop.f32.mrf.mxu1 }
 0x4b5   :  { %v2965_v5 = vmul.f32 %v6771_v52, %v10369_v37  ;;  %v10391_v52 = vpop.permute.xlu1 %3382 }
 0x4b6   :  { %v2945_v56 = vpop.f32.mrf.mxu1 }
 0x4b7   :  { %v6790_v47 = vpop.f32.mrf.mxu0  ;;  %v2964_v23 = vmul.f32 %v10365_v11, %v2945_v56 }
 0x4b8   :  { %v3071_v54 = vmul.f32 %v6790_v47, %v10371_v32 }
 0x4b9   :  { %v3053_v7 = vpop.f32.mrf.mxu0 }
 0x4ba   :  { %v3070_v49 = vmul.f32 %v10367_v0, %v3053_v7  ;;  %v3073_v8 = vadd.f32 %v3071_v54, %v2965_v5  ;;  %v10394_v5 = vpop.permute.xlu1 %3487 }
 0x4bb   :  { %11361 = vst [vmem:[#allocation28_spill] sm:$0xff] %v10394_v5 }
 0x4bc   :  { %v3072_v1 = vadd.f32 %v3070_v49, %v2964_v23 }
 0x4c5   :  { %v6809_v27 = vpop.f32.mrf.mxu1 }
 0x4c6   :  { %v3176_v10 = vmul.f32 %v6809_v27, %v10376_v17 }
 0x4c7   :  { %v3158_v38 = vpop.f32.mrf.mxu1 }
 0x4c8   :  { %v3178_v2 = vadd.f32 %v3176_v10, %v3073_v8  ;;  %v3175_v21 = vmul.f32 %v10373_v24, %v3158_v38  ;;  %v10397_v8 = vpop.permute.xlu0 %3483 }
 0x4c9   :  { %v6828_v15 = vpop.f32.mrf.mxu0  ;;  %11362 = vst [vmem:[#allocation4_spill] sm:$0xff] %v10397_v8 }
 0x4ca   :  { %v3177_v35 = vadd.f32 %v3175_v21, %v3072_v1  ;;  %v3281_v19 = vmul.f32 %v6828_v15, %v10382_v48  ;;  %v10401_v15 = vpop.permute.xlu1 %3580 }
 0x4cb   :  { %v3263_v14 = vpop.f32.mrf.mxu0  ;;  %11363 = vst [vmem:[#allocation37_spill] sm:$0xff] %v10401_v15 }
 0x4cc   :  { %v3283_v55 = vadd.f32 %v3281_v19, %v3178_v2  ;;  %v3280_v28 = vmul.f32 %v10385_v29, %v3263_v14  ;;  %v10405_v14 = vpop.permute.xlu0 %3584 }
 0x4cd   :  { %11365 = vst [vmem:[#allocation57_spill] sm:$0xff] %v10405_v14 }
 0x4ce   :  { %v3282_v47 = vadd.f32 %v3280_v28, %v3177_v35  ;;  %v10403_v19 = vpop.permute.xlu1 %3680 }
 0x4cf   :  { %11364 = vst [vmem:[#allocation22_spill] sm:$0xff] %v10403_v19 }
 0x4d7   :  { %v6847_v7 = vpop.f32.mrf.mxu1 }
 0x4d8   :  { %v3386_v54 = vmul.f32 %v6847_v7, %v10391_v52 }
 0x4d9   :  { %v3368_v56 = vpop.f32.mrf.mxu1 }
 0x4da   :  { %v3388_v49 = vadd.f32 %v3386_v54, %v3283_v55  ;;  %v3385_v27 = vmul.f32 %v10389_v25, %v3368_v56  ;;  %v10408_v54 = vpop.permute.xlu1 %3684 }
 0x4db   :  { %v6866_v23 = vpop.f32.mrf.mxu0  ;;  %11366 = vst [vmem:[#allocation15_spill] sm:$0xff] %v10408_v54 }
 0x4dc   :  { %v3387_v10 = vadd.f32 %v3385_v27, %v3282_v47  ;;  %v3491_v38 = vmul.f32 %v6866_v23, %v10394_v5 }
 0x4dd   :  { %v3473_v1 = vpop.f32.mrf.mxu0 }
 0x4de   :  { %v3493_v2 = vadd.f32 %v3491_v38, %v3388_v49  ;;  %v3490_v21 = vmul.f32 %v10397_v8, %v3473_v1  ;;  %v10413_v8 = vpop.permute.xlu1 %3783 }
 0x4df   :  { %11367 = vst [vmem:[#allocation32_spill] sm:$0xff] %v10413_v8 }
 0x4e0   :  { %v3492_v35 = vadd.f32 %v3490_v21, %v3387_v10 }
 0x4e9   :  { %v6885_v55 = vpop.f32.mrf.mxu1 }
 0x4ea   :  { %v3588_v28 = vmul.f32 %v6885_v55, %v10405_v14  ;;  %v10418_v55 = vld [vmem:[%s11029_s6] sm:$0x7] }
 0x4eb   :  { %v3570_v7 = vpop.f32.mrf.mxu1  ;;  %11368 = vst [vmem:[#allocation84_spill] sm:$0xff] %v10418_v55 }
 0x4ec   :  { %v3590_v47 = vadd.f32 %v3588_v28, %v3493_v2  ;;  %v3587_v56 = vmul.f32 %v10401_v15, %v3570_v7  ;;  %v10420_v2 = vpop.permute.xlu0 %3779 }
 0x4ed   :  { %v6904_v27 = vpop.f32.mrf.mxu0  ;;  %11369 = vst [vmem:[#allocation35_spill] sm:$0xff] %v10420_v2 }
 0x4ee   :  { %v3589_v49 = vadd.f32 %v3587_v56, %v3492_v35  ;;  %v3688_v23 = vmul.f32 %v6904_v27, %v10408_v54  ;;  %v11370_v35 = vsub.s32 2, %v9150_v9 }
 0x4ef   :  { %v3670_v38 = vpop.f32.mrf.mxu0 }
 0x4f0   :  { %v3690_v1 = vadd.f32 %v3688_v23, %v3590_v47  ;;  %v3687_v10 = vmul.f32 %v10403_v19, %v3670_v38  ;;  %v10426_v7 = vrot.slane %v10418_v55, %v11370_v35 }
 0x4f2   :  { %v3689_v21 = vadd.f32 %v3687_v10, %v3589_v49  ;;  %11371 = vst [vmem:[#allocation72_spill] sm:$0xff] %v10426_v7 }
 0x4fa   :  { %v6923_v14 = vpop.f32.mrf.mxu1 }
 0x4fb   :  { %v3787_v28 = vmul.f32 %v6923_v14, %v10413_v8 }
 0x4fc   :  { %v3769_v47 = vpop.f32.mrf.mxu1 }
 0x4fd   :  { %v3789_v56 = vadd.f32 %v3787_v28, %v3690_v1  ;;  %v3786_v27 = vmul.f32 %v10420_v2, %v3769_v47 }
 0x4fe   :  { %v6942_v49 = vpop.f32.mrf.mxu0 }
 0x4ff   :  { %v10430_v23 = vadd.f32 %v10426_v7, %v3789_v56  ;;  %v3788_v38 = vadd.f32 %v3786_v27, %v3689_v21 }
 0x500   :  { %v3856_v10 = vpop.f32.mrf.mxu0 }
 0x501   :  { %11372 = vst [vmem:[#allocation51_spill] sm:$0xff] %v10430_v23  ;;  %v10433_v19 = vadd.f32 %v10426_v7, %v3788_v38  ;;  %v4691_v14 = vsel %vm2556_vm0, %v10430_v23, 0.0 }
 0x502   :  { %v6945_v54 = vpop.f32.mrf.mxu0 }
 0x503   :  { %11373 = vst [vmem:[#allocation26_spill] sm:$0xff] %v10433_v19  ;;  %v4690_v35 = vsel %vm2556_vm0, %v10433_v19, 0.0  ;;  %v3896_v56 = vmax.f32 %v6942_v49, %v6945_v54 }
 0x504   :  { %v10439_v9 = vadd.f32 %v4691_v14, %v4690_v35  ;;  %v3866_v1 = vpop.f32.mrf.mxu0 }
 0x505   :  { %v3895_v27 = vmax.f32 %v3856_v10, %v3866_v1  ;;  %v11383_v1 = vld [vmem:[#allocation65_spill] sm:$0xff] }
 0x506   :  { %v6948_v28 = vpop.f32.mrf.mxu0 }
 0x508   :  { %v3876_v47 = vpop.f32.mrf.mxu0 }
 0x50a   :  { %v6951_v55 = vpop.f32.mrf.mxu0 }
 0x50b   :  { %v3898_v2 = vmax.f32 %v6948_v28, %v6951_v55  ;;  %v11384_v28 = vld [vmem:[#allocation54_spill] sm:$0xff] }
 0x50c   :  { %v3886_v21 = vpop.f32.mrf.mxu0 }
 0x50d   :  { %v3900_v8 = vmax.f32 %v3896_v56, %v3898_v2  ;;  %v3897_v38 = vmax.f32 %v3876_v47, %v3886_v21  ;;  %v11385_v56 = vld [vmem:[#allocation80_spill] sm:$0xff] }
 0x50e   :  { %v11386_v21 = vld [vmem:[#allocation8_spill] sm:$0xff] }
 0x50f   :  { %v3902_v7 = vmax.f32 %v3900_v8, 0.0  ;;  %v3899_v15 = vmax.f32 %v3895_v27, %v3897_v38 }
 0x511   :  { %v3906_v5 = vrot.slane %v3902_v7, 3  ;;  %v3901_v25 = vmax.f32 %v3899_v15, 0.0 }
 0x513   :  { %v10442_v23 = vsel %vm2858_vm1, %v3906_v5, 0.0  ;;  %v3905_v19 = vrot.slane %v3901_v25, 3 }
 0x514   :  { %v4000_v54 = vrot.slane %v10442_v23, 1  ;;  %v4264_v10 = vrot.slane %v10442_v23, 5  ;;  %v4352_v27 = vrot.slane %v10442_v23, 6 }
 0x515   :  { %v10445_v14 = vsel %vm2858_vm1, %v3905_v19, %v3906_v5  ;;  %v10448_v35 = vsel %vm2858_vm1, 0.0, %v3905_v19 }
 0x516   :  { %6968 = vmatprep.mubr.msk.f32.mxu1 %vm2556_vm0, %v10448_v35  ;;  %v3997_v8 = vrot.slane %v10448_v35, 1  ;;  %v3998_v55 = vrot.slane %v10445_v14, 1  ;;  %v4085_v15 = vrot.slane %v10448_v35, 2  ;;  %v4086_v2 = vrot.slane %v10445_v14, 2 }
 0x517   :  { %6969 = vmatmul.mubr.msk.f32.vlgmr.msra.gmra.mxu1 %vm2556_vm0, %v10445_v14  ;;  %v4173_v19 = vrot.slane %v10448_v35, 4  ;;  %v4174_v7 = vrot.slane %v10445_v14, 4 }
 0x518   :  { %6991 = vmatpush3.msra.mxu1 %v9783_v39  ;;  %v3999_v25 = vsel %vm2977_vm2, %v3997_v8, %v3998_v55  ;;  %v10464_v5 = vsel %vm2977_vm2, %v3998_v55, %v4000_v54  ;;  %v4087_v49 = vsel %vm3082_vm3, %v4085_v15, %v4086_v2  ;;  %v11390_v8 = vld [vmem:[#allocation3_spill] sm:$0xff]  ;;  %v11392_v55 = vld [vmem:[#allocation78_spill] sm:$0xff]  ;;  %v11394_v15 = vld [vmem:[#allocation21_spill] sm:$0xff] }
 0x519   :  { %6992 = vmatprep.subr.mxu1 %v9838_v53  ;;  %6987 = vmatprep.mubr.msk.f32.mxu0 %vm2556_vm0, %v3999_v25  ;;  %v4175_v39 = vsel %vm3187_vm4, %v4173_v19, %v4174_v7  ;;  %v11396_v25 = vld [vmem:[#allocation7_spill] sm:$0xff]  ;;  %v4518_v19 = vsel %vm2977_vm2, %v4000_v54, %v10224_v44  ;;  %v11399_v44 = vmov 0.0  }
 0x51a   :  { %6993 = vmatpush3.msra.mxu1 %v9838_v53  ;;  %6988 = vmatmul.mubr.msk.f32.vlgmr.msra.gmra.mxu0 %vm2556_vm0, %v10464_v5  ;;  %v4261_v53 = vrot.slane %v10448_v35, 5 }
 0x51b   :  { %6994 = vmatprep.subr.mxu1 %v9856_v59  ;;  %7010 = vmatpush3.msra.mxu0 %v9799_v43  ;;  %v4088_v43 = vrot.slane %v10442_v23, 2 }
 0x51c   :  { %6995 = vmatpush3.msra.mxu1 %v9856_v59  ;;  %7006 = vmatprep.mubr.msk.f32.mxu1 %vm2556_vm0, %v4087_v49  ;;  %v4262_v59 = vrot.slane %v10445_v14, 5 }
 0x51d   :  { %7011 = vmatprep.subr.mxu0 %v9869_v22  ;;  %7025 = vmatprep.mubr.msk.f32.mxu0 %vm2556_vm0, %v4175_v39 }
 0x51e   :  { %6996 = vmatprep.subr.mxu1 %v9876_v16  ;;  %7012 = vmatpush3.msra.mxu0 %v9869_v22  ;;  %v10507_v22 = vsel %vm3082_vm3, %v4086_v2, %v4088_v43  ;;  %v4265_v47 = vsel %vm3292_vm5, %v4262_v59, %v4264_v10  ;;  %v11395_v2 = vld [vmem:[#allocation31_spill] sm:$0xff] }
 0x51f   :  { %6997 = vmatpush3.msra.mxu1 %v9876_v16  ;;  %7013 = vmatprep.subr.mxu0 %v9886_v13  ;;  %v4263_v16 = vsel %vm3292_vm5, %v4261_v53, %v4262_v59 }
 0x520   :  { %6998 = vmatprep.subr.mxu1 %v9893_v41  ;;  %7014 = vmatpush3.msra.mxu0 %v9886_v13  ;;  %v4176_v13 = vrot.slane %v10442_v23, 4 }
 0x521   :  { %6999 = vmatpush3.msra.mxu1 %v9893_v41  ;;  %7015 = vmatprep.subr.mxu0 %v9900_v61  ;;  %v4349_v41 = vrot.slane %v10448_v35, 6  ;;  %v11388_v35 = vld [vmem:[#allocation25_spill] sm:$0xff] }
 0x522   :  { %7000 = vmatprep.subr.mxu1 %v9907_v12  ;;  %7016 = vmatpush3.msra.mxu0 %v9900_v61  ;;  %v4350_v61 = vrot.slane %v10445_v14, 6 }
 0x523   :  { %7001 = vmatpush3.msra.mxu1 %v9907_v12  ;;  %7017 = vmatprep.subr.mxu0 %v9914_v60  ;;  %v4177_v12 = vsel %vm3187_vm4, %v4174_v7, %v4176_v13 }
 0x524   :  { %7002 = vmatprep.subr.mxu1 %v9921_v18  ;;  %7018 = vmatpush3.msra.mxu0 %v9914_v60  ;;  %v4351_v60 = vsel %vm3397_vm6, %v4349_v41, %v4350_v61  ;;  %v4353_v38 = vsel %vm3397_vm6, %v4350_v61, %v4352_v27 }
 0x525   :  { %7003 = vmatpush3.msra.mxu1 %v9921_v18  ;;  %7019 = vmatprep.subr.mxu0 %v9928_v26  ;;  %v11374_v18 = vld [vmem:[#allocation88_spill] sm:$0xff] }
 0x526   :  { %7004 = vmatprep.subr.mxu1 %v9935_v51  ;;  %7020 = vmatpush3.msra.mxu0 %v9928_v26  ;;  %v11375_v26 = vld [vmem:[#allocation83_spill] sm:$0xff] }
 0x527   :  { %7005 = vmatpush3.msra.mxu1 %v9935_v51  ;;  %7021 = vmatprep.subr.mxu0 %v9942_v4  ;;  %v11376_v51 = vld [vmem:[#allocation70_spill] sm:$0xff] }
 0x528   :  { %7007 = vmatmul.mubr.msk.f32.vlgmr.msra.gmra.mxu1 %vm2556_vm0, %v10507_v22  ;;  %7022 = vmatpush3.msra.mxu0 %v9942_v4  ;;  %v11377_v4 = vld [vmem:[#allocation81_spill] sm:$0xff] }
 0x529   :  { %7028 = vmatprep.subr.mxu1 %v9954_v36  ;;  %7023 = vmatprep.subr.mxu0 %v9959_v6 }
 0x52a   :  { %7029 = vmatpush3.msra.mxu1 %v9954_v36  ;;  %7044 = vmatprep.mubr.msk.f32.mxu1 %vm2556_vm0, %v4263_v16  ;;  %v11379_v36 = vld [vmem:[#allocation18_spill] sm:$0xff] }
 0x52b   :  { %7024 = vmatpush3.msra.mxu0 %v9959_v6  ;;  %7030 = vmatprep.subr.mxu1 %v9974_v57  ;;  %v11381_v6 = vld [vmem:[#allocation47_spill] sm:$0xff] }
 0x52c   :  { %7026 = vmatmul.mubr.msk.f32.vlgmr.msra.gmra.mxu0 %vm2556_vm0, %v4177_v12  ;;  %7031 = vmatpush3.msra.mxu1 %v9974_v57  ;;  %v11382_v57 = vld [vmem:[#allocation14_spill] sm:$0xff] }
 0x52d   :  { %7047 = vmatprep.subr.mxu0 %v9989_v42  ;;  %7032 = vmatprep.subr.mxu1 %v9994_v31 }
 0x52e   :  { %7048 = vmatpush3.msra.mxu0 %v9989_v42  ;;  %7063 = vmatprep.mubr.msk.f32.mxu0 %vm2556_vm0, %v4351_v60  ;;  %v11378_v42 = vld [vmem:[#allocation20_spill] sm:$0xff] }
 0x52f   :  { %7033 = vmatpush3.msra.mxu1 %v9994_v31  ;;  %7049 = vmatprep.subr.mxu0 %v11374_v18  ;;  %v11380_v31 = vld [vmem:[#allocation44_spill] sm:$0xff] }
 0x530   :  { %7034 = vmatprep.subr.mxu1 %v11375_v26  ;;  %7050 = vmatpush3.msra.mxu0 %v11374_v18 }
 0x531   :  { %7035 = vmatpush3.msra.mxu1 %v11375_v26  ;;  %7051 = vmatprep.subr.mxu0 %v11376_v51 }
 0x532   :  { %7036 = vmatprep.subr.mxu1 %v11377_v4  ;;  %7052 = vmatpush3.msra.mxu0 %v11376_v51 }
 0x533   :  { %7037 = vmatpush3.msra.mxu1 %v11377_v4  ;;  %7053 = vmatprep.subr.mxu0 %v11378_v42 }
 0x534   :  { %7038 = vmatprep.subr.mxu1 %v11379_v36  ;;  %7054 = vmatpush3.msra.mxu0 %v11378_v42  ;;  %v11400_v42 = vld [vmem:[#allocation12_spill] sm:$0xff] }
 0x535   :  { %7039 = vmatpush3.msra.mxu1 %v11379_v36  ;;  %7055 = vmatprep.subr.mxu0 %v11380_v31 }
 0x536   :  { %7040 = vmatprep.subr.mxu1 %v11381_v6  ;;  %7056 = vmatpush3.msra.mxu0 %v11380_v31 }
 0x537   :  { %7041 = vmatpush3.msra.mxu1 %v11381_v6  ;;  %7057 = vmatprep.subr.mxu0 %v11382_v57 }
 0x538   :  { %7042 = vmatprep.subr.mxu1 %v11383_v1  ;;  %7058 = vmatpush3.msra.mxu0 %v11382_v57 }
 0x539   :  { %7043 = vmatpush3.msra.mxu1 %v11383_v1  ;;  %7059 = vmatprep.subr.mxu0 %v11384_v28 }
 0x53a   :  { %7045 = vmatmul.mubr.msk.f32.vlgmr.msra.gmra.mxu1 %vm2556_vm0, %v4265_v47  ;;  %7060 = vmatpush3.msra.mxu0 %v11384_v28 }
 0x53b   :  { %7066 = vmatprep.subr.mxu1 %v11385_v56  ;;  %7061 = vmatprep.subr.mxu0 %v11386_v21 }
 0x53c   :  { %7067 = vmatpush3.msra.mxu1 %v11385_v56  ;;  %7082 = vmatprep.mubr.msk.f32.mxu1 %vm2556_vm0, %v10445_v14  ;;  %v11387_v14 = vld [vmem:[#allocation9_spill] sm:$0xff] }
 0x53d   :  { %7062 = vmatpush3.msra.mxu0 %v11386_v21  ;;  %7068 = vmatprep.subr.mxu1 %v10106_v62  ;;  %v11403_v56 = vld [vmem:[#allocation57_spill] sm:$0xff] }
 0x53e   :  { %7064 = vmatmul.mubr.msk.f32.vlgmr.msra.gmra.mxu0 %vm2556_vm0, %v4353_v38  ;;  %7069 = vmatpush3.msra.mxu1 %v10106_v62  ;;  %v11389_v62 = vld [vmem:[#allocation53_spill] sm:$0xff] }
 0x53f   :  { %7085 = vmatprep.subr.mxu0 %v10117_v30  ;;  %7070 = vmatprep.subr.mxu1 %v10122_v33 }
 0x540   :  { %7086 = vmatpush3.msra.mxu0 %v10117_v30  ;;  %7101 = vmatprep.mubr.msk.f32.mxu0 %vm2556_vm0, %v10464_v5  ;;  %v11391_v30 = vld [vmem:[#allocation5_spill] sm:$0xff]  ;;  %v11397_v5 = vld [vmem:[#allocation40_spill] sm:$0xff] }
 0x541   :  { %7071 = vmatpush3.msra.mxu1 %v10122_v33  ;;  %7087 = vmatprep.subr.mxu0 %v11387_v14  ;;  %v11393_v33 = vld [vmem:[#allocation19_spill] sm:$0xff] }
 0x542   :  { %7072 = vmatprep.subr.mxu1 %v11388_v35  ;;  %7088 = vmatpush3.msra.mxu0 %v11387_v14 }
 0x543   :  { %7073 = vmatpush3.msra.mxu1 %v11388_v35  ;;  %7089 = vmatprep.subr.mxu0 %v11389_v62 }
 0x544   :  { %7074 = vmatprep.subr.mxu1 %v11390_v8  ;;  %7090 = vmatpush3.msra.mxu0 %v11389_v62  ;;  %v11405_v62 = vld [vmem:[#allocation15_spill] sm:$0xff] }
 0x545   :  { %7075 = vmatpush3.msra.mxu1 %v11390_v8  ;;  %7091 = vmatprep.subr.mxu0 %v11391_v30 }
 0x546   :  { %7076 = vmatprep.subr.mxu1 %v11392_v55  ;;  %7092 = vmatpush3.msra.mxu0 %v11391_v30 }
 0x547   :  { %7077 = vmatpush3.msra.mxu1 %v11392_v55  ;;  %7093 = vmatprep.subr.mxu0 %v11393_v33  ;;  %v11406_v55 = vld [vmem:[#allocation22_spill] sm:$0xff] }
 0x548   :  { %7078 = vmatprep.subr.mxu1 %v11394_v15  ;;  %7094 = vmatpush3.msra.mxu0 %v11393_v33 }
 0x549   :  { %7079 = vmatpush3.msra.mxu1 %v11394_v15  ;;  %7095 = vmatprep.subr.mxu0 %v11395_v2 }
 0x54a   :  { %7080 = vmatprep.subr.mxu1 %v11396_v25  ;;  %7096 = vmatpush3.msra.mxu0 %v11395_v2 }
 0x54b   :  { %7081 = vmatpush3.msra.mxu1 %v11396_v25  ;;  %7097 = vmatprep.subr.mxu0 %v11397_v5  ;;  %v11407_v25 = vld [vmem:[#allocation32_spill] sm:$0xff] }
 0x54c   :  { %7083 = vmatmul.mubr.msk.f32.vlgmr.msra.gmra.mxu1 %vm2556_vm0, %v10442_v23  ;;  %7098 = vmatpush3.msra.mxu0 %v11397_v5 }
 0x54d   :  { %7104 = vmatprep.subr.mxu1 %v10214_v45  ;;  %7099 = vmatprep.subr.mxu0 %v10219_v46 }
 0x54e   :  { %7105 = vmatpush3.msra.mxu1 %v10214_v45  ;;  %7120 = vmatprep.mubr.msk.f32.mxu1 %vm2556_vm0, %v10507_v22  ;;  %v11398_v45 = vld [vmem:[#allocation24_spill] sm:$0xff] }
 0x54f   :  { %7100 = vmatpush3.msra.mxu0 %v10219_v46  ;;  %7106 = vmatprep.subr.mxu1 %v10232_v20  ;;  %v10638_v46 = vld [vmem:[%s11031_s9 + $0x38] sm:$0xff] }
 0x550   :  { %7102 = vmatmul.mubr.msk.f32.vlgmr.msra.gmra.mxu0 %vm2556_vm0, %v4518_v19  ;;  %7107 = vmatpush3.msra.mxu1 %v10232_v20  ;;  %v10631_v20 = vld [vmem:[%s11030_s8] sm:$0xff] }
 0x551   :  { %7108 = vmatprep.subr.mxu1 %v10242_v50  ;;  %7127 = vmatprep.mubr.msk.f32.mxu0 %vm4750_vm7, %v10631_v20 }
 0x552   :  { %7109 = vmatpush3.msra.mxu1 %v10242_v50  ;;  %v4600_v50 = vsel %vm3082_vm3, %v4088_v43, %v10294_v58  ;;  %v10650_v58 = vld [vmem:[%s11031_s9 + $0x28] sm:$0xff] }
 0x553   :  { %7110 = vmatprep.subr.mxu1 %v10255_v63 }
 0x554   :  { %7111 = vmatpush3.msra.mxu1 %v10255_v63  ;;  %v10643_v63 = vld [vmem:[%s11031_s9 + $0x30] sm:$0xff] }
 0x555   :  { %7112 = vmatprep.subr.mxu1 %v11398_v45 }
 0x556   :  { %7113 = vmatpush3.msra.mxu1 %v11398_v45 }
 0x557   :  { %7114 = vmatprep.subr.mxu1 %v10273_v40 }
 0x558   :  { %7115 = vmatpush3.msra.mxu1 %v10273_v40 }
 0x559   :  { %7116 = vmatprep.subr.mxu1 %v10282_v34 }
 0x55a   :  { %7117 = vmatpush3.msra.mxu1 %v10282_v34 }
 0x55b   :  { %7118 = vmatprep.subr.mxu1 %v10291_v3 }
 0x55c   :  { %7119 = vmatpush3.msra.mxu1 %v10291_v3 }
 0x55d   :  { %7121 = vmatmul.mubr.msk.f32.vlgmr.msra.gmra.mxu1 %vm2556_vm0, %v4600_v50  ;;  %7130 = vmatprep.subr.mxu1 %v11399_v44 }
 0x55e   :  { %7131 = vmatpush3.msra.mxu1 %v10638_v46  ;;  %7146 = vmatprep.mubr.msk.f32.mxu1 %vm7448_vm8, %v11399_v44 }
 0x55f   :  { %7132 = vmatprep.subr.mxu1 %v11399_v44 }
 0x560   :  { %7133 = vmatpush3.msra.mxu1 %v10643_v63 }
 0x561   :  { %7134 = vmatprep.subr.mxu1 %v11399_v44 }
 0x562   :  { %7135 = vmatpush3.msra.mxu1 %v10650_v58 }
 0x563   :  { %7136 = vmatprep.subr.mxu1 %v11399_v44 }
 0x5d7   :  { %v6970_v40 = vpop.f32.mrf.mxu1 }
 0x5d8   :  { %v3993_v43 = vmul.f32 %v6970_v40, %v10369_v37  ;;  %v11408_v40 = vld [vmem:[#allocation35_spill] sm:$0xff] }
 0x5d9   :  { %v3983_v34 = vpop.f32.mrf.mxu1 }
 0x5da   :  { %v6989_v3 = vpop.f32.mrf.mxu0  ;;  %v3992_v16 = vmul.f32 %v3983_v34, %v10365_v11 }
 0x5db   :  { %v4082_v7 = vmul.f32 %v6989_v3, %v10371_v32 }
 0x5dc   :  { %v4072_v54 = vpop.f32.mrf.mxu0 }
 0x5dd   :  { %v4081_v53 = vmul.f32 %v4072_v54, %v10367_v0  ;;  %v4084_v13 = vadd.f32 %v4082_v7, %v3993_v43 }
 0x5df   :  { %v4083_v12 = vadd.f32 %v4081_v53, %v3992_v16 }
 0x5e8   :  { %v7008_v23 = vpop.f32.mrf.mxu1 }
 0x5e9   :  { %v4170_v59 = vmul.f32 %v7008_v23, %v10376_v17  ;;  %v11409_v23 = vld [vmem:[#allocation72_spill] sm:$0xff] }
 0x5ea   :  { %v4160_v49 = vpop.f32.mrf.mxu1 }
 0x5eb   :  { %v4169_v41 = vmul.f32 %v4160_v49, %v10373_v24  ;;  %v4172_v60 = vadd.f32 %v4170_v59, %v4084_v13  ;;  %v11401_v24 = vld [vmem:[#allocation28_spill] sm:$0xff] }
 0x5ec   :  { %v7027_v39 = vpop.f32.mrf.mxu0 }
 0x5ed   :  { %v4258_v18 = vmul.f32 %v7027_v39, %v10382_v48  ;;  %v4171_v51 = vadd.f32 %v4169_v41, %v4083_v12  ;;  %v11402_v48 = vld [vmem:[#allocation4_spill] sm:$0xff] }
 0x5ee   :  { %v4248_v61 = vpop.f32.mrf.mxu0 }
 0x5ef   :  { %v4257_v37 = vmul.f32 %v4248_v61, %v10385_v29  ;;  %v4260_v17 = vadd.f32 %v4258_v18, %v4172_v60  ;;  %v11404_v29 = vld [vmem:[#allocation37_spill] sm:$0xff]  ;;  %v11410_v18 = vld [vmem:[#allocation26_spill] sm:$0xff] }
 0x5f1   :  { %v4259_v31 = vadd.f32 %v4257_v37, %v4171_v51 }
 0x5fa   :  { %v7046_v22 = vpop.f32.mrf.mxu1 }
 0x5fb   :  { %v4346_v0 = vmul.f32 %v7046_v22, %v10391_v52 }
 0x5fc   :  { %v4336_v32 = vpop.f32.mrf.mxu1 }
 0x5fd   :  { %v4345_v36 = vmul.f32 %v4336_v32, %v11400_v42  ;;  %v4348_v6 = vadd.f32 %v4346_v0, %v4260_v17 }
 0x5fe   :  { %v7065_v26 = vpop.f32.mrf.mxu0 }
 0x5ff   :  { %v4434_v57 = vmul.f32 %v7065_v26, %v11401_v24  ;;  %v4347_v28 = vadd.f32 %v4345_v36, %v4259_v31  ;;  %v11411_v26 = vld [vmem:[#allocation51_spill] sm:$0xff] }
 0x600   :  { %v4424_v11 = vpop.f32.mrf.mxu0 }
 0x601   :  { %v4433_v47 = vmul.f32 %v4424_v11, %v11402_v48  ;;  %v4436_v27 = vadd.f32 %v4434_v57, %v4348_v6 }
 0x603   :  { %v4435_v14 = vadd.f32 %v4433_v47, %v4347_v28 }
 0x60c   :  { %v7084_v4 = vpop.f32.mrf.mxu1 }
 0x60d   :  { %v4515_v21 = vmul.f32 %v7084_v4, %v11403_v56 }
 0x60e   :  { %v4505_v10 = vpop.f32.mrf.mxu1 }
 0x60f   :  { %v4514_v38 = vmul.f32 %v4505_v10, %v11404_v29  ;;  %v4517_v35 = vadd.f32 %v4515_v21, %v4436_v27 }
 0x610   :  { %v7103_v1 = vpop.f32.mrf.mxu0 }
 0x611   :  { %v4597_v8 = vmul.f32 %v7103_v1, %v11405_v62  ;;  %v4516_v30 = vadd.f32 %v4514_v38, %v4435_v14  ;;  %v11412_v38 = vld [vmem:[#allocation84_spill] sm:$0xff] }
 0x612   :  { %v4587_v52 = vpop.f32.mrf.mxu0  ;;  %v11413_v14 = vld [vmem:[#allocation96_spill] sm:$0xff] }
 0x613   :  { %v4596_v33 = vmul.f32 %v4587_v52, %v11406_v55  ;;  %v4599_v2 = vadd.f32 %v4597_v8, %v4517_v35  ;;  %v11414_v35 = vsub.s32 0, %v11413_v14  ;;  %v11415_v8 = vsub.s32 1, %v11413_v14 }
 0x615   :  { %v4598_v45 = vadd.f32 %v4596_v33, %v4516_v30  ;;  %v4740_v30 = vrot.slane %v11412_v38, %v11415_v8 }
 0x61d   :  { %v7122_v15 = vpop.f32.mrf.mxu1 }
 0x61e   :  { %v4679_v5 = vmul.f32 %v7122_v15, %v11407_v25 }
 0x61f   :  { %v4669_v19 = vpop.f32.mrf.mxu1 }
 0x620   :  { %v4681_v50 = vadd.f32 %v4679_v5, %v4599_v2  ;;  %v4678_v34 = vmul.f32 %v4669_v19, %v11408_v40  ;;  %v10703_v40 = vld [vmem:[%s11031_s9 + $0x78] sm:$0xff] }
 0x622   :  { %v4680_v3 = vadd.f32 %v4678_v34, %v4598_v45  ;;  %v4689_v54 = vadd.f32 %v11409_v23, %v4681_v50  ;;  %v10698_v50 = vld [vmem:[%s11030_s8 + $0x8] sm:$0xff]  ;;  %v10711_v34 = vld [vmem:[%s11031_s9 + $0x70] sm:$0xff] }
 0x624   :  { %v4688_v7 = vadd.f32 %v11409_v23, %v4680_v3  ;;  %v4695_v43 = vsel %vm2556_vm0, %v4689_v54, 0.0  ;;  %v10720_v3 = vld [vmem:[%s11031_s9 + $0x20] sm:$0xff]  ;;  %v10725_v23 = vld [vmem:[%s11031_s9 + $0x68] sm:$0xff] }
 0x625   :  { %7137 = vmatpush3.msra.mxu1 %v10720_v3 }
 0x626   :  { %v4693_v49 = vsel %vm2556_vm0, %v4688_v7, 0.0  ;;  %7138 = vmatprep.subr.mxu1 %v11399_v44 }
 0x627   :  { %v4694_v39 = vadd.f32 %v4693_v49, %v10439_v9  ;;  %v10748_v49 = vld [vmem:[%s11031_s9 + $0x10] sm:$0xff] }
 0x629   :  { %v4696_v53 = vadd.f32 %v4695_v43, %v4694_v39  ;;  %v10753_v39 = vld [vmem:[%s11031_s9 + $0x58] sm:$0xff]  ;;  %v10762_v43 = vld [vmem:[%s11031_s9 + $0x8] sm:$0xff] }
 0x62b   :  { %v4697_v59 = vrot.slane %v4696_v53, 4 }
 0x62d   :  { %v4698_v22 = vadd.f32 %v4697_v59, %v4696_v53  ;;  %v10767_v53 = vld [vmem:[%s11031_s9 + $0x50] sm:$0xff]  ;;  %v10776_v59 = vld [vmem:[%s11031_s9] sm:$0xff] }
 0x62f   :  { %v4699_v16 = vrot.slane %v4698_v22, 2 }
 0x631   :  { %v4700_v13 = vadd.f32 %v4699_v16, %v4698_v22  ;;  %v10781_v22 = vld [vmem:[%s11031_s9 + $0x48] sm:$0xff]  ;;  %v10791_v16 = vld [vmem:[%s11031_s9 + $0x40] sm:$0xff] }
 0x633   :  { %v4701_v41 = vrot.slane %v4700_v13, 1 }
 0x635   :  { %v4702_v61 = vadd.f32 %v4701_v41, %v4700_v13 }
 0x637   :  { %v4703_v12 = vmul.f32 0.03125, %v4702_v61 }
 0x639   :  { %v4706_v60 = vsub.f32 %v4688_v7, %v4703_v12  ;;  %v4704_v32 = vsub.f32 %v11410_v18, %v4703_v12  ;;  %v4705_v51 = vsub.f32 %v11411_v26, %v4703_v12  ;;  %v4707_v37 = vsub.f32 %v4689_v54, %v4703_v12  ;;  %v10734_v54 = vld [vmem:[%s11031_s9 + $0x18] sm:$0xff]  ;;  %v10739_v7 = vld [vmem:[%s11031_s9 + $0x60] sm:$0xff] }
 0x63a   :  { %7139 = vmatpush3.msra.mxu1 %v10734_v54 }
 0x63b   :  { %v4710_v0 = vmul.f32 %v4706_v60, %v4706_v60  ;;  %v4708_v4 = vmul.f32 %v4704_v32, %v4704_v32  ;;  %v4709_v17 = vmul.f32 %v4705_v51, %v4705_v51  ;;  %v4711_v9 = vmul.f32 %v4707_v37, %v4707_v37  ;;  %7140 = vmatprep.subr.mxu1 %v11399_v44 }
 0x63c   :  { %7141 = vmatpush3.msra.mxu1 %v10748_v49 }
 0x63d   :  { %v4712_v42 = vsel %vm2556_vm0, %v4708_v4, 0.0  ;;  %v4713_v36 = vsel %vm2556_vm0, %v4709_v17, 0.0  ;;  %v4715_v31 = vsel %vm2556_vm0, %v4710_v0, 0.0  ;;  %v4717_v24 = vsel %vm2556_vm0, %v4711_v9, 0.0  ;;  %7142 = vmatprep.subr.mxu1 %v11399_v44  ;;  %v10807_v0 = vld [vmem:[%s11031_s9 + $0xb0] sm:$0xff]  ;;  %v10812_v4 = vld [vmem:[%s11031_s9 + $0xf8] sm:$0xff] }
 0x63e   :  { %v4714_v11 = vadd.f32 %v4713_v36, %v4712_v42  ;;  %7143 = vmatpush3.msra.mxu1 %v10762_v43  ;;  %v10822_v17 = vld [vmem:[%s11031_s9 + $0xa8] sm:$0xff]  ;;  %v10827_v9 = vld [vmem:[%s11031_s9 + $0xf0] sm:$0xff]  ;;  %v10836_v42 = vld [vmem:[%s11031_s9 + $0xa0] sm:$0xff] }
 0x63f   :  { %7144 = vmatprep.subr.mxu1 %v11399_v44  ;;  %v10841_v36 = vld [vmem:[%s11031_s9 + $0xe8] sm:$0xff] }
 0x640   :  { %v4716_v6 = vadd.f32 %v4715_v31, %v4714_v11  ;;  %7145 = vmatpush3.msra.mxu1 %v10776_v59  ;;  %v10850_v11 = vld [vmem:[%s11031_s9 + $0x98] sm:$0xff]  ;;  %v10855_v31 = vld [vmem:[%s11031_s9 + $0xe0] sm:$0xff] }
 0x641   :  { %7168 = vmatprep.subr.mxu1 %v11399_v44 }
 0x642   :  { %v4718_v57 = vadd.f32 %v4717_v24, %v4716_v6  ;;  %v10864_v6 = vld [vmem:[%s11031_s9 + $0x90] sm:$0xff]  ;;  %v10869_v24 = vld [vmem:[%s11031_s9 + $0xd8] sm:$0xff] }
 0x644   :  { %v4719_v10 = vrot.slane %v4718_v57, 4 }
 0x646   :  { %v4720_v1 = vadd.f32 %v4719_v10, %v4718_v57  ;;  %v10878_v57 = vld [vmem:[%s11031_s9 + $0x88] sm:$0xff]  ;;  %v10883_v10 = vld [vmem:[%s11031_s9 + $0xd0] sm:$0xff] }
 0x648   :  { %v4721_v28 = vrot.slane %v4720_v1, 2 }
 0x64a   :  { %v4722_v48 = vadd.f32 %v4721_v28, %v4720_v1  ;;  %v10892_v1 = vld [vmem:[%s11031_s9 + $0x80] sm:$0xff]  ;;  %v10897_v28 = vld [vmem:[%s11031_s9 + $0xc8] sm:$0xff] }
 0x64c   :  { %v4723_v47 = vrot.slane %v4722_v48, 1 }
 0x64e   :  { %v4724_v56 = vadd.f32 %v4723_v47, %v4722_v48  ;;  %v10906_v47 = vld [vmem:[%s11031_s9 + $0xc0] sm:$0xff] }
 0x650   :  { %v4725_v21 = vmul.f32 0.03125, %v4724_v56 }
 0x652   :  { %v4726_v27 = vadd.f32 1e-05, %v4725_v21 }
 0x654   :  { %7419 = vrsqrt.f32 %v4726_v27  ;;  %v10968_v27 = vld [vmem:[%s11033_s10] sm:$0x1] }
 0x661   :  { %v7420_v29 = vpop.eup %7419 }
 0x662   :  { %v4728_v52 = vmul.f32 %v7420_v29, %v11412_v38 }
 0x664   :  { %v4732_v62 = vrot.slane %v4728_v52, %v11414_v35 }
 0x666   :  { %v4734_v55 = vmul.f32 %v4732_v62, %v4705_v51  ;;  %v4733_v33 = vmul.f32 %v4732_v62, %v4704_v32  ;;  %v4736_v15 = vmul.f32 %v4732_v62, %v4707_v37  ;;  %v4735_v2 = vmul.f32 %v4732_v62, %v4706_v60  ;;  %v10801_v51 = vld [vmem:[%s11031_s9 + $0xb8] sm:$0xff] }
 0x668   :  { %v4742_v25 = vadd.f32 %v4740_v30, %v4734_v55  ;;  %v10691_v5 = vadd.f32 %v4740_v30, %v4736_v15  ;;  %v10693_v19 = vadd.f32 %v4740_v30, %v4735_v2  ;;  %v4741_v45 = vadd.f32 %v4740_v30, %v4733_v33  ;;  %v10974_v30 = vld [vmem:[%s11034_s11] sm:$0x1] }
 0x66a   :  { %7123 = vmatprep.subr.mxu0 %v4742_v25 }
 0x66b   :  { %7124 = vmatpush3.msra.mxu0 %v4742_v25 }
 0x66c   :  { %7125 = vmatprep.subr.mxu0 %v4741_v45 }
 0x66d   :  { %7126 = vmatpush3.msra.mxu0 %v4741_v45 }
 0x66e   :  { %7128 = vmatmul.mubr.msk.f32.vlgmr.msra.gmra.mxu0 %vm4750_vm7, %v10698_v50  ;;  %7149 = vmatprep.subr.mxu0 %v11399_v44 }
 0x66f   :  { %7150 = vmatpush3.msra.mxu0 %v10703_v40  ;;  %7165 = vmatprep.mubr.msk.f32.mxu0 %vm7448_vm8, %v11399_v44 }
 0x670   :  { %7151 = vmatprep.subr.mxu0 %v11399_v44 }
 0x671   :  { %7152 = vmatpush3.msra.mxu0 %v10711_v34 }
 0x672   :  { %7153 = vmatprep.subr.mxu0 %v11399_v44 }
 0x673   :  { %7154 = vmatpush3.msra.mxu0 %v10725_v23 }
 0x674   :  { %7155 = vmatprep.subr.mxu0 %v11399_v44 }
 0x675   :  { %7156 = vmatpush3.msra.mxu0 %v10739_v7 }
 0x676   :  { %7157 = vmatprep.subr.mxu0 %v11399_v44 }
 0x677   :  { %7158 = vmatpush3.msra.mxu0 %v10753_v39 }
 0x678   :  { %7159 = vmatprep.subr.mxu0 %v11399_v44 }
 0x679   :  { %7160 = vmatpush3.msra.mxu0 %v10767_v53 }
 0x67a   :  { %7161 = vmatprep.subr.mxu0 %v11399_v44 }
 0x67b   :  { %7162 = vmatpush3.msra.mxu0 %v10781_v22 }
 0x67c   :  { %7163 = vmatprep.subr.mxu0 %v11399_v44 }
 0x67d   :  { %7164 = vmatpush3.msra.mxu0 %v10791_v16 }
 0x67e   :  { %7187 = vmatprep.subr.mxu0 %v11399_v44 }
 0x72e   :  { %v7129_v13 = vpop.f32.mrf.mxu0 }
 0x72f   :  { %v4837_v41 = vrot.slane %v7129_v13, 4 }
 0x730   :  { %v4823_v61 = vpop.f32.mrf.mxu0 }
 0x731   :  { %v4833_v12 = vrot.slane %v4823_v61, 4  ;;  %v4839_v60 = vmax.f32 %v7129_v13, %v4837_v41 }
 0x733   :  { %v4835_v18 = vmax.f32 %v4823_v61, %v4833_v12 }
 0x735   :  { %v4840_v32 = vmax.f32 %v4835_v18, %v4839_v60 }
 0x737   :  { %v4841_v26 = vmax.f32 %v4840_v32, 0.0 }
 0x739   :  { %7147 = vmatmul.mubr.msk.f32.vlgmr.msra.gmra.mxu1 %vm2556_vm0, %v4841_v26  ;;  %v4932_v37 = vrot.slane %v4841_v26, 1  ;;  %v5014_v48 = vrot.slane %v4841_v26, 2  ;;  %v5096_v56 = vrot.slane %v4841_v26, 3 }
 0x73a   :  { %7169 = vmatpush3.msra.mxu1 %v10801_v51  ;;  %7184 = vmatprep.mubr.msk.f32.mxu1 %vm7448_vm8, %v11399_v44 }
 0x73b   :  { %7170 = vmatprep.subr.mxu1 %v11399_v44  ;;  %7166 = vmatmul.mubr.msk.f32.vlgmr.msra.gmra.mxu0 %vm2556_vm0, %v4932_v37 }
 0x73c   :  { %7171 = vmatpush3.msra.mxu1 %v10807_v0  ;;  %7188 = vmatpush3.msra.mxu0 %v10812_v4 }
 0x73d   :  { %7172 = vmatprep.subr.mxu1 %v11399_v44  ;;  %7189 = vmatprep.subr.mxu0 %v11399_v44 }
 0x73e   :  { %7173 = vmatpush3.msra.mxu1 %v10822_v17  ;;  %7190 = vmatpush3.msra.mxu0 %v10827_v9 }
 0x73f   :  { %7174 = vmatprep.subr.mxu1 %v11399_v44  ;;  %7191 = vmatprep.subr.mxu0 %v11399_v44 }
 0x740   :  { %7175 = vmatpush3.msra.mxu1 %v10836_v42  ;;  %7192 = vmatpush3.msra.mxu0 %v10841_v36 }
 0x741   :  { %7176 = vmatprep.subr.mxu1 %v11399_v44  ;;  %7193 = vmatprep.subr.mxu0 %v11399_v44 }
 0x742   :  { %7177 = vmatpush3.msra.mxu1 %v10850_v11  ;;  %7194 = vmatpush3.msra.mxu0 %v10855_v31 }
 0x743   :  { %7178 = vmatprep.subr.mxu1 %v11399_v44  ;;  %7195 = vmatprep.subr.mxu0 %v11399_v44 }
 0x744   :  { %7179 = vmatpush3.msra.mxu1 %v10864_v6  ;;  %7196 = vmatpush3.msra.mxu0 %v10869_v24 }
 0x745   :  { %7180 = vmatprep.subr.mxu1 %v11399_v44  ;;  %7197 = vmatprep.subr.mxu0 %v11399_v44 }
 0x746   :  { %7181 = vmatpush3.msra.mxu1 %v10878_v57  ;;  %7198 = vmatpush3.msra.mxu0 %v10883_v10 }
 0x747   :  { %7182 = vmatprep.subr.mxu1 %v11399_v44  ;;  %7199 = vmatprep.subr.mxu0 %v11399_v44 }
 0x748   :  { %7183 = vmatpush3.msra.mxu1 %v10892_v1  ;;  %7200 = vmatpush3.msra.mxu0 %v10897_v28 }
 0x749   :  { %7185 = vmatmul.mubr.msk.f32.vlgmr.msra.gmra.mxu1 %vm2556_vm0, %v5014_v48  ;;  %7201 = vmatprep.subr.mxu0 %v11399_v44 }
 0x74a   :  { %7206 = vmatprep.subr.mxu1 %v10691_v5  ;;  %7202 = vmatpush3.msra.mxu0 %v10906_v47 }
 0x74b   :  { %7203 = vmatprep.mubr.msk.f32.mxu0 %vm7448_vm8, %v11399_v44  ;;  %7207 = vmatpush3.msra.mxu1 %v10691_v5 }
 0x74c   :  { %7204 = vmatmul.mubr.msk.f32.vlgmr.msra.gmra.mxu0 %vm2556_vm0, %v5096_v56  ;;  %7208 = vmatprep.subr.mxu1 %v10693_v19 }
 0x74d   :  { %7209 = vmatpush3.msra.mxu1 %v10693_v19  ;;  %7210 = vmatprep.mubr.msk.f32.mxu1 %vm4750_vm7, %v10631_v20  ;;  %v18_v20 = vstv %s11032_s12 }
 0x74e   :  { %7211 = vmatmul.mubr.msk.f32.vlgmr.msra.gmra.mxu1 %vm4750_vm7, %v10698_v50  ;;  %7213 = vmatprep.subr.mxu0 %v11399_v44  ;;  %19 = vst [vmem:[#allocation2] sm:$0x1] %v18_v20 }
 0x74f   :  { %7214 = vmatpush3.msra.mxu0 %v10638_v46  ;;  %7232 = vmatprep.subr.mxu1 %v11399_v44 }
 0x750   :  { %7215 = vmatprep.subr.mxu0 %v11399_v44  ;;  %7233 = vmatpush3.msra.mxu1 %v10703_v40 }
 0x751   :  { %7216 = vmatpush3.msra.mxu0 %v10643_v63  ;;  %7234 = vmatprep.subr.mxu1 %v11399_v44 }
 0x752   :  { %7217 = vmatprep.subr.mxu0 %v11399_v44  ;;  %7235 = vmatpush3.msra.mxu1 %v10711_v34 }
 0x753   :  { %7218 = vmatpush3.msra.mxu0 %v10650_v58  ;;  %7236 = vmatprep.subr.mxu1 %v11399_v44 }
 0x754   :  { %7219 = vmatprep.subr.mxu0 %v11399_v44  ;;  %7237 = vmatpush3.msra.mxu1 %v10725_v23 }
 0x755   :  { %7220 = vmatpush3.msra.mxu0 %v10720_v3  ;;  %7238 = vmatprep.subr.mxu1 %v11399_v44  ;;  %v4749_v26 = vld [vmem:[#allocation2] sm:$0x1] }
 0x756   :  { %7221 = vmatprep.subr.mxu0 %v11399_v44  ;;  %7239 = vmatpush3.msra.mxu1 %v10739_v7 }
 0x757   :  { %7222 = vmatpush3.msra.mxu0 %v10734_v54  ;;  %7240 = vmatprep.subr.mxu1 %v11399_v44 }
 0x758   :  { %7223 = vmatprep.subr.mxu0 %v11399_v44  ;;  %7241 = vmatpush3.msra.mxu1 %v10753_v39 }
 0x759   :  { %7224 = vmatpush3.msra.mxu0 %v10748_v49  ;;  %7242 = vmatprep.subr.mxu1 %v11399_v44 }
 0x75a   :  { %7225 = vmatprep.subr.mxu0 %v11399_v44  ;;  %7243 = vmatpush3.msra.mxu1 %v10767_v53 }
 0x75b   :  { %7226 = vmatpush3.msra.mxu0 %v10762_v43  ;;  %7244 = vmatprep.subr.mxu1 %v11399_v44 }
 0x75c   :  { %7227 = vmatprep.subr.mxu0 %v11399_v44  ;;  %7245 = vmatpush3.msra.mxu1 %v10781_v22 }
 0x75d   :  { %7228 = vmatpush3.msra.mxu0 %v10776_v59  ;;  %7229 = vmatprep.mubr.msk.f32.mxu0 %vm7448_vm8, %v11399_v44 }
 0x75e   :  { %7246 = vmatprep.subr.mxu1 %v11399_v44  ;;  %7251 = vmatprep.subr.mxu0 %v11399_v44 }
 0x75f   :  { %7247 = vmatpush3.msra.mxu1 %v10791_v16  ;;  %7248 = vmatprep.mubr.msk.f32.mxu1 %vm7448_vm8, %v11399_v44 }
 0x760   :  { %7270 = vmatprep.subr.mxu1 %v11399_v44 }
 0x7f9   :  { %v4919_v46 = vpop.f32.mrf.mxu1 }
 0x7fa   :  { %v4923_v29 = vadd.f32 %v4919_v46, %v10968_v27 }
 0x7fb   :  { %v7148_v63 = vpop.f32.mrf.mxu1  ;;  %v5001_v58 = vpop.f32.mrf.mxu0 }
 0x7fc   :  { %v5005_v38 = vadd.f32 %v5001_v58, %v4923_v29 }
 0x7fd   :  { %v7167_v21 = vpop.f32.mrf.mxu0 }
 0x809   :  { %v5083_v52 = vpop.f32.mrf.mxu1 }
 0x80a   :  { %v5087_v14 = vadd.f32 %v5083_v52, %v5005_v38 }
 0x80b   :  { %v7186_v35 = vpop.f32.mrf.mxu1 }
 0x80c   :  { %v5165_v62 = vpop.f32.mrf.mxu0 }
 0x80d   :  { %v5169_v8 = vadd.f32 %v5165_v62, %v5087_v14 }
 0x80e   :  { %v7205_v55 = vpop.f32.mrf.mxu0  ;;  %v7212_v33 = vpop.f32.mrf.mxu1 }
 0x80f   :  { %v5170_v15 = vmax.f32 %v5169_v8, 0.0  ;;  %v5258_v2 = vrot.slane %v7212_v33, 4 }
 0x810   :  { %v5244_v25 = vpop.f32.mrf.mxu1 }
 0x811   :  { %v5171_v5 = vmul.f32 %v5170_v15, %v10974_v30  ;;  %v5254_v19 = vrot.slane %v5244_v25, 4  ;;  %v5260_v45 = vmax.f32 %v7212_v33, %v5258_v2 }
 0x813   :  { %v5256_v50 = vmax.f32 %v5244_v25, %v5254_v19  ;;  %v5173_v40 = vsel %vm5172_vm9, %v5171_v5, 0.0 }
 0x814   :  { %5174 = vadd.xlane.f32.xlu0 %v5173_v40 }
 0x815   :  { %v5261_v34 = vmax.f32 %v5256_v50, %v5260_v45 }
 0x817   :  { %v5262_v3 = vmax.f32 %v5261_v34, 0.0 }
 0x819   :  { %7230 = vmatmul.mubr.msk.f32.vlgmr.msra.gmra.mxu0 %vm2556_vm0, %v5262_v3  ;;  %v5337_v23 = vrot.slane %v5262_v3, 1  ;;  %v5411_v54 = vrot.slane %v5262_v3, 2  ;;  %v5485_v7 = vrot.slane %v5262_v3, 3 }
 0x81a   :  { %7252 = vmatpush3.msra.mxu0 %v10801_v51  ;;  %7267 = vmatprep.mubr.msk.f32.mxu0 %vm7448_vm8, %v11399_v44 }
 0x81b   :  { %7253 = vmatprep.subr.mxu0 %v11399_v44  ;;  %7249 = vmatmul.mubr.msk.f32.vlgmr.msra.gmra.mxu1 %vm2556_vm0, %v5337_v23 }
 0x81c   :  { %7254 = vmatpush3.msra.mxu0 %v10807_v0  ;;  %7271 = vmatpush3.msra.mxu1 %v10812_v4 }
 0x81d   :  { %7255 = vmatprep.subr.mxu0 %v11399_v44  ;;  %7272 = vmatprep.subr.mxu1 %v11399_v44 }
 0x81e   :  { %7256 = vmatpush3.msra.mxu0 %v10822_v17  ;;  %7273 = vmatpush3.msra.mxu1 %v10827_v9 }
 0x81f   :  { %7257 = vmatprep.subr.mxu0 %v11399_v44  ;;  %7274 = vmatprep.subr.mxu1 %v11399_v44 }
 0x820   :  { %7258 = vmatpush3.msra.mxu0 %v10836_v42  ;;  %7275 = vmatpush3.msra.mxu1 %v10841_v36 }
 0x821   :  { %7259 = vmatprep.subr.mxu0 %v11399_v44  ;;  %7276 = vmatprep.subr.mxu1 %v11399_v44 }
 0x822   :  { %7260 = vmatpush3.msra.mxu0 %v10850_v11  ;;  %7277 = vmatpush3.msra.mxu1 %v10855_v31 }
 0x823   :  { %7261 = vmatprep.subr.mxu0 %v11399_v44  ;;  %7278 = vmatprep.subr.mxu1 %v11399_v44 }
 0x824   :  { %7262 = vmatpush3.msra.mxu0 %v10864_v6  ;;  %7279 = vmatpush3.msra.mxu1 %v10869_v24 }
 0x825   :  { %7263 = vmatprep.subr.mxu0 %v11399_v44  ;;  %7280 = vmatprep.subr.mxu1 %v11399_v44 }
 0x826   :  { %7264 = vmatpush3.msra.mxu0 %v10878_v57  ;;  %7281 = vmatpush3.msra.mxu1 %v10883_v10 }
 0x827   :  { %7265 = vmatprep.subr.mxu0 %v11399_v44  ;;  %7282 = vmatprep.subr.mxu1 %v11399_v44 }
 0x828   :  { %7266 = vmatpush3.msra.mxu0 %v10892_v1  ;;  %7283 = vmatpush3.msra.mxu1 %v10897_v28 }
 0x829   :  { %7268 = vmatmul.mubr.msk.f32.vlgmr.msra.gmra.mxu0 %vm2556_vm0, %v5411_v54  ;;  %7284 = vmatprep.subr.mxu1 %v11399_v44 }
 0x82a   :  { %7285 = vmatpush3.msra.mxu1 %v10906_v47  ;;  %7286 = vmatprep.mubr.msk.f32.mxu1 %vm7448_vm8, %v11399_v44 }
 0x82b   :  { %7287 = vmatmul.mubr.msk.f32.vlgmr.msra.gmra.mxu1 %vm2556_vm0, %v5485_v7 }
 0x89d   :  { %v5175_v51 = vpop.xlane.xlu0 %5174 }
 0x89e   :  { %v5176_v0 = vadd.f32 %v5175_v51, %v4749_v26 }
 0x8a0   :  { %v5177_v9 = vmax.f32 %v5176_v0, 0.0 }
 0x8d9   :  { %v5332_v49 = vpop.f32.mrf.mxu0 }
 0x8da   :  { %v5336_v59 = vadd.f32 %v5332_v49, %v10968_v27 }
 0x8db   :  { %v7231_v39 = vpop.f32.mrf.mxu0  ;;  %v5406_v43 = vpop.f32.mrf.mxu1 }
 0x8dc   :  { %v5410_v22 = vadd.f32 %v5406_v43, %v5336_v59 }
 0x8dd   :  { %v7250_v53 = vpop.f32.mrf.mxu1 }
 0x8e9   :  { %v5480_v16 = vpop.f32.mrf.mxu0 }
 0x8ea   :  { %v5484_v13 = vadd.f32 %v5480_v16, %v5410_v22 }
 0x8eb   :  { %v7269_v41 = vpop.f32.mrf.mxu0  ;;  %v5554_v61 = vpop.f32.mrf.mxu1 }
 0x8ec   :  { %v5558_v12 = vadd.f32 %v5554_v61, %v5484_v13 }
 0x8ed   :  { %v7288_v60 = vpop.f32.mrf.mxu1 }
 0x8ee   :  { %v5559_v18 = vmax.f32 %v5558_v12, 0.0 }
 0x8f0   :  { %v5560_v32 = vmul.f32 %v5559_v18, %v10974_v30 }
 0x8f2   :  { %v5561_v44 = vsel %vm5172_vm9, %v5560_v32, 0.0 }
 0x8f3   :  { %5562 = vadd.xlane.f32.xlu1 %v5561_v44 }
 0x97c   :  { %v5563_v37 = vpop.xlane.xlu1 %5562 }
 0x97d   :  { %v5564_v4 = vadd.f32 %v5563_v37, %v4749_v26 }
 0x97f   :  { %v5565_v17 = vmax.f32 %v5564_v4, 0.0 }
 0x981   :  { %v5567_v42 = vrot.slane %v5565_v17, 7 }
 0x983   :  { %v5570_v36 = vsel %vm5569_vm10, %v5177_v9, %v5567_v42 }
 0x984   :  { %5572 = vst.msk [vmem:[%s11035_s13] sm:$0x3] %vm5571_vm11, %v5570_v36 }

</bundles_post_ra>
